<compile_context>
chip_gen: v6e
topology: v6e:2x2x1
jax: 0.10.0
libtpu: 0.0.40
codegen_flags: <defaults>
</compile_context>

<pallas_src>
import functools

import jax
import jax.numpy as jnp
from jax.experimental import pallas as pl
from jax.experimental.pallas import tpu as pltpu

EPS = 1e-5  # torch.nn.LayerNorm default


def _gelu_tanh(x):
    c = jnp.sqrt(2.0 / jnp.pi).astype(x.dtype)
    return 0.5 * x * (1.0 + jnp.tanh(c * (x + 0.044715 * x * x * x)))


def _ln_nogain(x):
    mu = jnp.mean(x, axis=-1, keepdims=True)
    var = jnp.mean((x - mu) ** 2, axis=-1, keepdims=True)
    return (x - mu) * jax.lax.rsqrt(var + EPS)


# ---------------------------------------------------------------------------
# Fused kernel: norm1 + window MSA (+rel-pos bias) + proj + residual
#               + norm2 + FFN(GELU) + residual. One step, B folded into rows.
# Row order: (b, window_row, window_col, token_in_window)  (window-partitioned).
# ---------------------------------------------------------------------------
def swin_block_kernel(x_ref, wmat_ref, pvec_ref, bias_ref, o_ref, *,
                      num_heads, head_dim, num_windows, win_tokens, hidden):
    nh, hd, nW, N = num_heads, head_dim, num_windows, win_tokens
    C = nh * hd
    M = nW * N

    x = x_ref[...]                                            # (M, C) f32

    # ---- norm1 (affine folded into wqkv/bqkv) + fused QKV projection ------
    xn = _ln_nogain(x).astype(jnp.bfloat16)
    qkv = jnp.dot(xn, wmat_ref[0:C, 0:3 * C],
                  preferred_element_type=jnp.float32)
    qkv = qkv + pvec_ref[0:1, 0:3 * C]                        # (M, 3C) f32

    # ---- gather heads into a single (nh*nW, N, hd) batch -------------------
    def heads(base):
        return jnp.concatenate(
            [qkv[:, base + h * hd: base + (h + 1) * hd].reshape(nW, N, hd)
             for h in range(nh)], axis=0).astype(jnp.bfloat16)

    q_b, k_b, v_b = heads(0), heads(C), heads(2 * C)          # (nh*nW, N, hd)

    # ---- one batched score matmul + bias + one softmax chain --------------
    s = jnp.einsum("bqd,bkd->bqk", q_b, k_b,
                   preferred_element_type=jnp.float32)        # (nh*nW, N, N)
    s = s + bias_ref[...]                                     # rel-pos bias (q scale folded in Wq)

    m = jnp.max(s, axis=-1, keepdims=True)
    e = jnp.exp(s - m)
    # approximate EUP reciprocal: rows sum to 1 only to ~1e-3 (within test tol)
    p = (e * pl.reciprocal(jnp.sum(e, axis=-1, keepdims=True), approx=True)
         ).astype(jnp.bfloat16)

    o_b = jnp.einsum("bqk,bkd->bqd", p, v_b,
                     preferred_element_type=jnp.float32)      # (nh*nW, N, hd)

    attn = jnp.concatenate(
        [o_b[h * nW:(h + 1) * nW].reshape(M, hd) for h in range(nh)], axis=-1)

    attn = jnp.dot(attn.astype(jnp.bfloat16), wmat_ref[C:2 * C, 0:C],
                   preferred_element_type=jnp.float32) + pvec_ref[1:2, 0:C]

    x1 = x + attn

    # ---- norm2 (affine folded into w1/b1) + FFN + residual -----------------
    xn2 = _ln_nogain(x1).astype(jnp.bfloat16)
    h1 = jnp.dot(xn2, wmat_ref[2 * C:3 * C, 0:hidden],
                 preferred_element_type=jnp.float32) + pvec_ref[2:3, 0:hidden]
    h1 = _gelu_tanh(h1).astype(jnp.bfloat16)
    y = jnp.dot(h1, wmat_ref[3 * C:3 * C + hidden, 0:C],
                preferred_element_type=jnp.float32) + pvec_ref[3:4, 0:C]

    o_ref[...] = x1 + y


# ---------------------------------------------------------------------------
# Glue (plain JAX)
# ---------------------------------------------------------------------------
def window_partition(x, H, W, ws):
    B, L, C = x.shape
    x = x.reshape(B, H // ws, ws, W // ws, ws, C)
    x = x.transpose(0, 1, 3, 2, 4, 5)
    return x.reshape(-1, ws * ws, C)


def window_reverse(windows, H, W, ws, B):
    C = windows.shape[-1]
    x = windows.reshape(B, H // ws, W // ws, ws, ws, C)
    x = x.transpose(0, 1, 3, 2, 4, 5)
    return x.reshape(B, H * W, C)


def _full(shape):
    return pl.BlockSpec(shape, lambda *_: (0,) * len(shape))


def swin_block_forward(x, hw_shape, p):
    B, L, C = x.shape
    H, W = hw_shape
    ws = p["window_size"]
    nh = p["num_heads"]
    hd = C // nh
    N = ws * ws
    nW = B * (H // ws) * (W // ws)      # total windows (batch folded in)
    M = nW * N                          # total tokens
    hidden = p["w1"].shape[-1]
    scale = float(hd) ** -0.5
    WCOL = 128                          # lane-padded width of packed params

    # ---- constant-fold LayerNorm affines + q scale into the weights -------
    g1 = p["g1"].reshape(C)
    be1 = p["be1"].reshape(C)
    g2 = p["g2"].reshape(C)
    be2 = p["be2"].reshape(C)

    wqkv = p["wqkv"] * g1[:, None]
    bqkv = p["bqkv"].reshape(3 * C) + be1 @ p["wqkv"]
    qscale = jnp.concatenate(
        [jnp.full((C,), scale, jnp.float32), jnp.ones((2 * C,), jnp.float32)])
    wqkv = wqkv * qscale[None, :]
    bqkv = bqkv * qscale

    w1 = p["w1"] * g2[:, None]
    b1 = p["b1"].reshape(hidden) + be2 @ p["w1"]

    # ---- pack matrices (bf16) and bias vectors (f32) into two slabs -------
    def pad2(a, cols):
        return jnp.pad(a, ((0, 0), (0, cols - a.shape[1])))

    wmat = jnp.concatenate([
        pad2(wqkv, WCOL),                       # rows [0, C)
        pad2(p["wproj"], WCOL),                 # rows [C, 2C)
        pad2(w1, WCOL),                         # rows [2C, 3C)
        pad2(p["w2"], WCOL),                    # rows [3C, 3C+hidden)
    ], axis=0).astype(jnp.bfloat16)

    def vrow(v):
        return jnp.pad(v.reshape(1, -1), ((0, 0), (0, WCOL - v.size)))

    pvec = jnp.concatenate([
        vrow(bqkv), vrow(p["bp"].reshape(C)), vrow(b1), vrow(p["b2"].reshape(C)),
        jnp.zeros((4, WCOL), jnp.float32),
    ], axis=0).astype(jnp.float32)              # (8, 128)

    # pre-expanded relative position bias, matching (head, window) batch order
    bias_exp = jnp.repeat(p["rel_bias"], nW, axis=0).astype(jnp.float32)  # (nh*nW, N, N)

    # window partition in the wrapper; batch folded into the token rows
    xw = window_partition(x, H, W, ws).reshape(M, C)

    out = pl.pallas_call(
        functools.partial(swin_block_kernel, num_heads=nh, head_dim=hd,
                          num_windows=nW, win_tokens=N, hidden=hidden),
        out_shape=jax.ShapeDtypeStruct((M, C), jnp.float32),
        grid=(1,),
        in_specs=[_full((M, C)), _full(wmat.shape), _full(pvec.shape),
                  _full(bias_exp.shape)],
        out_specs=_full((M, C)),
        compiler_params=pltpu.CompilerParams(dimension_semantics=("arbitrary",)),
    )(xw, wmat, pvec, bias_exp)

    return window_reverse(out.reshape(nW, N, C), H, W, ws, B)


# ---------------------------------------------------------------------------
# Pure-JAX reference (mirrors the PyTorch forward, unfolded params)
# ---------------------------------------------------------------------------
def swin_block_reference(x, hw_shape, p):
    B, L, C = x.shape
    H, W = hw_shape
    ws = p["window_size"]
    nh = p["num_heads"]
    hd = C // nh
    N = ws * ws
    scale = float(hd) ** -0.5

    def ln(v, g, b):
        mu = jnp.mean(v, axis=-1, keepdims=True)
        var = jnp.mean((v - mu) ** 2, axis=-1, keepdims=True)
        return (v - mu) * jax.lax.rsqrt(var + EPS) * g + b

    identity = x
    xn = ln(x, p["g1"], p["be1"])
    xw = window_partition(xn, H, W, ws)                       # (nW, N, C)
    nW = xw.shape[0]
    qkv = xw @ p["wqkv"] + p["bqkv"]                          # (nW, N, 3C)
    qkv = qkv.reshape(nW, N, 3, nh, hd).transpose(2, 0, 3, 1, 4)
    q, k, v = qkv[0] * scale, qkv[1], qkv[2]                  # (nW, nh, N, hd)
    attn = q @ k.transpose(0, 1, 3, 2)
    attn = attn + p["rel_bias"][None]
    attn = jax.nn.softmax(attn, axis=-1)
    out = (attn @ v).transpose(0, 2, 1, 3).reshape(nW, N, C)
    out = out @ p["wproj"] + p["bp"]
    out = window_reverse(out, H, W, ws, B)
    x = identity + out

    identity = x
    xn = ln(x, p["g2"], p["be2"])
    h = _gelu_tanh(xn @ p["w1"] + p["b1"])
    y = h @ p["w2"] + p["b2"]
    return identity + y


# ---------------------------------------------------------------------------
def make_params(key, C, nh, ws, hidden):
    N = ws * ws
    ks = jax.random.split(key, 12)
    s = 0.05

    g1 = 1.0 + 0.1 * jax.random.normal(ks[0], (1, C), jnp.float32)
    be1 = 0.1 * jax.random.normal(ks[1], (1, C), jnp.float32)
    g2 = 1.0 + 0.1 * jax.random.normal(ks[2], (1, C), jnp.float32)
    be2 = 0.1 * jax.random.normal(ks[3], (1, C), jnp.float32)

    wqkv = s * jax.random.normal(ks[4], (C, 3 * C), jnp.float32)
    bqkv = s * jax.random.normal(ks[5], (1, 3 * C), jnp.float32)
    wproj = s * jax.random.normal(ks[6], (C, C), jnp.float32)
    bproj = s * jax.random.normal(ks[7], (1, C), jnp.float32)

    w1 = s * jax.random.normal(ks[8], (C, hidden), jnp.float32)
    b1 = s * jax.random.normal(ks[9], (1, hidden), jnp.float32)
    w2 = s * jax.random.normal(ks[10], (hidden, C), jnp.float32)
    b2 = s * jax.random.normal(ks[11], (1, C), jnp.float32)

    # relative position bias table (learnable -> random init) + index gather
    table = s * jax.random.normal(jax.random.fold_in(key, 99),
                                  ((2 * ws - 1) * (2 * ws - 1), nh), jnp.float32)
    seq1 = jnp.arange(0, (2 * ws - 1) * ws, 2 * ws - 1)
    seq2 = jnp.arange(0, ws)
    coords = (seq1[:, None] + seq2[None, :]).reshape(1, -1)   # doublestepseq
    rel_index = coords + coords.T
    rel_index = rel_index[:, ::-1]                            # .flip(1)
    rel_bias = table[rel_index.reshape(-1)].reshape(N, N, nh).transpose(2, 0, 1)

    return dict(
        window_size=ws, num_heads=nh,
        g1=g1, be1=be1, g2=g2, be2=be2,
        wqkv=wqkv, bqkv=bqkv, wproj=wproj, bp=bproj,
        rel_bias=rel_bias,
        w1=w1, b1=b1, w2=w2, b2=b2,
    )


if __name__ == "__main__":
    B, H, W, C = 2, 8, 8, 32
    nh, ws, hidden = 4, 4, 64
    L = H * W

    key = jax.random.PRNGKey(0)
    kx, kp = jax.random.split(key)
    x = jax.random.normal(kx, (B, L, C), jnp.float32)
    params = make_params(kp, C, nh, ws, hidden)

    out = swin_block_forward(x, (H, W), params)
    out = jax.block_until_ready(out)

    ref = swin_block_reference(x, (H, W), params)
    assert out.shape == (B, L, C)
    assert jnp.allclose(out, ref, rtol=2e-2, atol=2e-2), "mismatch vs reference"

    print("KERNEL_OK")
</pallas_src>

<mosaic_0001>
module attributes {stable_mosaic.version = 11 : i64} {
  func.func @swin_block_kernel(%arg0: i32, %arg1: memref<128x32xf32, #tpu.memory_space<vmem>>, %arg2: memref<160x128xbf16, #tpu.memory_space<vmem>>, %arg3: memref<8x128xf32, #tpu.memory_space<vmem>>, %arg4: memref<32x16x16xf32, #tpu.memory_space<vmem>>, %arg5: memref<128x32xf32, #tpu.memory_space<vmem>>) attributes {dimension_semantics = [#tpu.dimension_semantics<arbitrary>], iteration_bounds = array<i64: 1>, scalar_prefetch = 0 : i64, scratch_operands = 0 : i64, tpu.core_type = #tpu.core_type<tc>, window_params = [{pipeline_mode = #tpu.pipeline_mode<synchronous>, transform_indices = @transform_0, window_bounds = array<i64: 128, 32>}, {pipeline_mode = #tpu.pipeline_mode<synchronous>, transform_indices = @transform_1, window_bounds = array<i64: 160, 128>}, {pipeline_mode = #tpu.pipeline_mode<synchronous>, transform_indices = @transform_2, window_bounds = array<i64: 8, 128>}, {pipeline_mode = #tpu.pipeline_mode<synchronous>, transform_indices = @transform_3, window_bounds = array<i64: 32, 16, 16>}, {pipeline_mode = #tpu.pipeline_mode<synchronous>, transform_indices = @transform_4, window_bounds = array<i64: 128, 32>}]} {
    %c0 = arith.constant 0 : index
    %c0_0 = arith.constant 0 : index
    %0 = vector.load %arg1[%c0, %c0_0] : memref<128x32xf32, #tpu.memory_space<vmem>>, vector<128x32xf32>
    %cst = arith.constant dense<0.000000e+00> : vector<128xf32>
    %1 = vector.multi_reduction <add>, %0, %cst [1] : vector<128x32xf32> to vector<128xf32>
    %2 = vector.shape_cast %1 : vector<128xf32> to vector<128x1xf32>
    %cst_1 = arith.constant 3.200000e+01 : f32
    %3 = vector.broadcast %cst_1 : f32 to vector<128x1xf32>
    %4 = arith.divf %2, %3 : vector<128x1xf32>
    %5 = vector.broadcast %4 : vector<128x1xf32> to vector<128x32xf32>
    %6 = arith.subf %0, %5 : vector<128x32xf32>
    %7 = arith.mulf %6, %6 : vector<128x32xf32>
    %cst_2 = arith.constant dense<0.000000e+00> : vector<128xf32>
    %8 = vector.multi_reduction <add>, %7, %cst_2 [1] : vector<128x32xf32> to vector<128xf32>
    %9 = vector.shape_cast %8 : vector<128xf32> to vector<128x1xf32>
    %cst_3 = arith.constant 3.200000e+01 : f32
    %10 = vector.broadcast %cst_3 : f32 to vector<128x1xf32>
    %11 = arith.divf %9, %10 : vector<128x1xf32>
    %12 = vector.broadcast %4 : vector<128x1xf32> to vector<128x32xf32>
    %13 = arith.subf %0, %12 : vector<128x32xf32>
    %cst_4 = arith.constant 9.99999974E-6 : f32
    %14 = vector.broadcast %cst_4 : f32 to vector<128x1xf32>
    %15 = arith.addf %11, %14 : vector<128x1xf32>
    %16 = math.rsqrt %15 : vector<128x1xf32>
    %17 = vector.broadcast %16 : vector<128x1xf32> to vector<128x32xf32>
    %18 = arith.mulf %13, %17 : vector<128x32xf32>
    %19 = arith.truncf %18 : vector<128x32xf32> to vector<128x32xbf16>
    %c0_5 = arith.constant 0 : index
    %c0_6 = arith.constant 0 : index
    %20 = vector.load %arg2[%c0_5, %c0_6] : memref<160x128xbf16, #tpu.memory_space<vmem>>, vector<32x96xbf16>
    %cst_7 = arith.constant dense<0.000000e+00> : vector<128x96xf32>
    %21 = tpu.matmul %19, %20, %cst_7 {dimension_numbers = #tpu.dot_dimension_numbers<[1], [0], [0], [1], [0, 0, 1, 1], [], []>} : vector<128x32xbf16>, vector<32x96xbf16>, vector<128x96xf32> -> vector<128x96xf32>
    %c0_8 = arith.constant 0 : index
    %c0_9 = arith.constant 0 : index
    %22 = vector.load %arg3[%c0_8, %c0_9] : memref<8x128xf32, #tpu.memory_space<vmem>>, vector<1x96xf32>
    %23 = vector.broadcast %22 : vector<1x96xf32> to vector<128x96xf32>
    %24 = arith.addf %21, %23 : vector<128x96xf32>
    %25 = vector.extract_strided_slice %24 {offsets = [0, 0], sizes = [128, 8], strides = [1, 1]} : vector<128x96xf32> to vector<128x8xf32>
    %26 = vector.shape_cast %25 : vector<128x8xf32> to vector<8x16x8xf32>
    %27 = vector.extract_strided_slice %24 {offsets = [0, 8], sizes = [128, 8], strides = [1, 1]} : vector<128x96xf32> to vector<128x8xf32>
    %28 = vector.shape_cast %27 : vector<128x8xf32> to vector<8x16x8xf32>
    %29 = vector.extract_strided_slice %24 {offsets = [0, 16], sizes = [128, 8], strides = [1, 1]} : vector<128x96xf32> to vector<128x8xf32>
    %30 = vector.shape_cast %29 : vector<128x8xf32> to vector<8x16x8xf32>
    %31 = vector.extract_strided_slice %24 {offsets = [0, 24], sizes = [128, 8], strides = [1, 1]} : vector<128x96xf32> to vector<128x8xf32>
    %32 = vector.shape_cast %31 : vector<128x8xf32> to vector<8x16x8xf32>
    %33 = tpu.concatenate %26, %28, %30, %32 in 0 : vector<8x16x8xf32>, vector<8x16x8xf32>, vector<8x16x8xf32>, vector<8x16x8xf32> -> vector<32x16x8xf32>
    %34 = arith.truncf %33 : vector<32x16x8xf32> to vector<32x16x8xbf16>
    %35 = vector.extract_strided_slice %24 {offsets = [0, 32], sizes = [128, 8], strides = [1, 1]} : vector<128x96xf32> to vector<128x8xf32>
    %36 = vector.shape_cast %35 : vector<128x8xf32> to vector<8x16x8xf32>
    %37 = vector.extract_strided_slice %24 {offsets = [0, 40], sizes = [128, 8], strides = [1, 1]} : vector<128x96xf32> to vector<128x8xf32>
    %38 = vector.shape_cast %37 : vector<128x8xf32> to vector<8x16x8xf32>
    %39 = vector.extract_strided_slice %24 {offsets = [0, 48], sizes = [128, 8], strides = [1, 1]} : vector<128x96xf32> to vector<128x8xf32>
    %40 = vector.shape_cast %39 : vector<128x8xf32> to vector<8x16x8xf32>
    %41 = vector.extract_strided_slice %24 {offsets = [0, 56], sizes = [128, 8], strides = [1, 1]} : vector<128x96xf32> to vector<128x8xf32>
    %42 = vector.shape_cast %41 : vector<128x8xf32> to vector<8x16x8xf32>
    %43 = tpu.concatenate %36, %38, %40, %42 in 0 : vector<8x16x8xf32>, vector<8x16x8xf32>, vector<8x16x8xf32>, vector<8x16x8xf32> -> vector<32x16x8xf32>
    %44 = arith.truncf %43 : vector<32x16x8xf32> to vector<32x16x8xbf16>
    %45 = vector.extract_strided_slice %24 {offsets = [0, 64], sizes = [128, 8], strides = [1, 1]} : vector<128x96xf32> to vector<128x8xf32>
    %46 = vector.shape_cast %45 : vector<128x8xf32> to vector<8x16x8xf32>
    %47 = vector.extract_strided_slice %24 {offsets = [0, 72], sizes = [128, 8], strides = [1, 1]} : vector<128x96xf32> to vector<128x8xf32>
    %48 = vector.shape_cast %47 : vector<128x8xf32> to vector<8x16x8xf32>
    %49 = vector.extract_strided_slice %24 {offsets = [0, 80], sizes = [128, 8], strides = [1, 1]} : vector<128x96xf32> to vector<128x8xf32>
    %50 = vector.shape_cast %49 : vector<128x8xf32> to vector<8x16x8xf32>
    %51 = vector.extract_strided_slice %24 {offsets = [0, 88], sizes = [128, 8], strides = [1, 1]} : vector<128x96xf32> to vector<128x8xf32>
    %52 = vector.shape_cast %51 : vector<128x8xf32> to vector<8x16x8xf32>
    %53 = tpu.concatenate %46, %48, %50, %52 in 0 : vector<8x16x8xf32>, vector<8x16x8xf32>, vector<8x16x8xf32>, vector<8x16x8xf32> -> vector<32x16x8xf32>
    %54 = arith.truncf %53 : vector<32x16x8xf32> to vector<32x16x8xbf16>
    "tpu.trace_start"() <{level = 10 : i32, message = "bqd,bkd->bqk"}> : () -> ()
    %cst_10 = arith.constant dense<0.000000e+00> : vector<32x16x16xf32>
    %55 = tpu.matmul %34, %44, %cst_10 {dimension_numbers = #tpu.dot_dimension_numbers<[2], [2], [1], [1], [0, 0, 0, 1, 1, 1], [0], [0]>} : vector<32x16x8xbf16>, vector<32x16x8xbf16>, vector<32x16x16xf32> -> vector<32x16x16xf32>
    "tpu.trace_stop"() : () -> ()
    %c0_11 = arith.constant 0 : index
    %c0_12 = arith.constant 0 : index
    %c0_13 = arith.constant 0 : index
    %56 = vector.load %arg4[%c0_11, %c0_12, %c0_13] : memref<32x16x16xf32, #tpu.memory_space<vmem>>, vector<32x16x16xf32>
    %57 = arith.addf %55, %56 : vector<32x16x16xf32>
    %cst_14 = arith.constant dense<0xFF800000> : vector<32x16xf32>
    %58 = vector.multi_reduction <maximumf>, %57, %cst_14 [2] : vector<32x16x16xf32> to vector<32x16xf32>
    %59 = vector.shape_cast %58 : vector<32x16xf32> to vector<32x16x1xf32>
    %60 = vector.broadcast %59 : vector<32x16x1xf32> to vector<32x16x16xf32>
    %61 = arith.subf %57, %60 : vector<32x16x16xf32>
    %62 = math.exp %61 : vector<32x16x16xf32>
    %cst_15 = arith.constant dense<0.000000e+00> : vector<32x16xf32>
    %63 = vector.multi_reduction <add>, %62, %cst_15 [2] : vector<32x16x16xf32> to vector<32x16xf32>
    %64 = vector.shape_cast %63 : vector<32x16xf32> to vector<32x16x1xf32>
    %65 = tpu.reciprocal %64 {approx = true} : vector<32x16x1xf32> -> vector<32x16x1xf32>
    %66 = vector.broadcast %65 : vector<32x16x1xf32> to vector<32x16x16xf32>
    %67 = arith.mulf %62, %66 : vector<32x16x16xf32>
    %68 = arith.truncf %67 : vector<32x16x16xf32> to vector<32x16x16xbf16>
    "tpu.trace_start"() <{level = 10 : i32, message = "bqk,bkd->bqd"}> : () -> ()
    %cst_16 = arith.constant dense<0.000000e+00> : vector<32x16x8xf32>
    %69 = tpu.matmul %68, %54, %cst_16 {dimension_numbers = #tpu.dot_dimension_numbers<[2], [1], [1], [2], [0, 0, 0, 1, 1, 2], [0], [0]>} : vector<32x16x16xbf16>, vector<32x16x8xbf16>, vector<32x16x8xf32> -> vector<32x16x8xf32>
    "tpu.trace_stop"() : () -> ()
    %70 = vector.extract_strided_slice %69 {offsets = [0, 0, 0], sizes = [8, 16, 8], strides = [1, 1, 1]} : vector<32x16x8xf32> to vector<8x16x8xf32>
    %71 = vector.shape_cast %70 : vector<8x16x8xf32> to vector<128x8xf32>
    %72 = vector.extract_strided_slice %69 {offsets = [8, 0, 0], sizes = [8, 16, 8], strides = [1, 1, 1]} : vector<32x16x8xf32> to vector<8x16x8xf32>
    %73 = vector.shape_cast %72 : vector<8x16x8xf32> to vector<128x8xf32>
    %74 = vector.extract_strided_slice %69 {offsets = [16, 0, 0], sizes = [8, 16, 8], strides = [1, 1, 1]} : vector<32x16x8xf32> to vector<8x16x8xf32>
    %75 = vector.shape_cast %74 : vector<8x16x8xf32> to vector<128x8xf32>
    %76 = vector.extract_strided_slice %69 {offsets = [24, 0, 0], sizes = [8, 16, 8], strides = [1, 1, 1]} : vector<32x16x8xf32> to vector<8x16x8xf32>
    %77 = vector.shape_cast %76 : vector<8x16x8xf32> to vector<128x8xf32>
    %78 = tpu.concatenate %71, %73, %75, %77 in 1 : vector<128x8xf32>, vector<128x8xf32>, vector<128x8xf32>, vector<128x8xf32> -> vector<128x32xf32>
    %79 = arith.truncf %78 : vector<128x32xf32> to vector<128x32xbf16>
    %c32 = arith.constant 32 : index
    %c0_17 = arith.constant 0 : index
    %80 = vector.load %arg2[%c32, %c0_17] : memref<160x128xbf16, #tpu.memory_space<vmem>>, vector<32x32xbf16>
    %cst_18 = arith.constant dense<0.000000e+00> : vector<128x32xf32>
    %81 = tpu.matmul %79, %80, %cst_18 {dimension_numbers = #tpu.dot_dimension_numbers<[1], [0], [0], [1], [0, 0, 1, 1], [], []>} : vector<128x32xbf16>, vector<32x32xbf16>, vector<128x32xf32> -> vector<128x32xf32>
    %c1 = arith.constant 1 : index
    %c0_19 = arith.constant 0 : index
    %82 = vector.load %arg3[%c1, %c0_19] : memref<8x128xf32, #tpu.memory_space<vmem>>, vector<1x32xf32>
    %83 = vector.broadcast %82 : vector<1x32xf32> to vector<128x32xf32>
    %84 = arith.addf %81, %83 : vector<128x32xf32>
    %85 = arith.addf %0, %84 : vector<128x32xf32>
    %cst_20 = arith.constant dense<0.000000e+00> : vector<128xf32>
    %86 = vector.multi_reduction <add>, %85, %cst_20 [1] : vector<128x32xf32> to vector<128xf32>
    %87 = vector.shape_cast %86 : vector<128xf32> to vector<128x1xf32>
    %cst_21 = arith.constant 3.200000e+01 : f32
    %88 = vector.broadcast %cst_21 : f32 to vector<128x1xf32>
    %89 = arith.divf %87, %88 : vector<128x1xf32>
    %90 = vector.broadcast %89 : vector<128x1xf32> to vector<128x32xf32>
    %91 = arith.subf %85, %90 : vector<128x32xf32>
    %92 = arith.mulf %91, %91 : vector<128x32xf32>
    %cst_22 = arith.constant dense<0.000000e+00> : vector<128xf32>
    %93 = vector.multi_reduction <add>, %92, %cst_22 [1] : vector<128x32xf32> to vector<128xf32>
    %94 = vector.shape_cast %93 : vector<128xf32> to vector<128x1xf32>
    %cst_23 = arith.constant 3.200000e+01 : f32
    %95 = vector.broadcast %cst_23 : f32 to vector<128x1xf32>
    %96 = arith.divf %94, %95 : vector<128x1xf32>
    %97 = vector.broadcast %89 : vector<128x1xf32> to vector<128x32xf32>
    %98 = arith.subf %85, %97 : vector<128x32xf32>
    %cst_24 = arith.constant 9.99999974E-6 : f32
    %99 = vector.broadcast %cst_24 : f32 to vector<128x1xf32>
    %100 = arith.addf %96, %99 : vector<128x1xf32>
    %101 = math.rsqrt %100 : vector<128x1xf32>
    %102 = vector.broadcast %101 : vector<128x1xf32> to vector<128x32xf32>
    %103 = arith.mulf %98, %102 : vector<128x32xf32>
    %104 = arith.truncf %103 : vector<128x32xf32> to vector<128x32xbf16>
    %c64 = arith.constant 64 : index
    %c0_25 = arith.constant 0 : index
    %105 = vector.load %arg2[%c64, %c0_25] : memref<160x128xbf16, #tpu.memory_space<vmem>>, vector<32x64xbf16>
    %cst_26 = arith.constant dense<0.000000e+00> : vector<128x64xf32>
    %106 = tpu.matmul %104, %105, %cst_26 {dimension_numbers = #tpu.dot_dimension_numbers<[1], [0], [0], [1], [0, 0, 1, 1], [], []>} : vector<128x32xbf16>, vector<32x64xbf16>, vector<128x64xf32> -> vector<128x64xf32>
    %c2 = arith.constant 2 : index
    %c0_27 = arith.constant 0 : index
    %107 = vector.load %arg3[%c2, %c0_27] : memref<8x128xf32, #tpu.memory_space<vmem>>, vector<1x64xf32>
    %108 = vector.broadcast %107 : vector<1x64xf32> to vector<128x64xf32>
    %109 = arith.addf %106, %108 : vector<128x64xf32>
    %cst_28 = arith.constant 0.636619746 : f32
    %110 = math.sqrt %cst_28 : f32
    %cst_29 = arith.constant 5.000000e-01 : f32
    %111 = vector.broadcast %cst_29 : f32 to vector<128x64xf32>
    %112 = arith.mulf %111, %109 : vector<128x64xf32>
    %cst_30 = arith.constant 4.471500e-02 : f32
    %113 = vector.broadcast %cst_30 : f32 to vector<128x64xf32>
    %114 = arith.mulf %113, %109 : vector<128x64xf32>
    %115 = arith.mulf %114, %109 : vector<128x64xf32>
    %116 = arith.mulf %115, %109 : vector<128x64xf32>
    %117 = arith.addf %109, %116 : vector<128x64xf32>
    %118 = vector.broadcast %110 : f32 to vector<128x64xf32>
    %119 = arith.mulf %118, %117 : vector<128x64xf32>
    %120 = math.tanh %119 : vector<128x64xf32>
    %cst_31 = arith.constant 1.000000e+00 : f32
    %121 = vector.broadcast %cst_31 : f32 to vector<128x64xf32>
    %122 = arith.addf %121, %120 : vector<128x64xf32>
    %123 = arith.mulf %112, %122 : vector<128x64xf32>
    %124 = arith.truncf %123 : vector<128x64xf32> to vector<128x64xbf16>
    %c96 = arith.constant 96 : index
    %c0_32 = arith.constant 0 : index
    %125 = vector.load %arg2[%c96, %c0_32] : memref<160x128xbf16, #tpu.memory_space<vmem>>, vector<64x32xbf16>
    %cst_33 = arith.constant dense<0.000000e+00> : vector<128x32xf32>
    %126 = tpu.matmul %124, %125, %cst_33 {dimension_numbers = #tpu.dot_dimension_numbers<[1], [0], [0], [1], [0, 0, 1, 1], [], []>} : vector<128x64xbf16>, vector<64x32xbf16>, vector<128x32xf32> -> vector<128x32xf32>
    %c3 = arith.constant 3 : index
    %c0_34 = arith.constant 0 : index
    %127 = vector.load %arg3[%c3, %c0_34] : memref<8x128xf32, #tpu.memory_space<vmem>>, vector<1x32xf32>
    %128 = vector.broadcast %127 : vector<1x32xf32> to vector<128x32xf32>
    %129 = arith.addf %126, %128 : vector<128x32xf32>
    %130 = arith.addf %85, %129 : vector<128x32xf32>
    %c0_35 = arith.constant 0 : index
    %c0_36 = arith.constant 0 : index
    %131 = vector.load %arg5[%c0_35, %c0_36] : memref<128x32xf32, #tpu.memory_space<vmem>>, vector<128x32xf32>
    tpu.vector_store %arg5[%c0_35, %c0_36], %130 {strides = array<i32>} : memref<128x32xf32, #tpu.memory_space<vmem>>, vector<128x32xf32>,
    return
  }
  func.func @transform_0(%arg0: i32) -> (i32, i32) {
    %c0_i32 = arith.constant 0 : i32
    %c0_i32_0 = arith.constant 0 : i32
    %c0_i32_1 = arith.constant 0 : i32
    return %c0_i32, %c0_i32_0 : i32, i32
  }
  func.func @transform_1(%arg0: i32) -> (i32, i32) {
    %c0_i32 = arith.constant 0 : i32
    %c0_i32_0 = arith.constant 0 : i32
    %c0_i32_1 = arith.constant 0 : i32
    return %c0_i32, %c0_i32_0 : i32, i32
  }
  func.func @transform_2(%arg0: i32) -> (i32, i32) {
    %c0_i32 = arith.constant 0 : i32
    %c0_i32_0 = arith.constant 0 : i32
    %c0_i32_1 = arith.constant 0 : i32
    return %c0_i32, %c0_i32_0 : i32, i32
  }
  func.func @transform_3(%arg0: i32) -> (i32, i32, i32) {
    %c0_i32 = arith.constant 0 : i32
    %c0_i32_0 = arith.constant 0 : i32
    %c0_i32_1 = arith.constant 0 : i32
    %c0_i32_2 = arith.constant 0 : i32
    return %c0_i32, %c0_i32_0, %c0_i32_1 : i32, i32, i32
  }
  func.func @transform_4(%arg0: i32) -> (i32, i32) {
    %c0_i32 = arith.constant 0 : i32
    %c0_i32_0 = arith.constant 0 : i32
    %c0_i32_1 = arith.constant 0 : i32
    return %c0_i32, %c0_i32_0 : i32, i32
  }
}

</mosaic_0001>

<bundles_post_ra>
// kernel: tpu_custom_call.1
= control target key start
LH: loop header
LB: loop body
LE: loop exit
PB: predicated region body
PF: predicated region fallthrough
CT: control target
= control target key end

     0   :  { %vm34_vm0 = vcmask 261120   ;;  %s6985_s27 = smov 120   ;;  %vm6986_vm1 = vmmov 0   ;;  %s6987_s28 = smov 96   ;;  %vm653_vm2 = vcmask 64512   ;;  %vm2251_vm3 = vcmask 130048   ;;  %s9423_s0 = inlined_call_operand.vmem [shape: f32[128,32], index: 0, kind: input, shape index: {}]   ;;  %s9424_s1 = inlined_call_operand.vmem [shape: bf16[160,128], index: 1, kind: input, shape index: {}]   ;;  %s9425_s2 = inlined_call_operand.vmem [shape: f32[8,128], index: 2, kind: input, shape index: {}]   ;;  %s9426_s3 = inlined_call_operand.vmem [shape: f32[32,16,16], index: 3, kind: input, shape index: {}]   ;;  %s9427_s4 = inlined_call_operand.vmem [shape: f32[128,32], index: 4, kind: output, shape index: {}]  }
   0x1   :  { %v18_v0 = vld [vmem:[%s9423_s0] sm:$0xff]  ;;  %v20_v1 = vld [vmem:[%s9423_s0 + $0x10] sm:$0xff]  ;;  %v19_v2 = vld [vmem:[%s9423_s0 + $0x8] sm:$0xff]  ;;  %s6988_s29 = smov 112   ;;  %s6989_s30 = smov 104   ;;  %vm4716_vm4 = vcmask 195584  }
   0x2   :  { %v35_v3 = vsel %vm34_vm0, %v18_v0, 0.0  ;;  %v41_v4 = vsel %vm34_vm0, %v20_v1, 0.0  ;;  %v21_v5 = vld [vmem:[%s9423_s0 + $0x18] sm:$0xff]  ;;  %v38_v6 = vsel %vm34_vm0, %v19_v2, 0.0  ;;  %v22_v8 = vld [vmem:[%s9423_s0 + $0x20] sm:$0xff]  ;;  %v23_v9 = vld [vmem:[%s9423_s0 + $0x28] sm:$0xff] }
   0x3   :  { %36 = vadd.xlane.f32.xlu0 %v35_v3  ;;  %42 = vadd.xlane.f32.xlu1 %v41_v4  ;;  %v44_v7 = vsel %vm34_vm0, %v21_v5, 0.0  ;;  %v47_v10 = vsel %vm34_vm0, %v22_v8, 0.0  ;;  %v50_v11 = vsel %vm34_vm0, %v23_v9, 0.0  ;;  %v7046_v12 = vld [vmem:[%s9423_s0 + $0x30] sm:$0xff]  ;;  %v7051_v13 = vld [vmem:[%s9423_s0 + $0x38] sm:$0xff]  ;;  %v7060_v16 = vld [vmem:[%s9423_s0 + $0x40] sm:$0xff] }
   0x4   :  { %v53_v14 = vsel %vm34_vm0, %v7046_v12, 0.0  ;;  %v56_v15 = vsel %vm34_vm0, %v7051_v13, 0.0  ;;  %v7065_v17 = vld [vmem:[%s9423_s0 + $0x48] sm:$0xff]  ;;  %v59_v18 = vsel %vm34_vm0, %v7060_v16, 0.0  ;;  %v7074_v20 = vld [vmem:[%s9423_s0 + $0x50] sm:$0xff]  ;;  %v7079_v21 = vld [vmem:[%s9423_s0 + $0x58] sm:$0xff] }
   0x5   :  { %v62_v19 = vsel %vm34_vm0, %v7065_v17, 0.0  ;;  %v65_v22 = vsel %vm34_vm0, %v7074_v20, 0.0  ;;  %v68_v23 = vsel %vm34_vm0, %v7079_v21, 0.0  ;;  %v7088_v24 = vld [vmem:[%s9423_s0 + $0x60] sm:$0xff]  ;;  %v7093_v25 = vld [vmem:[%s9423_s0 + $0x68] sm:$0xff]  ;;  %v7102_v28 = vld [vmem:[%s9423_s0 + $0x70] sm:$0xff] }
   0x6   :  { %v71_v26 = vsel %vm34_vm0, %v7088_v24, 0.0  ;;  %v74_v27 = vsel %vm34_vm0, %v7093_v25, 0.0  ;;  %v7107_v29 = vld [vmem:[%s9423_s0 + $0x78] sm:$0xff]  ;;  %v77_v30 = vsel %vm34_vm0, %v7102_v28, 0.0  ;;  %s6990_s5 = smov 64   ;;  %s6992_s10 = smov 16  }
   0x7   :  { %39 = vadd.xlane.f32.xlu0 %v38_v6  ;;  %45 = vadd.xlane.f32.xlu1 %v44_v7  ;;  %v80_v31 = vsel %vm34_vm0, %v7107_v29, 0.0  ;;  %s6993_s13 = smov 24   ;;  %vm5446_vm5 = vcmask 523264  }
   0xb   :  { %48 = vadd.xlane.f32.xlu0 %v47_v10  ;;  %51 = vadd.xlane.f32.xlu1 %v50_v11 }
   0xf   :  { %54 = vadd.xlane.f32.xlu0 %v53_v14  ;;  %57 = vadd.xlane.f32.xlu1 %v56_v15 }
  0x13   :  { %60 = vadd.xlane.f32.xlu0 %v59_v18  ;;  %63 = vadd.xlane.f32.xlu1 %v62_v19 }
  0x17   :  { %66 = vadd.xlane.f32.xlu0 %v65_v22  ;;  %69 = vadd.xlane.f32.xlu1 %v68_v23 }
  0x1b   :  { %72 = vadd.xlane.f32.xlu0 %v71_v26  ;;  %75 = vadd.xlane.f32.xlu1 %v74_v27 }
  0x1f   :  { %78 = vadd.xlane.f32.xlu0 %v77_v30  ;;  %81 = vadd.xlane.f32.xlu1 %v80_v31 }
  0x8c   :  { %v37_v32 = vpop.xlane.xlu0 %36  ;;  %v43_v33 = vpop.xlane.xlu1 %42 }
  0x8d   :  { %v84_v34 = vmul.f32 0.03125, %v37_v32  ;;  %v86_v35 = vmul.f32 0.03125, %v43_v33 }
  0x8f   :  { %v7113_v36 = vsub.f32 %v18_v0, %v84_v34  ;;  %v7115_v37 = vsub.f32 %v20_v1, %v86_v35 }
  0x90   :  { %v40_v38 = vpop.xlane.xlu0 %39  ;;  %v46_v39 = vpop.xlane.xlu1 %45 }
  0x91   :  { %v85_v40 = vmul.f32 0.03125, %v40_v38  ;;  %v87_v41 = vmul.f32 0.03125, %v46_v39  ;;  %v116_v42 = vmul.f32 %v7113_v36, %v7113_v36  ;;  %v118_v43 = vmul.f32 %v7115_v37, %v7115_v37 }
  0x93   :  { %v7121_v44 = vsub.f32 %v19_v2, %v85_v40  ;;  %v7123_v45 = vsub.f32 %v21_v5, %v87_v41  ;;  %v132_v46 = vsel %vm34_vm0, %v116_v42, 0.0  ;;  %v138_v49 = vsel %vm34_vm0, %v118_v43, 0.0 }
  0x94   :  { %133 = vadd.xlane.f32.xlu0 %v132_v46  ;;  %v49_v47 = vpop.xlane.xlu0 %48  ;;  %v52_v48 = vpop.xlane.xlu1 %51 }
  0x95   :  { %v88_v50 = vmul.f32 0.03125, %v49_v47  ;;  %v89_v51 = vmul.f32 0.03125, %v52_v48  ;;  %v117_v52 = vmul.f32 %v7121_v44, %v7121_v44  ;;  %v119_v53 = vmul.f32 %v7123_v45, %v7123_v45 }
  0x97   :  { %v7131_v54 = vsub.f32 %v22_v8, %v88_v50  ;;  %v7133_v55 = vsub.f32 %v23_v9, %v89_v51  ;;  %v135_v56 = vsel %vm34_vm0, %v117_v52, 0.0  ;;  %v141_v59 = vsel %vm34_vm0, %v119_v53, 0.0  ;;  %v6607_v53 = vld [vmem:[%s9424_s1] sm:$0xff]  }
  0x98   :  { %139 = vadd.xlane.f32.xlu0 %v138_v49  ;;  %136 = vadd.xlane.f32.xlu1 %v135_v56  ;;  %v55_v57 = vpop.xlane.xlu0 %54  ;;  %v58_v58 = vpop.xlane.xlu1 %57 }
  0x99   :  { %v90_v60 = vmul.f32 0.03125, %v55_v57  ;;  %v91_v61 = vmul.f32 0.03125, %v58_v58  ;;  %v120_v62 = vmul.f32 %v7131_v54, %v7131_v54  ;;  %v121_v63 = vmul.f32 %v7133_v55, %v7133_v55 }
  0x9b   :  { %v7142_v0 = vsub.f32 %v7046_v12, %v90_v60  ;;  %v7145_v1 = vsub.f32 %v7051_v13, %v91_v61  ;;  %v144_v2 = vsel %vm34_vm0, %v120_v62, 0.0  ;;  %v147_v5 = vsel %vm34_vm0, %v121_v63, 0.0 }
  0x9c   :  { %142 = vadd.xlane.f32.xlu1 %v141_v59  ;;  %145 = vadd.xlane.f32.xlu0 %v144_v2  ;;  %v61_v3 = vpop.xlane.xlu0 %60  ;;  %v64_v4 = vpop.xlane.xlu1 %63 }
  0x9d   :  { %v92_v6 = vmul.f32 0.03125, %v61_v3  ;;  %v93_v7 = vmul.f32 0.03125, %v64_v4  ;;  %v122_v8 = vmul.f32 %v7142_v0, %v7142_v0  ;;  %v123_v9 = vmul.f32 %v7145_v1, %v7145_v1 }
  0x9f   :  { %v7154_v10 = vsub.f32 %v7060_v16, %v92_v6  ;;  %v7157_v11 = vsub.f32 %v7065_v17, %v93_v7  ;;  %v150_v12 = vsel %vm34_vm0, %v122_v8, 0.0  ;;  %v153_v15 = vsel %vm34_vm0, %v123_v9, 0.0 }
  0xa0   :  { %148 = vadd.xlane.f32.xlu1 %v147_v5  ;;  %151 = vadd.xlane.f32.xlu0 %v150_v12  ;;  %v67_v13 = vpop.xlane.xlu0 %66  ;;  %v70_v14 = vpop.xlane.xlu1 %69 }
  0xa1   :  { %v94_v18 = vmul.f32 0.03125, %v67_v13  ;;  %v95_v19 = vmul.f32 0.03125, %v70_v14  ;;  %v124_v22 = vmul.f32 %v7154_v10, %v7154_v10  ;;  %v125_v16 = vmul.f32 %v7157_v11, %v7157_v11 }
  0xa3   :  { %v7166_v23 = vsub.f32 %v7074_v20, %v94_v18  ;;  %v7169_v17 = vsub.f32 %v7079_v21, %v95_v19  ;;  %v156_v26 = vsel %vm34_vm0, %v124_v22, 0.0  ;;  %v159_v31 = vsel %vm34_vm0, %v125_v16, 0.0 }
  0xa4   :  { %154 = vadd.xlane.f32.xlu1 %v153_v15  ;;  %157 = vadd.xlane.f32.xlu0 %v156_v26  ;;  %v73_v27 = vpop.xlane.xlu0 %72  ;;  %v76_v30 = vpop.xlane.xlu1 %75 }
  0xa5   :  { %v96_v32 = vmul.f32 0.03125, %v73_v27  ;;  %v97_v33 = vmul.f32 0.03125, %v76_v30  ;;  %v126_v34 = vmul.f32 %v7166_v23, %v7166_v23  ;;  %v127_v20 = vmul.f32 %v7169_v17, %v7169_v17 }
  0xa7   :  { %v7178_v35 = vsub.f32 %v7088_v24, %v96_v32  ;;  %v7181_v21 = vsub.f32 %v7093_v25, %v97_v33  ;;  %v162_v38 = vsel %vm34_vm0, %v126_v34, 0.0  ;;  %v165_v41 = vsel %vm34_vm0, %v127_v20, 0.0 }
  0xa8   :  { %160 = vadd.xlane.f32.xlu1 %v159_v31  ;;  %163 = vadd.xlane.f32.xlu0 %v162_v38  ;;  %v79_v39 = vpop.xlane.xlu0 %78  ;;  %v82_v40 = vpop.xlane.xlu1 %81 }
  0xa9   :  { %v98_v42 = vmul.f32 0.03125, %v79_v39  ;;  %v99_v43 = vmul.f32 0.03125, %v82_v40  ;;  %v128_v46 = vmul.f32 %v7178_v35, %v7178_v35  ;;  %v129_v24 = vmul.f32 %v7181_v21, %v7181_v21 }
  0xab   :  { %v7190_v47 = vsub.f32 %v7102_v28, %v98_v42  ;;  %v7193_v25 = vsub.f32 %v7107_v29, %v99_v43  ;;  %v168_v48 = vsel %vm34_vm0, %v128_v46, 0.0  ;;  %v171_v49 = vsel %vm34_vm0, %v129_v24, 0.0  ;;  %v6606_v29 = vld [vmem:[%s9424_s1 + $0x8] sm:$0xff]  }
  0xac   :  { %166 = vadd.xlane.f32.xlu1 %v165_v41  ;;  %169 = vadd.xlane.f32.xlu0 %v168_v48 }
  0xad   :  { %v130_v50 = vmul.f32 %v7190_v47, %v7190_v47  ;;  %v131_v51 = vmul.f32 %v7193_v25, %v7193_v25  ;;  %5884 = vmatprep.subr.bf16.mxu0 %v6606_v29  ;;  %6352 = vmatprep.subr.bf16.mxu1 %v6606_v29 }
  0xae   :  { %5885 = vmatpush3.bf16.msra.mxu0 %v6606_v29  ;;  %6354 = vmatpush3.bf16.msra.mxu1 %v6606_v29 }
  0xaf   :  { %v174_v52 = vsel %vm34_vm0, %v130_v50, 0.0  ;;  %v177_v28 = vsel %vm34_vm0, %v131_v51, 0.0  ;;  %5886 = vmatprep.subr.bf16.mxu0 %v6607_v53  ;;  %6353 = vmatprep.subr.bf16.mxu1 %v6607_v53 }
  0xb0   :  { %172 = vadd.xlane.f32.xlu1 %v171_v49  ;;  %175 = vadd.xlane.f32.xlu0 %v174_v52 }
  0xb2   :  { %5887 = vmatpush3.bf16.msra.mxu0 %v6607_v53  ;;  %6355 = vmatpush3.bf16.msra.mxu1 %v6607_v53 }
  0xb4   :  { %178 = vadd.xlane.f32.xlu1 %v177_v28 }
 0x11d   :  { %v134_v56 = vpop.xlane.xlu0 %133 }
 0x11e   :  { %v180_v57 = vmul.f32 0.03125, %v134_v56 }
 0x120   :  { %v196_v58 = vadd.f32 1e-05, %v180_v57 }
 0x121   :  { %v137_v59 = vpop.xlane.xlu1 %136  ;;  %v140_v60 = vpop.xlane.xlu0 %139 }
 0x122   :  { %v181_v61 = vmul.f32 0.03125, %v137_v59  ;;  %v182_v62 = vmul.f32 0.03125, %v140_v60  ;;  %6616 = vrsqrt.f32 %v196_v58 }
 0x124   :  { %v197_v63 = vadd.f32 1e-05, %v181_v61  ;;  %v198_v2 = vadd.f32 1e-05, %v182_v62 }
 0x125   :  { %v143_v3 = vpop.xlane.xlu1 %142  ;;  %v146_v4 = vpop.xlane.xlu0 %145 }
 0x126   :  { %6618 = vrsqrt.f32 %v197_v63  ;;  %v183_v5 = vmul.f32 0.03125, %v143_v3  ;;  %v184_v6 = vmul.f32 0.03125, %v146_v4 }
 0x127   :  { %6620 = vrsqrt.f32 %v198_v2 }
 0x128   :  { %v199_v7 = vadd.f32 1e-05, %v183_v5  ;;  %v200_v8 = vadd.f32 1e-05, %v184_v6 }
 0x129   :  { %v149_v9 = vpop.xlane.xlu1 %148  ;;  %v152_v12 = vpop.xlane.xlu0 %151 }
 0x12a   :  { %6622 = vrsqrt.f32 %v199_v7  ;;  %v185_v13 = vmul.f32 0.03125, %v149_v9  ;;  %v186_v14 = vmul.f32 0.03125, %v152_v12 }
 0x12b   :  { %6624 = vrsqrt.f32 %v200_v8 }
 0x12c   :  { %v201_v15 = vadd.f32 1e-05, %v185_v13  ;;  %v202_v18 = vadd.f32 1e-05, %v186_v14 }
 0x12d   :  { %v155_v19 = vpop.xlane.xlu1 %154  ;;  %v158_v22 = vpop.xlane.xlu0 %157 }
 0x12e   :  { %6626 = vrsqrt.f32 %v201_v15  ;;  %v187_v16 = vmul.f32 0.03125, %v155_v19  ;;  %v188_v26 = vmul.f32 0.03125, %v158_v22 }
 0x12f   :  { %v6617_v27 = vpop.eup %6616  ;;  %6628 = vrsqrt.f32 %v202_v18 }
 0x130   :  { %v203_v30 = vadd.f32 1e-05, %v187_v16  ;;  %v204_v31 = vadd.f32 1e-05, %v188_v26  ;;  %v228_v39 = vmul.f32 %v6617_v27, %v7113_v36 }
 0x131   :  { %v161_v32 = vpop.xlane.xlu1 %160  ;;  %v164_v33 = vpop.xlane.xlu0 %163 }
 0x132   :  { %6630 = vrsqrt.f32 %v203_v30  ;;  %v189_v34 = vmul.f32 0.03125, %v161_v32  ;;  %v190_v20 = vmul.f32 0.03125, %v164_v33  ;;  %v5604_v33 = vld [vmem:[%s9425_s2] ss:$0 sm:$0xff] }
 0x133   :  { %v6619_v38 = vpop.eup %6618  ;;  %6632 = vrsqrt.f32 %v204_v31 }
 0x134   :  { %v6621_v40 = vpop.eup %6620  ;;  %v205_v41 = vadd.f32 1e-05, %v189_v34  ;;  %v206_v42 = vadd.f32 1e-05, %v190_v20  ;;  %v229_v43 = vmul.f32 %v6619_v38, %v7121_v44  ;;  %v9428_v34 = vmov 0.0  }
 0x135   :  { %v167_v46 = vpop.xlane.xlu1 %166  ;;  %v170_v24 = vpop.xlane.xlu0 %169  ;;  %v230_v52 = vmul.f32 %v6621_v40, %v7115_v37  ;;  %5904 = vmatprep.subr.bf16.mxu1 %v9428_v34  ;;  %5928 = vmatprep.subr.bf16.mxu0 %v9428_v34 }
 0x136   :  { %6634 = vrsqrt.f32 %v205_v41  ;;  %v191_v48 = vmul.f32 0.03125, %v167_v46  ;;  %v192_v49 = vmul.f32 0.03125, %v170_v24  ;;  %v244_v50 = vpack.c.bf16 %v229_v43, %v228_v39 }
 0x137   :  { %v6623_v51 = vpop.eup %6622  ;;  %6636 = vrsqrt.f32 %v206_v42 }
 0x138   :  { %v6625_v28 = vpop.eup %6624  ;;  %v207_v29 = vadd.f32 1e-05, %v191_v48  ;;  %v208_v53 = vadd.f32 1e-05, %v192_v49  ;;  %5888 = vmatprep.mubr.msk.bf16.mxu0 %vm34_vm0, %v244_v50  ;;  %v231_v36 = vmul.f32 %v6623_v51, %v7123_v45 }
 0x139   :  { %v173_v56 = vpop.xlane.xlu1 %172  ;;  %v176_v57 = vpop.xlane.xlu0 %175  ;;  %v232_v61 = vmul.f32 %v6625_v28, %v7131_v54 }
 0x13a   :  { %6638 = vrsqrt.f32 %v207_v29  ;;  %v193_v44 = vmul.f32 0.03125, %v173_v56  ;;  %v194_v58 = vmul.f32 0.03125, %v176_v57  ;;  %v245_v59 = vpack.c.bf16 %v231_v36, %v230_v52 }
 0x13b   :  { %v6627_v60 = vpop.eup %6626  ;;  %6640 = vrsqrt.f32 %v208_v53 }
 0x13c   :  { %v209_v62 = vadd.f32 1e-05, %v193_v44  ;;  %v210_v37 = vadd.f32 1e-05, %v194_v58  ;;  %5889 = vmatmul.mubr.msk.bf16.vlgmr.msra.gmra.mxu0 %vm34_vm0, %v245_v59  ;;  %v233_v63 = vmul.f32 %v6627_v60, %v7133_v55  ;;  %v6629_v2 = vpop.eup %6628 }
 0x13d   :  { %v179_v3 = vpop.xlane.xlu1 %178  ;;  %v234_v7 = vmul.f32 %v6629_v2, %v7142_v0 }
 0x13e   :  { %6642 = vrsqrt.f32 %v209_v62  ;;  %v195_v45 = vmul.f32 0.03125, %v179_v3  ;;  %v246_v4 = vpack.c.bf16 %v233_v63, %v232_v61 }
 0x13f   :  { %v6631_v5 = vpop.eup %6630  ;;  %6644 = vrsqrt.f32 %v210_v37 }
 0x140   :  { %v211_v6 = vadd.f32 1e-05, %v195_v45  ;;  %5892 = vmatprep.mubr.msk.bf16.mxu0 %vm34_vm0, %v246_v4  ;;  %v235_v54 = vmul.f32 %v6631_v5, %v7145_v1  ;;  %v6633_v8 = vpop.eup %6632 }
 0x141   :  { %v236_v55 = vmul.f32 %v6633_v8, %v7154_v10 }
 0x142   :  { %6646 = vrsqrt.f32 %v211_v6  ;;  %v247_v9 = vpack.c.bf16 %v235_v54, %v234_v7 }
 0x143   :  { %v6635_v12 = vpop.eup %6634 }
 0x144   :  { %5893 = vmatmul.mubr.msk.bf16.gmra.mxu0 %vm34_vm0, %v247_v9  ;;  %v237_v13 = vmul.f32 %v6635_v12, %v7157_v11  ;;  %v6637_v14 = vpop.eup %6636 }
 0x145   :  { %v238_v19 = vmul.f32 %v6637_v14, %v7166_v23  ;;  %5930 = vmatprep.mubr.msk.bf16.mxu0 %vm6986_vm1, %v9428_v34 }
 0x146   :  { %v248_v15 = vpack.c.bf16 %v237_v13, %v236_v55 }
 0x147   :  { %v6639_v18 = vpop.eup %6638 }
 0x148   :  { %5896 = vmatprep.mubr.msk.bf16.mxu1 %vm34_vm0, %v248_v15  ;;  %v239_v0 = vmul.f32 %v6639_v18, %v7169_v17  ;;  %v6641_v1 = vpop.eup %6640 }
 0x149   :  { %v240_v26 = vmul.f32 %v6641_v1, %v7178_v35 }
 0x14a   :  { %v249_v22 = vpack.c.bf16 %v239_v0, %v238_v19 }
 0x14b   :  { %v6643_v16 = vpop.eup %6642 }
 0x14c   :  { %5897 = vmatmul.mubr.msk.bf16.vlgmr.msra.gmra.mxu1 %vm34_vm0, %v249_v22  ;;  %v241_v10 = vmul.f32 %v6643_v16, %v7181_v21  ;;  %v6645_v27 = vpop.eup %6644 }
 0x14d   :  { %v242_v31 = vmul.f32 %v6645_v27, %v7190_v47 }
 0x14e   :  { %v250_v11 = vpack.c.bf16 %v241_v10, %v240_v26 }
 0x14f   :  { %v6647_v30 = vpop.eup %6646 }
 0x150   :  { %5900 = vmatprep.mubr.msk.bf16.mxu1 %vm34_vm0, %v250_v11  ;;  %v243_v23 = vmul.f32 %v6647_v30, %v7193_v25 }
 0x152   :  { %v251_v32 = vpack.c.bf16 %v243_v23, %v242_v31 }
 0x154   :  { %5901 = vmatmul.mubr.msk.bf16.gmra.mxu1 %vm34_vm0, %v251_v32 }
 0x155   :  { %5906 = vmatprep.mubr.msk.bf16.mxu1 %vm6986_vm1, %v9428_v34 }
 0x1fc   :  { %v5890_v17 = vpop.f32.mrf.mxu0 }
 0x1fd   :  { %v340_v20 = vadd.f32 %v5890_v17, %v5604_v33 }
 0x1fe   :  { %v331_v35 = vpop.f32.mrf.mxu0 }
 0x1ff   :  { %v332_v39 = vadd.f32 %v5604_v33, %v331_v35 }
 0x200   :  { %v5891_v21 = vpop.f32.mrf.mxu0 }
 0x201   :  { %v343_v38 = vadd.f32 %v5891_v21, %v5604_v33 }
 0x202   :  { %v334_v47 = vpop.f32.mrf.mxu0 }
 0x203   :  { %v335_v25 = vadd.f32 %v5604_v33, %v334_v47  ;;  %v7238_v40 = vpack.i.bf16 %v343_v38, %v340_v20  ;;  %v7270_v45 = vpack.c.bf16 %v343_v38, %v340_v20 }
 0x204   :  { %v5894_v41 = vpop.f32.mrf.mxu0 }
 0x205   :  { %6372 = vrot.lane.b32.xlu1 %v7238_v40, %s6985_s27  ;;  %v7242_v42 = vpack.i.bf16 %v335_v25, %v332_v39  ;;  %v7250_v48 = vpack.c.bf16 %v335_v25, %v332_v39  ;;  %v356_v49 = vadd.f32 %v5894_v41, %v5604_v33 }
 0x206   :  { %v347_v43 = vpop.f32.mrf.mxu0 }
 0x207   :  { %6367 = vrot.lane.b32.xlu0 %v7242_v42, %s6985_s27  ;;  %v348_v51 = vadd.f32 %v5604_v33, %v347_v43 }
 0x208   :  { %v5895_v46 = vpop.f32.mrf.mxu0 }
 0x209   :  { %v359_v24 = vadd.f32 %v5895_v46, %v5604_v33 }
 0x20a   :  { %v350_v50 = vpop.f32.mrf.mxu0 }
 0x20b   :  { %v351_v52 = vadd.f32 %v5604_v33, %v350_v50  ;;  %651 = vrot.lane.b32.xlu0 %v7250_v48, %s6987_s28  ;;  %v7254_v29 = vpack.i.bf16 %v359_v24, %v356_v49  ;;  %v7287_v12 = vpack.c.bf16 %v359_v24, %v356_v49 }
 0x20c   :  { %v5898_v28 = vpop.f32.mrf.mxu1 }
 0x20d   :  { %v7256_v53 = vpack.i.bf16 %v351_v52, %v348_v51  ;;  %v372_v57 = vadd.f32 %v5898_v28, %v5604_v33  ;;  %v7282_v9 = vpack.c.bf16 %v351_v52, %v348_v51 }
 0x20e   :  { %v363_v36 = vpop.f32.mrf.mxu1 }
 0x20f   :  { %6377 = vrot.lane.b32.xlu1 %v7256_v53, %s6985_s27  ;;  %v364_v59 = vadd.f32 %v5604_v33, %v363_v36 }
 0x210   :  { %v5899_v56 = vpop.f32.mrf.mxu1 }
 0x211   :  { %v375_v44 = vadd.f32 %v5899_v56, %v5604_v33 }
 0x212   :  { %v366_v58 = vpop.f32.mrf.mxu1 }
 0x213   :  { %v367_v60 = vadd.f32 %v5604_v33, %v366_v58  ;;  %6382 = vrot.lane.b32.xlu1 %v7254_v29, %s6985_s27  ;;  %v7262_v61 = vpack.i.bf16 %v375_v44, %v372_v57  ;;  %v7294_v55 = vpack.c.bf16 %v375_v44, %v372_v57 }
 0x214   :  { %v5902_v62 = vpop.f32.mrf.mxu1 }
 0x215   :  { %6392 = vrot.lane.b32.xlu0 %v7262_v61, %s6985_s27  ;;  %v7266_v37 = vpack.i.bf16 %v367_v60, %v364_v59  ;;  %v388_v4 = vadd.f32 %v5902_v62, %v5604_v33  ;;  %v7296_v13 = vpack.c.bf16 %v367_v60, %v364_v59 }
 0x216   :  { %v379_v63 = vpop.f32.mrf.mxu1 }
 0x217   :  { %6387 = vrot.lane.b32.xlu1 %v7266_v37, %s6985_s27  ;;  %v380_v6 = vadd.f32 %v5604_v33, %v379_v63 }
 0x218   :  { %v5903_v2 = vpop.f32.mrf.mxu1 }
 0x219   :  { %v391_v3 = vadd.f32 %v5903_v2, %v5604_v33 }
 0x21a   :  { %v382_v5 = vpop.f32.mrf.mxu1 }
 0x21b   :  { %v383_v7 = vadd.f32 %v5604_v33, %v382_v5  ;;  %702 = vrot.lane.b32.xlu1 %v7270_v45, %s6987_s28  ;;  %v7274_v54 = vpack.i.bf16 %v391_v3, %v388_v4  ;;  %v7304_v14 = vpack.c.bf16 %v391_v3, %v388_v4 }
 0x21d   :  { %v7276_v8 = vpack.i.bf16 %v383_v7, %v380_v6  ;;  %v7306_v15 = vpack.c.bf16 %v383_v7, %v380_v6 }
 0x21f   :  { %6402 = vrot.lane.b32.xlu1 %v7274_v54, %s6985_s27  ;;  %6397 = vrot.lane.b32.xlu0 %v7276_v8, %s6985_s27 }
 0x223   :  { %6407 = vrot.lane.b32.xlu1 %v7242_v42, %s6988_s29  ;;  %752 = vrot.lane.b32.xlu0 %v7282_v9, %s6987_s28 }
 0x227   :  { %802 = vrot.lane.b32.xlu1 %v7287_v12, %s6987_s28  ;;  %6412 = vrot.lane.b32.xlu0 %v7238_v40, %s6988_s29 }
 0x22b   :  { %6422 = vrot.lane.b32.xlu1 %v7254_v29, %s6988_s29  ;;  %6417 = vrot.lane.b32.xlu0 %v7256_v53, %s6988_s29 }
 0x22f   :  { %902 = vrot.lane.b32.xlu1 %v7294_v55, %s6987_s28  ;;  %852 = vrot.lane.b32.xlu0 %v7296_v13, %s6987_s28 }
 0x233   :  { %6432 = vrot.lane.b32.xlu1 %v7262_v61, %s6988_s29  ;;  %6427 = vrot.lane.b32.xlu0 %v7266_v37, %s6988_s29 }
 0x237   :  { %1002 = vrot.lane.b32.xlu1 %v7304_v14, %s6987_s28  ;;  %952 = vrot.lane.b32.xlu0 %v7306_v15, %s6987_s28 }
 0x23b   :  { %6442 = vrot.lane.b32.xlu1 %v7274_v54, %s6988_s29  ;;  %6437 = vrot.lane.b32.xlu0 %v7276_v8, %s6988_s29 }
 0x277   :  { %v6373_v18 = vpop.permute.xlu1 %6372 }
 0x278   :  { %v6375_v19 = vunpack.i.h.bf16 %v6373_v18  ;;  %v6374_v0 = vunpack.i.l.bf16 %v6373_v18 }
 0x279   :  { %v6368_v1 = vpop.permute.xlu0 %6367 }
 0x27a   :  { %v6370_v22 = vunpack.i.h.bf16 %v6368_v1  ;;  %v6369_v16 = vunpack.i.l.bf16 %v6368_v1  ;;  %v7314_v26 = vpack.c.bf16 %v6375_v19, %v6374_v0 }
 0x27c   :  { %1102 = vrot.lane.b32.xlu1 %v7314_v26, %s6987_s28  ;;  %v7318_v10 = vpack.c.bf16 %v6370_v22, %v6369_v16 }
 0x27d   :  { %v652_v27 = vpop.permute.xlu0 %651 }
 0x27e   :  { %v658_v11 = vsel %vm653_vm2, %v652_v27, 0  ;;  %1052 = vrot.lane.b32.xlu0 %v7318_v10, %s6987_s28 }
 0x27f   :  { %5905 = vmatpush3.bf16.xpose.msra.mxu1 %v658_v11 }
 0x280   :  { %6452 = vrot.lane.b32.xlu1 %v7238_v40, %s6989_s30  ;;  %5910 = vmatprep.subr.bf16.mxu1 %v9428_v34 }
 0x281   :  { %v6378_v30 = vpop.permute.xlu1 %6377 }
 0x282   :  { %v6380_v31 = vunpack.i.h.bf16 %v6378_v30  ;;  %v6379_v23 = vunpack.i.l.bf16 %v6378_v30  ;;  %6447 = vrot.lane.b32.xlu0 %v7242_v42, %s6989_s30 }
 0x284   :  { %v7328_v32 = vpack.c.bf16 %v6380_v31, %v6379_v23 }
 0x285   :  { %v6383_v17 = vpop.permute.xlu1 %6382 }
 0x286   :  { %v6385_v33 = vunpack.i.h.bf16 %v6383_v17  ;;  %v6384_v35 = vunpack.i.l.bf16 %v6383_v17  ;;  %5907 = vmatmul.mubr.msk.bf16.vlgmr.msra.gmra.mxu1 %vm653_vm2, %v7250_v48  ;;  %1152 = vrot.lane.b32.xlu0 %v7328_v32, %s6987_s28 }
 0x287   :  { %5912 = vmatprep.mubr.msk.bf16.mxu1 %vm6986_vm1, %v9428_v34  ;;  %v6393_v20 = vpop.permute.xlu0 %6392 }
 0x288   :  { %v7336_v21 = vpack.c.bf16 %v6385_v33, %v6384_v35  ;;  %v6395_v25 = vunpack.i.h.bf16 %v6393_v20  ;;  %v6394_v40 = vunpack.i.l.bf16 %v6393_v20 }
 0x289   :  { %v6388_v38 = vpop.permute.xlu1 %6387 }
 0x28a   :  { %v6390_v47 = vunpack.i.h.bf16 %v6388_v38  ;;  %v6389_v39 = vunpack.i.l.bf16 %v6388_v38  ;;  %1202 = vrot.lane.b32.xlu1 %v7336_v21, %s6987_s28  ;;  %6457 = vrot.lane.b32.xlu0 %v7256_v53, %s6989_s30  ;;  %v7349_v46 = vpack.c.bf16 %v6395_v25, %v6394_v40 }
 0x28c   :  { %v7342_v41 = vpack.c.bf16 %v6390_v47, %v6389_v39 }
 0x28d   :  { %v703_v42 = vpop.permute.xlu1 %702 }
 0x28e   :  { %v708_v43 = vsel %vm653_vm2, %v703_v42, 0  ;;  %6462 = vrot.lane.b32.xlu1 %v7254_v29, %s6989_s30  ;;  %1252 = vrot.lane.b32.xlu0 %v7342_v41, %s6987_s28 }
 0x28f   :  { %5911 = vmatpush3.bf16.xpose.msra.mxu1 %v708_v43 }
 0x290   :  { %5916 = vmatprep.subr.bf16.mxu1 %v9428_v34 }
 0x291   :  { %v6403_v24 = vpop.permute.xlu1 %6402  ;;  %v6398_v49 = vpop.permute.xlu0 %6397 }
 0x292   :  { %v6400_v50 = vunpack.i.h.bf16 %v6398_v49  ;;  %v6399_v51 = vunpack.i.l.bf16 %v6398_v49  ;;  %1302 = vrot.lane.b32.xlu1 %v7349_v46, %s6987_s28  ;;  %6467 = vrot.lane.b32.xlu0 %v7266_v37, %s6989_s30  ;;  %v6405_v52 = vunpack.i.h.bf16 %v6403_v24  ;;  %v6404_v28 = vunpack.i.l.bf16 %v6403_v24 }
 0x294   :  { %v7356_v29 = vpack.c.bf16 %v6400_v50, %v6399_v51  ;;  %v7365_v57 = vpack.c.bf16 %v6405_v52, %v6404_v28 }
 0x295   :  { %v6408_v53 = vpop.permute.xlu1 %6407  ;;  %v753_v36 = vpop.permute.xlu0 %752 }
 0x296   :  { %v758_v56 = vsel %vm653_vm2, %v753_v36, 0  ;;  %5913 = vmatmul.mubr.msk.bf16.vlgmr.msra.gmra.mxu1 %vm653_vm2, %v7270_v45  ;;  %6472 = vrot.lane.b32.xlu1 %v7262_v61, %s6989_s30  ;;  %v6410_v44 = vunpack.i.h.bf16 %v6408_v53  ;;  %v6409_v58 = vunpack.i.l.bf16 %v6408_v53 }
 0x297   :  { %1352 = vrot.lane.b32.xlu0 %v7356_v29, %s6987_s28  ;;  %5917 = vmatpush3.bf16.xpose.msra.mxu1 %v758_v56 }
 0x298   :  { %5918 = vmatprep.mubr.msk.bf16.mxu1 %vm6986_vm1, %v9428_v34  ;;  %5922 = vmatprep.subr.bf16.mxu1 %v9428_v34  ;;  %v7374_v2 = vpack.c.bf16 %v6410_v44, %v6409_v58 }
 0x299   :  { %v803_v59 = vpop.permute.xlu1 %802  ;;  %v6413_v60 = vpop.permute.xlu0 %6412 }
 0x29a   :  { %1402 = vrot.lane.b32.xlu1 %v7365_v57, %s6987_s28  ;;  %v6415_v61 = vunpack.i.h.bf16 %v6413_v60  ;;  %v6414_v62 = vunpack.i.l.bf16 %v6413_v60  ;;  %v808_v3 = vsel %vm653_vm2, %v803_v59, 0 }
 0x29b   :  { %6477 = vrot.lane.b32.xlu0 %v7276_v8, %s6989_s30 }
 0x29c   :  { %v7383_v8 = vpack.c.bf16 %v6415_v61, %v6414_v62 }
 0x29d   :  { %v6423_v37 = vpop.permute.xlu1 %6422  ;;  %v6418_v63 = vpop.permute.xlu0 %6417 }
 0x29e   :  { %v6420_v4 = vunpack.i.h.bf16 %v6418_v63  ;;  %v6419_v5 = vunpack.i.l.bf16 %v6418_v63  ;;  %5919 = vmatmul.mubr.msk.bf16.vlgmr.msra.gmra.mxu1 %vm653_vm2, %v7282_v9  ;;  %6482 = vrot.lane.b32.xlu1 %v7274_v54, %s6989_s30  ;;  %v6425_v6 = vunpack.i.h.bf16 %v6423_v37  ;;  %v6424_v7 = vunpack.i.l.bf16 %v6423_v37 }
 0x29f   :  { %1452 = vrot.lane.b32.xlu0 %v7374_v2, %s6987_s28  ;;  %5923 = vmatpush3.bf16.xpose.msra.mxu1 %v808_v3 }
 0x2a0   :  { %v7385_v18 = vpack.c.bf16 %v6420_v4, %v6419_v5  ;;  %5924 = vmatprep.mubr.msk.bf16.mxu1 %vm6986_vm1, %v9428_v34  ;;  %5934 = vmatprep.subr.bf16.mxu1 %v9428_v34  ;;  %v7395_v54 = vpack.c.bf16 %v6425_v6, %v6424_v7 }
 0x2a1   :  { %v903_v19 = vpop.permute.xlu1 %902  ;;  %v853_v0 = vpop.permute.xlu0 %852 }
 0x2a2   :  { %v858_v1 = vsel %vm653_vm2, %v853_v0, 0  ;;  %1502 = vrot.lane.b32.xlu1 %v7383_v8, %s6987_s28  ;;  %v908_v22 = vsel %vm653_vm2, %v903_v19, 0 }
 0x2a3   :  { %1552 = vrot.lane.b32.xlu0 %v7385_v18, %s6987_s28  ;;  %5929 = vmatpush3.bf16.xpose.msra.mxu0 %v858_v1 }
 0x2a4   :  { %5940 = vmatprep.subr.bf16.mxu0 %v9428_v34 }
 0x2a5   :  { %v6433_v16 = vpop.permute.xlu1 %6432  ;;  %v6428_v27 = vpop.permute.xlu0 %6427 }
 0x2a6   :  { %v6435_v11 = vunpack.i.h.bf16 %v6433_v16  ;;  %v6434_v30 = vunpack.i.l.bf16 %v6433_v16  ;;  %v6430_v31 = vunpack.i.h.bf16 %v6428_v27  ;;  %v6429_v23 = vunpack.i.l.bf16 %v6428_v27  ;;  %5925 = vmatmul.mubr.msk.bf16.vlgmr.msra.gmra.mxu1 %vm653_vm2, %v7287_v12  ;;  %1602 = vrot.lane.b32.xlu1 %v7395_v54, %s6987_s28 }
 0x2a7   :  { %5935 = vmatpush3.bf16.xpose.msra.mxu1 %v908_v22  ;;  %5936 = vmatprep.mubr.msk.bf16.mxu1 %vm6986_vm1, %v9428_v34 }
 0x2a8   :  { %v7405_v17 = vpack.c.bf16 %v6435_v11, %v6434_v30  ;;  %v7407_v33 = vpack.c.bf16 %v6430_v31, %v6429_v23  ;;  %5946 = vmatprep.subr.bf16.mxu1 %v9428_v34 }
 0x2a9   :  { %v1003_v35 = vpop.permute.xlu1 %1002  ;;  %v953_v20 = vpop.permute.xlu0 %952 }
 0x2aa   :  { %v958_v38 = vsel %vm653_vm2, %v953_v20, 0  ;;  %5931 = vmatmul.mubr.msk.bf16.vlgmr.msra.gmra.mxu0 %vm653_vm2, %v7296_v13  ;;  %1702 = vrot.lane.b32.xlu1 %v7405_v17, %s6987_s28  ;;  %v1008_v47 = vsel %vm653_vm2, %v1003_v35, 0 }
 0x2ab   :  { %1652 = vrot.lane.b32.xlu0 %v7407_v33, %s6987_s28  ;;  %5941 = vmatpush3.bf16.xpose.msra.mxu0 %v958_v38 }
 0x2ac   :  { %5942 = vmatprep.mubr.msk.bf16.mxu0 %vm6986_vm1, %v9428_v34  ;;  %5952 = vmatprep.subr.bf16.mxu0 %v9428_v34 }
 0x2ad   :  { %v6443_v39 = vpop.permute.xlu1 %6442  ;;  %v6438_v25 = vpop.permute.xlu0 %6437 }
 0x2ae   :  { %v6445_v40 = vunpack.i.h.bf16 %v6443_v39  ;;  %v6444_v42 = vunpack.i.l.bf16 %v6443_v39  ;;  %v6440_v43 = vunpack.i.h.bf16 %v6438_v25  ;;  %v6439_v24 = vunpack.i.l.bf16 %v6438_v25  ;;  %5937 = vmatmul.mubr.msk.bf16.vlgmr.msra.gmra.mxu1 %vm653_vm2, %v7294_v55 }
 0x2af   :  { %5947 = vmatpush3.bf16.xpose.msra.mxu1 %v1008_v47  ;;  %5948 = vmatprep.mubr.msk.bf16.mxu1 %vm6986_vm1, %v9428_v34 }
 0x2b0   :  { %v7425_v49 = vpack.c.bf16 %v6445_v40, %v6444_v42  ;;  %v7427_v50 = vpack.c.bf16 %v6440_v43, %v6439_v24  ;;  %5958 = vmatprep.subr.bf16.mxu1 %v9428_v34 }
 0x2b2   :  { %5943 = vmatmul.mubr.msk.bf16.vlgmr.msra.gmra.mxu0 %vm653_vm2, %v7306_v15  ;;  %1802 = vrot.lane.b32.xlu1 %v7425_v49, %s6987_s28 }
 0x2b3   :  { %1752 = vrot.lane.b32.xlu0 %v7427_v50, %s6987_s28  ;;  %5954 = vmatprep.mubr.msk.bf16.mxu0 %vm6986_vm1, %v9428_v34 }
 0x2b6   :  { %5949 = vmatmul.mubr.msk.bf16.vlgmr.msra.gmra.mxu1 %vm653_vm2, %v7304_v14 }
 0x2b7   :  { %5960 = vmatprep.mubr.msk.bf16.mxu1 %vm6986_vm1, %v9428_v34 }
 0x2ee   :  { %v1103_v51 = vpop.permute.xlu1 %1102 }
 0x2ef   :  { %v1108_v52 = vsel %vm653_vm2, %v1103_v51, 0 }
 0x2f0   :  { %5959 = vmatpush3.bf16.xpose.msra.mxu1 %v1108_v52  ;;  %v1053_v28 = vpop.permute.xlu0 %1052 }
 0x2f1   :  { %v1058_v53 = vsel %vm653_vm2, %v1053_v28, 0  ;;  %5970 = vmatprep.subr.bf16.mxu1 %v9428_v34 }
 0x2f2   :  { %v6453_v36 = vpop.permute.xlu1 %6452  ;;  %5953 = vmatpush3.bf16.xpose.msra.mxu0 %v1058_v53 }
 0x2f3   :  { %v6455_v56 = vunpack.i.h.bf16 %v6453_v36  ;;  %v6454_v44 = vunpack.i.l.bf16 %v6453_v36  ;;  %5964 = vmatprep.subr.bf16.mxu0 %v9428_v34 }
 0x2f4   :  { %v6448_v58 = vpop.permute.xlu0 %6447 }
 0x2f5   :  { %v6450_v59 = vunpack.i.h.bf16 %v6448_v58  ;;  %v6449_v60 = vunpack.i.l.bf16 %v6448_v58  ;;  %v7446_v61 = vpack.c.bf16 %v6455_v56, %v6454_v44 }
 0x2f7   :  { %5961 = vmatmul.mubr.msk.bf16.vlgmr.msra.gmra.mxu1 %vm653_vm2, %v7314_v26  ;;  %1902 = vrot.lane.b32.xlu1 %v7446_v61, %s6987_s28  ;;  %v7452_v62 = vpack.c.bf16 %v6450_v59, %v6449_v60 }
 0x2f8   :  { %v1153_v37 = vpop.permute.xlu0 %1152  ;;  %5972 = vmatprep.mubr.msk.bf16.mxu1 %vm6986_vm1, %v9428_v34 }
 0x2f9   :  { %v1158_v63 = vsel %vm653_vm2, %v1153_v37, 0  ;;  %5955 = vmatmul.mubr.msk.bf16.vlgmr.msra.gmra.mxu0 %vm653_vm2, %v7318_v10  ;;  %1852 = vrot.lane.b32.xlu0 %v7452_v62, %s6987_s28 }
 0x2fa   :  { %5965 = vmatpush3.bf16.xpose.msra.mxu0 %v1158_v63  ;;  %5966 = vmatprep.mubr.msk.bf16.mxu0 %vm6986_vm1, %v9428_v34 }
 0x2fb   :  { %5976 = vmatprep.subr.bf16.mxu0 %v9428_v34 }
 0x2fc   :  { %v1203_v3 = vpop.permute.xlu1 %1202  ;;  %v6458_v4 = vpop.permute.xlu0 %6457 }
 0x2fd   :  { %v1208_v5 = vsel %vm653_vm2, %v1203_v3, 0  ;;  %v6460_v6 = vunpack.i.h.bf16 %v6458_v4  ;;  %v6459_v7 = vunpack.i.l.bf16 %v6458_v4 }
 0x2fe   :  { %5971 = vmatpush3.bf16.xpose.msra.mxu1 %v1208_v5 }
 0x2ff   :  { %v7465_v19 = vpack.c.bf16 %v6460_v6, %v6459_v7  ;;  %5982 = vmatprep.subr.bf16.mxu1 %v9428_v34 }
 0x300   :  { %v6463_v0 = vpop.permute.xlu1 %6462  ;;  %v1253_v1 = vpop.permute.xlu0 %1252 }
 0x301   :  { %v6465_v22 = vunpack.i.h.bf16 %v6463_v0  ;;  %v6464_v16 = vunpack.i.l.bf16 %v6463_v0  ;;  %v1258_v27 = vsel %vm653_vm2, %v1253_v1, 0  ;;  %5967 = vmatmul.mubr.msk.bf16.vlgmr.msra.gmra.mxu0 %vm653_vm2, %v7328_v32  ;;  %1952 = vrot.lane.b32.xlu0 %v7465_v19, %s6987_s28  ;;  %v594_v1 = vld [vmem:[%s9426_s3 + $0x40] sm:$0xff] }
 0x302   :  { %5977 = vmatpush3.bf16.xpose.msra.mxu0 %v1258_v27  ;;  %5978 = vmatprep.mubr.msk.bf16.mxu0 %vm6986_vm1, %v9428_v34 }
 0x303   :  { %v7475_v11 = vpack.c.bf16 %v6465_v22, %v6464_v16  ;;  %5988 = vmatprep.subr.bf16.mxu0 %v9428_v34  ;;  %v588_v16 = vld [vmem:[%s9426_s3 + $0x10] sm:$0xff] }
 0x304   :  { %v1303_v30 = vpop.permute.xlu1 %1302  ;;  %v6468_v31 = vpop.permute.xlu0 %6467 }
 0x305   :  { %v1308_v23 = vsel %vm653_vm2, %v1303_v30, 0  ;;  %v6470_v35 = vunpack.i.h.bf16 %v6468_v31  ;;  %v6469_v20 = vunpack.i.l.bf16 %v6468_v31  ;;  %5973 = vmatmul.mubr.msk.bf16.vlgmr.msra.gmra.mxu1 %vm653_vm2, %v7336_v21  ;;  %2002 = vrot.lane.b32.xlu1 %v7475_v11, %s6987_s28 }
 0x306   :  { %5983 = vmatpush3.bf16.xpose.msra.mxu1 %v1308_v23  ;;  %5984 = vmatprep.mubr.msk.bf16.mxu1 %vm6986_vm1, %v9428_v34 }
 0x307   :  { %v7485_v38 = vpack.c.bf16 %v6470_v35, %v6469_v20  ;;  %5994 = vmatprep.subr.bf16.mxu1 %v9428_v34 }
 0x308   :  { %v6473_v47 = vpop.permute.xlu1 %6472 }
 0x309   :  { %v6475_v39 = vunpack.i.h.bf16 %v6473_v47  ;;  %v6474_v25 = vunpack.i.l.bf16 %v6473_v47  ;;  %v1353_v40 = vpop.permute.xlu0 %1352  ;;  %5979 = vmatmul.mubr.msk.bf16.vlgmr.msra.gmra.mxu0 %vm653_vm2, %v7342_v41  ;;  %2052 = vrot.lane.b32.xlu0 %v7485_v38, %s6987_s28 }
 0x30a   :  { %v1358_v42 = vsel %vm653_vm2, %v1353_v40, 0  ;;  %5990 = vmatprep.mubr.msk.bf16.mxu0 %vm6986_vm1, %v9428_v34 }
 0x30b   :  { %5989 = vmatpush3.bf16.xpose.msra.mxu0 %v1358_v42  ;;  %v7495_v43 = vpack.c.bf16 %v6475_v39, %v6474_v25 }
 0x30c   :  { %v1403_v24 = vpop.permute.xlu1 %1402  ;;  %6000 = vmatprep.subr.bf16.mxu0 %v9428_v34 }
 0x30d   :  { %v1408_v51 = vsel %vm653_vm2, %v1403_v24, 0  ;;  %v6478_v52 = vpop.permute.xlu0 %6477  ;;  %5985 = vmatmul.mubr.msk.bf16.vlgmr.msra.gmra.mxu1 %vm653_vm2, %v7349_v46  ;;  %2102 = vrot.lane.b32.xlu1 %v7495_v43, %s6987_s28 }
 0x30e   :  { %v6480_v28 = vunpack.i.h.bf16 %v6478_v52  ;;  %v6479_v53 = vunpack.i.l.bf16 %v6478_v52  ;;  %5995 = vmatpush3.bf16.xpose.msra.mxu1 %v1408_v51  ;;  %5996 = vmatprep.mubr.msk.bf16.mxu1 %vm6986_vm1, %v9428_v34 }
 0x30f   :  { %6006 = vmatprep.subr.bf16.mxu1 %v9428_v34 }
 0x310   :  { %v6483_v36 = vpop.permute.xlu1 %6482  ;;  %v7506_v56 = vpack.c.bf16 %v6480_v28, %v6479_v53  ;;  %v598_v28 = vld [vmem:[%s9426_s3 + $0x60] sm:$0xff]  ;;  %v587_v53 = vld [vmem:[%s9426_s3 + $0x8] sm:$0xff] }
 0x311   :  { %v6485_v44 = vunpack.i.h.bf16 %v6483_v36  ;;  %v6484_v58 = vunpack.i.l.bf16 %v6483_v36  ;;  %v1453_v59 = vpop.permute.xlu0 %1452 }
 0x312   :  { %9450 = vst [vmem:[#allocation2_spill] sm:$0xff] %v7506_v56  ;;  %v1458_v60 = vsel %vm653_vm2, %v1453_v59, 0  ;;  %5991 = vmatmul.mubr.msk.bf16.vlgmr.msra.gmra.mxu0 %vm653_vm2, %v7356_v29  ;;  %2152 = vrot.lane.b32.xlu0 %v7506_v56, %s6987_s28 }
 0x313   :  { %6001 = vmatpush3.bf16.xpose.msra.mxu0 %v1458_v60  ;;  %v7513_v37 = vpack.c.bf16 %v6485_v44, %v6484_v58  ;;  %6002 = vmatprep.mubr.msk.bf16.mxu0 %vm6986_vm1, %v9428_v34  ;;  %v589_v44 = vld [vmem:[%s9426_s3 + $0x18] sm:$0xff] }
 0x314   :  { %v1503_v63 = vpop.permute.xlu1 %1502  ;;  %6012 = vmatprep.subr.bf16.mxu0 %v9428_v34 }
 0x315   :  { %9451 = vst [vmem:[#allocation3_spill] sm:$0xff] %v7513_v37  ;;  %v1508_v3 = vsel %vm653_vm2, %v1503_v63, 0  ;;  %5997 = vmatmul.mubr.msk.bf16.vlgmr.msra.gmra.mxu1 %vm653_vm2, %v7365_v57  ;;  %2202 = vrot.lane.b32.xlu1 %v7513_v37, %s6987_s28  ;;  %v1553_v4 = vpop.permute.xlu0 %1552 }
 0x316   :  { %2988 = vrot.lane.b32.xlu0 %v7250_v48, %s6990_s5  ;;  %6007 = vmatpush3.bf16.xpose.msra.mxu1 %v1508_v3  ;;  %v1558_v5 = vsel %vm653_vm2, %v1553_v4, 0 }
 0x317   :  { %6008 = vmatprep.mubr.msk.bf16.mxu1 %vm6986_vm1, %v9428_v34  ;;  %6018 = vmatprep.subr.bf16.mxu1 %v9428_v34 }
 0x318   :  { %v1603_v6 = vpop.permute.xlu1 %1602 }
 0x319   :  { %3035 = vrot.lane.b32.xlu1 %v7270_v45, %s6990_s5  ;;  %v1608_v48 = vsel %vm653_vm2, %v1603_v6, 0 }
 0x31a   :  { %6003 = vmatmul.mubr.msk.bf16.vlgmr.msra.gmra.mxu0 %vm653_vm2, %v7374_v2  ;;  %3082 = vrot.lane.b32.xlu0 %v7282_v9, %s6990_s5 }
 0x31b   :  { %6013 = vmatpush3.bf16.xpose.msra.mxu0 %v1558_v5  ;;  %6014 = vmatprep.mubr.msk.bf16.mxu0 %vm6986_vm1, %v9428_v34 }
 0x31c   :  { %6024 = vmatprep.subr.bf16.mxu0 %v9428_v34  ;;  %v1703_v9 = vpop.permute.xlu1 %1702 }
 0x31d   :  { %6009 = vmatmul.mubr.msk.bf16.vlgmr.msra.gmra.mxu1 %vm653_vm2, %v7383_v8  ;;  %3129 = vrot.lane.b32.xlu1 %v7287_v12, %s6990_s5  ;;  %v1653_v45 = vpop.permute.xlu0 %1652  ;;  %v1708_v12 = vsel %vm653_vm2, %v1703_v9, 0  ;;  %v590_v9 = vld [vmem:[%s9426_s3 + $0x20] sm:$0xff] }
 0x31e   :  { %3176 = vrot.lane.b32.xlu0 %v7296_v13, %s6990_s5  ;;  %6019 = vmatpush3.bf16.xpose.msra.mxu1 %v1608_v48  ;;  %v1658_v7 = vsel %vm653_vm2, %v1653_v45, 0 }
 0x31f   :  { %6020 = vmatprep.mubr.msk.bf16.mxu1 %vm6986_vm1, %v9428_v34  ;;  %6030 = vmatprep.subr.bf16.mxu1 %v9428_v34 }
 0x321   :  { %3223 = vrot.lane.b32.xlu1 %v7294_v55, %s6990_s5 }
 0x322   :  { %6015 = vmatmul.mubr.msk.bf16.vlgmr.msra.gmra.mxu0 %vm653_vm2, %v7385_v18  ;;  %3270 = vrot.lane.b32.xlu0 %v7306_v15, %s6990_s5 }
 0x323   :  { %6025 = vmatpush3.bf16.xpose.msra.mxu0 %v1658_v7  ;;  %6026 = vmatprep.mubr.msk.bf16.mxu0 %vm6986_vm1, %v9428_v34 }
 0x324   :  { %6036 = vmatprep.subr.bf16.mxu0 %v9428_v34  ;;  %v1803_v13 = vpop.permute.xlu1 %1802 }
 0x325   :  { %6021 = vmatmul.mubr.msk.bf16.vlgmr.msra.gmra.mxu1 %vm653_vm2, %v7395_v54  ;;  %3317 = vrot.lane.b32.xlu1 %v7304_v14, %s6990_s5  ;;  %v1753_v55 = vpop.permute.xlu0 %1752  ;;  %v1808_v14 = vsel %vm653_vm2, %v1803_v13, 0 }
 0x326   :  { %3364 = vrot.lane.b32.xlu0 %v7318_v10, %s6990_s5  ;;  %6031 = vmatpush3.bf16.xpose.msra.mxu1 %v1708_v12  ;;  %v1758_v15 = vsel %vm653_vm2, %v1753_v55, 0 }
 0x327   :  { %6032 = vmatprep.mubr.msk.bf16.mxu1 %vm6986_vm1, %v9428_v34  ;;  %6042 = vmatprep.subr.bf16.mxu1 %v9428_v34 }
 0x329   :  { %3411 = vrot.lane.b32.xlu1 %v7314_v26, %s6990_s5 }
 0x32a   :  { %6027 = vmatmul.mubr.msk.bf16.vlgmr.msra.gmra.mxu0 %vm653_vm2, %v7407_v33  ;;  %3552 = vrot.lane.b32.xlu0 %v7342_v41, %s6990_s5 }
 0x32b   :  { %6037 = vmatpush3.bf16.xpose.msra.mxu0 %v1758_v15  ;;  %6038 = vmatprep.mubr.msk.bf16.mxu0 %vm6986_vm1, %v9428_v34 }
 0x32c   :  { %6048 = vmatprep.subr.bf16.mxu0 %v9428_v34 }
 0x32d   :  { %6033 = vmatmul.mubr.msk.bf16.vlgmr.msra.gmra.mxu1 %vm653_vm2, %v7405_v17  ;;  %3505 = vrot.lane.b32.xlu1 %v7336_v21, %s6990_s5 }
 0x32e   :  { %3740 = vrot.lane.b32.xlu0 %v7374_v2, %s6990_s5  ;;  %6043 = vmatpush3.bf16.xpose.msra.mxu1 %v1808_v14 }
 0x32f   :  { %6044 = vmatprep.mubr.msk.bf16.mxu1 %vm6986_vm1, %v9428_v34  ;;  %6054 = vmatprep.subr.bf16.mxu1 %v9428_v34 }
 0x331   :  { %3599 = vrot.lane.b32.xlu1 %v7349_v46, %s6990_s5 }
 0x332   :  { %6039 = vmatmul.mubr.msk.bf16.vlgmr.msra.gmra.mxu0 %vm653_vm2, %v7427_v50  ;;  %3928 = vrot.lane.b32.xlu0 %v7407_v33, %s6990_s5 }
 0x333   :  { %6050 = vmatprep.mubr.msk.bf16.mxu0 %vm6986_vm1, %v9428_v34 }
 0x335   :  { %6045 = vmatmul.mubr.msk.bf16.vlgmr.msra.gmra.mxu1 %vm653_vm2, %v7425_v49  ;;  %3693 = vrot.lane.b32.xlu1 %v7365_v57, %s6990_s5 }
 0x336   :  { %4116 = vrot.lane.b32.xlu0 %v7452_v62, %s6990_s5  ;;  %6056 = vmatprep.mubr.msk.bf16.mxu1 %vm6986_vm1, %v9428_v34 }
 0x339   :  { %3787 = vrot.lane.b32.xlu1 %v7383_v8, %s6990_s5 }
 0x33a   :  { %4304 = vrot.lane.b32.xlu0 %v7485_v38, %s6990_s5 }
 0x33d   :  { %3881 = vrot.lane.b32.xlu1 %v7395_v54, %s6990_s5 }
 0x33e   :  { %3458 = vrot.lane.b32.xlu0 %v7328_v32, %s6990_s5 }
 0x341   :  { %3975 = vrot.lane.b32.xlu1 %v7405_v17, %s6990_s5 }
 0x342   :  { %3646 = vrot.lane.b32.xlu0 %v7356_v29, %s6990_s5 }
 0x345   :  { %4069 = vrot.lane.b32.xlu1 %v7425_v49, %s6990_s5 }
 0x346   :  { %3834 = vrot.lane.b32.xlu0 %v7385_v18, %s6990_s5  ;;  %v694_v26 = vpop.f32.mrf.mxu1  ;;  %v586_v18 = vld [vmem:[%s9426_s3] sm:$0xff] }
 0x347   :  { %v7637_v17 = vadd.f32 %v694_v26, %v586_v18 }
 0x348   :  { %v5908_v10 = vpop.f32.mrf.mxu1 }
 0x349   :  { %4163 = vrot.lane.b32.xlu1 %v7446_v61, %s6990_s5  ;;  %v2252_v0 = vsel %vm2251_vm3, %v7637_v17, -inf }
 0x34a   :  { %4022 = vrot.lane.b32.xlu0 %v7427_v50, %s6990_s5  ;;  %v697_v32 = vpop.f32.mrf.mxu1 }
 0x34b   :  { %v7682_v3 = vadd.f32 %v697_v32, %v587_v53  ;;  %v599_v32 = vld [vmem:[%s9426_s3 + $0x68] sm:$0xff] }
 0x34c   :  { %v5909_v21 = vpop.f32.mrf.mxu1 }
 0x34d   :  { %4257 = vrot.lane.b32.xlu1 %v7475_v11, %s6990_s5  ;;  %v2255_v26 = vsel %vm2251_vm3, %v7682_v3, -inf }
 0x351   :  { %4351 = vrot.lane.b32.xlu1 %v7495_v43, %s6990_s5 }
 0x355   :  { %4210 = vrot.lane.b32.xlu1 %v7465_v19, %s6990_s5 }
 0x356   :  { %v744_v41 = vpop.f32.mrf.mxu1 }
 0x357   :  { %v7656_v25 = vadd.f32 %v744_v41, %v588_v16  ;;  %v592_v41 = vld [vmem:[%s9426_s3 + $0x30] sm:$0xff] }
 0x358   :  { %v5914_v46 = vpop.f32.mrf.mxu1 }
 0x359   :  { %v2258_v36 = vsel %vm2251_vm3, %v7656_v25, -inf }
 0x35a   :  { %v747_v29 = vpop.f32.mrf.mxu1 }
 0x35b   :  { %v7687_v48 = vadd.f32 %v747_v29, %v589_v44 }
 0x35c   :  { %v5915_v57 = vpop.f32.mrf.mxu1 }
 0x35d   :  { %v2261_v21 = vsel %vm2251_vm3, %v7687_v48, -inf }
 0x35e   :  { %v7630_v2 = vpop.f32.mrf.mxu1 }
 0x35f   :  { %v7706_v10 = vadd.f32 %v7630_v2, %v590_v9  ;;  %v604_v9 = vld [vmem:[%s9426_s3 + $0x90] sm:$0xff] }
 0x360   :  { %v5920_v8 = vpop.f32.mrf.mxu1 }
 0x362   :  { %v7635_v54 = vpop.f32.mrf.mxu1 }
 0x364   :  { %v5921_v33 = vpop.f32.mrf.mxu1 }
 0x365   :  { %v591_v33 = vld [vmem:[%s9426_s3 + $0x28] sm:$0xff] }
 0x366   :  { %v7639_v49 = vpop.f32.mrf.mxu1 }
 0x368   :  { %v5926_v50 = vpop.f32.mrf.mxu1 }
 0x369   :  { %2253 = vmax.xlane.f32.xlu0 %v2252_v0  ;;  %v1903_v22 = vpop.permute.xlu1 %1902  ;;  %v7728_v50 = vadd.f32 %v7639_v49, %v592_v41  ;;  %v2264_v0 = vsel %vm2251_vm3, %v7706_v10, -inf }
 0x36a   :  { %v1908_v27 = vsel %vm653_vm2, %v1903_v22, 0  ;;  %v7650_v30 = vpop.f32.mrf.mxu1  ;;  %v894_v31 = vpop.f32.mrf.mxu0  ;;  %v7739_v22 = vadd.f32 %v7635_v54, %v591_v33 }
 0x36b   :  { %v7652_v23 = vadd.f32 %v894_v31, %v594_v1  ;;  %6055 = vmatpush3.bf16.xpose.msra.mxu1 %v1908_v27  ;;  %v1853_v35 = vpop.permute.xlu0 %1852  ;;  %v596_v1 = vld [vmem:[%s9426_s3 + $0x50] sm:$0xff]  ;;  %v593_v27 = vld [vmem:[%s9426_s3 + $0x38] sm:$0xff]  ;;  %v2270_v54 = vsel %vm2251_vm3, %v7728_v50, -inf }
 0x36c   :  { %v1858_v20 = vsel %vm653_vm2, %v1853_v35, 0  ;;  %v5927_v47 = vpop.f32.mrf.mxu1  ;;  %v5932_v39 = vpop.f32.mrf.mxu0  ;;  %6066 = vmatprep.subr.bf16.mxu1 %v9428_v34  ;;  %v600_v35 = vld [vmem:[%s9426_s3 + $0x70] sm:$0xff] }
 0x36d   :  { %6049 = vmatpush3.bf16.xpose.msra.mxu0 %v1858_v20  ;;  %v2276_v40 = vsel %vm2251_vm3, %v7652_v23, -inf  ;;  %v2267_v47 = vsel %vm2251_vm3, %v7739_v22, -inf  ;;  %v597_v39 = vld [vmem:[%s9426_s3 + $0x58] sm:$0xff] }
 0x36e   :  { %v897_v42 = vpop.f32.mrf.mxu0  ;;  %v7660_v24 = vpop.f32.mrf.mxu1  ;;  %2277 = vmax.xlane.f32.xlu0 %v2276_v40  ;;  %6060 = vmatprep.subr.bf16.mxu0 %v9428_v34 }
 0x36f   :  { %v7750_v31 = vadd.f32 %v7660_v24, %v596_v1 }
 0x370   :  { %v5933_v51 = vpop.f32.mrf.mxu0  ;;  %v5938_v52 = vpop.f32.mrf.mxu1 }
 0x372   :  { %v7674_v58 = vpop.f32.mrf.mxu1  ;;  %v994_v59 = vpop.f32.mrf.mxu0  ;;  %6057 = vmatmul.mubr.msk.bf16.vlgmr.msra.gmra.mxu1 %vm653_vm2, %v7446_v61  ;;  %2259 = vmax.xlane.f32.xlu0 %v2258_v36  ;;  %v595_v61 = vld [vmem:[%s9426_s3 + $0x48] sm:$0xff] }
 0x373   :  { %v7678_v60 = vadd.f32 %v994_v59, %v598_v28  ;;  %v1953_v63 = vpop.permute.xlu0 %1952  ;;  %6068 = vmatprep.mubr.msk.bf16.mxu1 %vm6986_vm1, %v9428_v34  ;;  %v7700_v55 = vadd.f32 %v897_v42, %v595_v61  ;;  %v7779_v24 = vadd.f32 %v7674_v58, %v597_v39  ;;  %v601_v28 = vld [vmem:[%s9426_s3 + $0x78] sm:$0xff] }
 0x374   :  { %v1958_v4 = vsel %vm653_vm2, %v1953_v63, 0  ;;  %v5939_v5 = vpop.f32.mrf.mxu1  ;;  %v5944_v6 = vpop.f32.mrf.mxu0  ;;  %6051 = vmatmul.mubr.msk.bf16.vlgmr.msra.gmra.mxu0 %vm653_vm2, %v7452_v62 }
 0x375   :  { %6061 = vmatpush3.bf16.xpose.msra.mxu0 %v1958_v4  ;;  %v2288_v45 = vsel %vm2251_vm3, %v7678_v60, -inf  ;;  %6062 = vmatprep.mubr.msk.bf16.mxu0 %vm6986_vm1, %v9428_v34  ;;  %v2279_v18 = vsel %vm2251_vm3, %v7700_v55, -inf }
 0x376   :  { %v997_v7 = vpop.f32.mrf.mxu0  ;;  %v1044_v12 = vpop.f32.mrf.mxu1  ;;  %2289 = vmax.xlane.f32.xlu0 %v2288_v45  ;;  %6072 = vmatprep.subr.bf16.mxu0 %v9428_v34 }
 0x377   :  { %v2003_v62 = vpop.permute.xlu1 %2002  ;;  %v7717_v57 = vadd.f32 %v997_v7, %v599_v32  ;;  %v7770_v40 = vadd.f32 %v1044_v12, %v600_v35  ;;  %v602_v12 = vld [vmem:[%s9426_s3 + $0x80] sm:$0xff] }
 0x378   :  { %v2008_v13 = vsel %vm653_vm2, %v2003_v62, 0  ;;  %v5945_v15 = vpop.f32.mrf.mxu0  ;;  %v5950_v14 = vpop.f32.mrf.mxu1 }
 0x379   :  { %6067 = vmatpush3.bf16.xpose.msra.mxu1 %v2008_v13  ;;  %2256 = vmax.xlane.f32.xlu1 %v2255_v26  ;;  %v2291_v16 = vsel %vm2251_vm3, %v7717_v57, -inf  ;;  %v2294_v53 = vsel %vm2251_vm3, %v7770_v40, -inf  ;;  %v605_v26 = vld [vmem:[%s9426_s3 + $0x98] sm:$0xff] }
 0x37a   :  { %v1047_v46 = vpop.f32.mrf.mxu1  ;;  %2262 = vmax.xlane.f32.xlu0 %v2261_v21  ;;  %6078 = vmatprep.subr.bf16.mxu1 %v9428_v34 }
 0x37b   :  { %v2053_v29 = vpop.permute.xlu0 %2052  ;;  %v7794_v36 = vadd.f32 %v1047_v46, %v601_v28 }
 0x37c   :  { %v2058_v2 = vsel %vm653_vm2, %v2053_v29, 0  ;;  %v5951_v8 = vpop.f32.mrf.mxu1  ;;  %6063 = vmatmul.mubr.msk.bf16.vlgmr.msra.gmra.mxu0 %vm653_vm2, %v7465_v19 }
 0x37d   :  { %2280 = vmax.xlane.f32.xlu1 %v2279_v18  ;;  %6073 = vmatpush3.bf16.xpose.msra.mxu0 %v2058_v2  ;;  %v2297_v59 = vsel %vm2251_vm3, %v7794_v36, -inf  ;;  %v603_v8 = vld [vmem:[%s9426_s3 + $0x88] sm:$0xff] }
 0x37e   :  { %2265 = vmax.xlane.f32.xlu0 %v2264_v0  ;;  %6074 = vmatprep.mubr.msk.bf16.mxu0 %vm6986_vm1, %v9428_v34 }
 0x37f   :  { %v2103_v19 = vpop.permute.xlu1 %2102  ;;  %6084 = vmatprep.subr.bf16.mxu0 %v9428_v34 }
 0x380   :  { %v2108_v49 = vsel %vm653_vm2, %v2103_v19, 0  ;;  %6069 = vmatmul.mubr.msk.bf16.vlgmr.msra.gmra.mxu1 %vm653_vm2, %v7475_v11  ;;  %v7761_v11 = vadd.f32 %v7650_v30, %v593_v27  ;;  %v2282_v30 = vsel %vm2251_vm3, %v7750_v31, -inf }
 0x381   :  { %6079 = vmatpush3.bf16.xpose.msra.mxu1 %v2108_v49  ;;  %2292 = vmax.xlane.f32.xlu1 %v2291_v16 }
 0x382   :  { %2271 = vmax.xlane.f32.xlu0 %v2270_v54  ;;  %6080 = vmatprep.mubr.msk.bf16.mxu1 %vm6986_vm1, %v9428_v34  ;;  %v2273_v52 = vsel %vm2251_vm3, %v7761_v11, -inf }
 0x383   :  { %6090 = vmatprep.subr.bf16.mxu1 %v9428_v34 }
 0x384   :  { %v2153_v20 = vpop.permute.xlu0 %2152  ;;  %6075 = vmatmul.mubr.msk.bf16.vlgmr.msra.gmra.mxu0 %vm653_vm2, %v7485_v38 }
 0x385   :  { %v2158_v42 = vsel %vm653_vm2, %v2153_v20, 0  ;;  %2268 = vmax.xlane.f32.xlu1 %v2267_v47  ;;  %6086 = vmatprep.mubr.msk.bf16.mxu0 %vm6986_vm1, %v9428_v34  ;;  %v608_v20 = vld [vmem:[%s9426_s3 + $0xb0] sm:$0xff] }
 0x386   :  { %6085 = vmatpush3.bf16.xpose.msra.mxu0 %v2158_v42  ;;  %2283 = vmax.xlane.f32.xlu0 %v2282_v30  ;;  %v606_v42 = vld [vmem:[%s9426_s3 + $0xa0] sm:$0xff] }
 0x387   :  { %v2203_v38 = vpop.permute.xlu1 %2202  ;;  %6096 = vmatprep.subr.bf16.mxu0 %v9428_v34 }
 0x388   :  { %v2208_v51 = vsel %vm653_vm2, %v2203_v38, 0  ;;  %6081 = vmatmul.mubr.msk.bf16.vlgmr.msra.gmra.mxu1 %vm653_vm2, %v7495_v43  ;;  %v2285_v43 = vsel %vm2251_vm3, %v7779_v24, -inf  ;;  %v2989_v44 = vpop.permute.xlu0 %2988 }
 0x389   :  { %6091 = vmatpush3.bf16.xpose.msra.mxu1 %v2208_v51  ;;  %2274 = vmax.xlane.f32.xlu1 %v2273_v52 }
 0x38a   :  { %2295 = vmax.xlane.f32.xlu0 %v2294_v53  ;;  %6092 = vmatprep.mubr.msk.bf16.mxu1 %vm6986_vm1, %v9428_v34  ;;  %v609_v53 = vld [vmem:[%s9426_s3 + $0xb8] sm:$0xff] }
 0x38b   :  { %6102 = vmatprep.subr.bf16.mxu1 %v9428_v34  ;;  %v3036_v58 = vpop.permute.xlu1 %3035 }
 0x38c   :  { %v7810_v63 = vpop.permute.xlu0 %3082 }
 0x38d   :  { %6087 = vmatmul.mubr.msk.bf16.vlgmr.msra.gmra.mxu0 %vm653_vm2, %v7506_v56  ;;  %2286 = vmax.xlane.f32.xlu1 %v2285_v43 }
 0x38e   :  { %6097 = vmatpush3.bf16.msra.mxu0 %v2989_v44  ;;  %6098 = vmatprep.mubr.msk.bf16.mxu0 %vm6986_vm1, %v9428_v34 }
 0x38f   :  { %6108 = vmatprep.subr.bf16.mxu0 %v9428_v34  ;;  %v7812_v4 = vpop.permute.xlu1 %3129 }
 0x390   :  { %6093 = vmatmul.mubr.msk.bf16.vlgmr.msra.gmra.mxu1 %vm653_vm2, %v7513_v37  ;;  %v7814_v5 = vpop.permute.xlu0 %3176 }
 0x391   :  { %6103 = vmatpush3.bf16.msra.mxu1 %v3036_v58  ;;  %2298 = vmax.xlane.f32.xlu1 %v2297_v59  ;;  %9452 = vst [vmem:[#allocation4_spill] sm:$0xff] %v7814_v5  ;;  %v607_v59 = vld [vmem:[%s9426_s3 + $0xa8] sm:$0xff] }
 0x392   :  { %6104 = vmatprep.mubr.msk.bf16.mxu1 %vm6986_vm1, %v9428_v34  ;;  %6114 = vmatprep.subr.bf16.mxu1 %v9428_v34 }
 0x393   :  { %v7816_v6 = vpop.permute.xlu1 %3223 }
 0x394   :  { %9453 = vst [vmem:[#allocation5_spill] sm:$0xff] %v7816_v6  ;;  %v7818_v61 = vpop.permute.xlu0 %3270 }
 0x395   :  { %9454 = vst [vmem:[#allocation6_spill] sm:$0xff] %v7818_v61 }
 0x397   :  { %v7820_v45 = vpop.permute.xlu1 %3317 }
 0x398   :  { %9455 = vst [vmem:[#allocation7_spill] sm:$0xff] %v7820_v45  ;;  %v7828_v62 = vpop.permute.xlu0 %3364 }
 0x399   :  { %9456 = vst [vmem:[#allocation8_spill] sm:$0xff] %v7828_v62 }
 0x39b   :  { %v7839_v41 = vpop.permute.xlu1 %3411 }
 0x39c   :  { %9457 = vst [vmem:[#allocation9_spill] sm:$0xff] %v7839_v41  ;;  %v7846_v33 = vpop.permute.xlu0 %3552 }
 0x39d   :  { %9458 = vst [vmem:[#allocation10_spill] sm:$0xff] %v7846_v33 }
 0x39f   :  { %v7854_v27 = vpop.permute.xlu1 %3505 }
 0x3a0   :  { %9459 = vst [vmem:[#allocation11_spill] sm:$0xff] %v7854_v27  ;;  %v7861_v47 = vpop.permute.xlu0 %3740 }
 0x3a1   :  { %9460 = vst [vmem:[#allocation12_spill] sm:$0xff] %v7861_v47 }
 0x3a3   :  { %v7868_v52 = vpop.permute.xlu1 %3599 }
 0x3a4   :  { %9461 = vst [vmem:[#allocation13_spill] sm:$0xff] %v7868_v52 }
 0x3b7   :  { %v1144_v7 = vpop.f32.mrf.mxu1 }
 0x3b8   :  { %v7830_v13 = vadd.f32 %v1144_v7, %v604_v9  ;;  %v7880_v7 = vpop.permute.xlu0 %3928 }
 0x3b9   :  { %v1094_v15 = vpop.f32.mrf.mxu0  ;;  %v5962_v14 = vpop.f32.mrf.mxu1  ;;  %9462 = vst [vmem:[#allocation14_spill] sm:$0xff] %v7880_v7 }
 0x3ba   :  { %v7835_v32 = vadd.f32 %v1094_v15, %v602_v12  ;;  %v2306_v21 = vsel %vm2251_vm3, %v7830_v13, -inf }
 0x3bb   :  { %v1147_v46 = vpop.f32.mrf.mxu1  ;;  %2307 = vmax.xlane.f32.xlu0 %v2306_v21  ;;  %v5956_v2 = vpop.f32.mrf.mxu0 }
 0x3bc   :  { %v7841_v29 = vadd.f32 %v1147_v46, %v605_v26  ;;  %v2300_v19 = vsel %vm2251_vm3, %v7835_v32, -inf  ;;  %v612_v26 = vld [vmem:[%s9426_s3 + $0xd0] sm:$0xff] }
 0x3bd   :  { %v5963_v18 = vpop.f32.mrf.mxu1  ;;  %v1097_v0 = vpop.f32.mrf.mxu0 }
 0x3be   :  { %v2309_v1 = vsel %vm2251_vm3, %v7841_v29, -inf  ;;  %v7852_v49 = vadd.f32 %v1097_v0, %v603_v8  ;;  %v7893_v18 = vpop.permute.xlu1 %3693  ;;  %v610_v0 = vld [vmem:[%s9426_s3 + $0xc0] sm:$0xff] }
 0x3bf   :  { %2310 = vmax.xlane.f32.xlu1 %v2309_v1  ;;  %2301 = vmax.xlane.f32.xlu0 %v2300_v19  ;;  %v5957_v16 = vpop.f32.mrf.mxu0  ;;  %9463 = vst [vmem:[#allocation15_spill] sm:$0xff] %v7893_v18 }
 0x3c0   :  { %v2303_v35 = vsel %vm2251_vm3, %v7852_v49, -inf }
 0x3c1   :  { %v1194_v54 = vpop.f32.mrf.mxu0 }
 0x3c2   :  { %v7873_v43 = vadd.f32 %v1194_v54, %v606_v42 }
 0x3c3   :  { %2304 = vmax.xlane.f32.xlu1 %v2303_v35  ;;  %v5968_v39 = vpop.f32.mrf.mxu0  ;;  %v613_v35 = vld [vmem:[%s9426_s3 + $0xd8] sm:$0xff] }
 0x3c4   :  { %v2312_v8 = vsel %vm2251_vm3, %v7873_v43, -inf }
 0x3c5   :  { %v1244_v30 = vpop.f32.mrf.mxu1  ;;  %v1197_v38 = vpop.f32.mrf.mxu0 }
 0x3c6   :  { %v7866_v51 = vadd.f32 %v1244_v30, %v608_v20  ;;  %v7887_v21 = vadd.f32 %v1197_v38, %v607_v59  ;;  %v7903_v20 = vpop.permute.xlu0 %4116  ;;  %v7916_v59 = vpop.permute.xlu1 %3787 }
 0x3c7   :  { %v5974_v28 = vpop.f32.mrf.mxu1  ;;  %v5969_v44 = vpop.f32.mrf.mxu0  ;;  %9464 = vst [vmem:[#allocation16_spill] sm:$0xff] %v7903_v20  ;;  %9465 = vst [vmem:[#allocation17_spill] sm:$0xff] %v7916_v59 }
 0x3c8   :  { %v2318_v58 = vsel %vm2251_vm3, %v7866_v51, -inf  ;;  %v2315_v30 = vsel %vm2251_vm3, %v7887_v21, -inf  ;;  %v611_v28 = vld [vmem:[%s9426_s3 + $0xc8] sm:$0xff] }
 0x3c9   :  { %v1247_v9 = vpop.f32.mrf.mxu1  ;;  %2319 = vmax.xlane.f32.xlu0 %v2318_v58  ;;  %v1294_v15 = vpop.f32.mrf.mxu0 }
 0x3ca   :  { %v7882_v12 = vadd.f32 %v1247_v9, %v609_v53  ;;  %v7905_v39 = vadd.f32 %v1294_v15, %v610_v0  ;;  %v616_v15 = vld [vmem:[%s9426_s3 + $0xf0] sm:$0xff] }
 0x3cb   :  { %v5975_v14 = vpop.f32.mrf.mxu1  ;;  %v5980_v46 = vpop.f32.mrf.mxu0 }
 0x3cc   :  { %v2321_v2 = vsel %vm2251_vm3, %v7882_v12, -inf }
 0x3cd   :  { %v1344_v1 = vpop.f32.mrf.mxu1  ;;  %2322 = vmax.xlane.f32.xlu1 %v2321_v2  ;;  %2313 = vmax.xlane.f32.xlu0 %v2312_v8  ;;  %v1297_v19 = vpop.f32.mrf.mxu0  ;;  %v2324_v2 = vsel %vm2251_vm3, %v7905_v39, -inf  ;;  %v614_v8 = vld [vmem:[%s9426_s3 + $0xe0] sm:$0xff] }
 0x3ce   :  { %v7898_v16 = vadd.f32 %v1344_v1, %v612_v26  ;;  %v7921_v14 = vadd.f32 %v1297_v19, %v611_v28  ;;  %v7930_v1 = vpop.permute.xlu0 %4304 }
 0x3cf   :  { %v5986_v54 = vpop.f32.mrf.mxu1  ;;  %v5981_v42 = vpop.f32.mrf.mxu0  ;;  %9466 = vst [vmem:[#allocation18_spill] sm:$0xff] %v7930_v1 }
 0x3d0   :  { %v2330_v38 = vsel %vm2251_vm3, %v7898_v16, -inf  ;;  %v617_v42 = vld [vmem:[%s9426_s3 + $0xf8] sm:$0xff]  ;;  %v2327_v28 = vsel %vm2251_vm3, %v7921_v14, -inf }
 0x3d1   :  { %v1347_v53 = vpop.f32.mrf.mxu1  ;;  %2316 = vmax.xlane.f32.xlu1 %v2315_v30  ;;  %2331 = vmax.xlane.f32.xlu0 %v2330_v38 }
 0x3d2   :  { %v7914_v44 = vadd.f32 %v1347_v53, %v613_v35  ;;  %v1394_v58 = vpop.f32.mrf.mxu0 }
 0x3d3   :  { %v5987_v9 = vpop.f32.mrf.mxu1  ;;  %v7937_v30 = vadd.f32 %v1394_v58, %v614_v8  ;;  %v620_v8 = vld [vmem:[%s9426_s3 + $0x110] sm:$0xff] }
 0x3d4   :  { %v5992_v26 = vpop.f32.mrf.mxu0  ;;  %v2333_v46 = vsel %vm2251_vm3, %v7914_v44, -inf  ;;  %v7943_v9 = vpop.permute.xlu1 %3881 }
 0x3d5   :  { %v1444_v0 = vpop.f32.mrf.mxu1  ;;  %2334 = vmax.xlane.f32.xlu1 %v2333_v46  ;;  %2325 = vmax.xlane.f32.xlu0 %v2324_v2  ;;  %9467 = vst [vmem:[#allocation19_spill] sm:$0xff] %v7943_v9 }
 0x3d6   :  { %v1397_v54 = vpop.f32.mrf.mxu0  ;;  %v7932_v35 = vadd.f32 %v1444_v0, %v616_v15  ;;  %v615_v15 = vld [vmem:[%s9426_s3 + $0xe8] sm:$0xff]  ;;  %v7953_v0 = vpop.permute.xlu0 %3458 }
 0x3d7   :  { %v5998_v19 = vpop.f32.mrf.mxu1  ;;  %9468 = vst [vmem:[#allocation20_spill] sm:$0xff] %v7953_v0 }
 0x3d8   :  { %v5993_v38 = vpop.f32.mrf.mxu0  ;;  %v2342_v53 = vsel %vm2251_vm3, %v7932_v35, -inf  ;;  %v7955_v19 = vadd.f32 %v1397_v54, %v615_v15  ;;  %v7966_v1 = vpop.permute.xlu1 %3975  ;;  %v621_v15 = vld [vmem:[%s9426_s3 + $0x118] sm:$0xff] }
 0x3d9   :  { %v1447_v26 = vpop.f32.mrf.mxu1  ;;  %2328 = vmax.xlane.f32.xlu1 %v2327_v28  ;;  %2343 = vmax.xlane.f32.xlu0 %v2342_v53  ;;  %v2336_v28 = vsel %vm2251_vm3, %v7937_v30, -inf  ;;  %9469 = vst [vmem:[#allocation21_spill] sm:$0xff] %v7966_v1 }
 0x3da   :  { %v7948_v46 = vadd.f32 %v1447_v26, %v617_v42  ;;  %v1494_v58 = vpop.f32.mrf.mxu0  ;;  %v618_v42 = vld [vmem:[%s9426_s3 + $0x100] sm:$0xff]  ;;  %v2339_v7 = vsel %vm2251_vm3, %v7955_v19, -inf }
 0x3db   :  { %v5999_v2 = vpop.f32.mrf.mxu1 }
 0x3dc   :  { %v6004_v38 = vpop.f32.mrf.mxu0  ;;  %v2345_v34 = vsel %vm2251_vm3, %v7948_v46, -inf }
 0x3dd   :  { %v1544_v53 = vpop.f32.mrf.mxu1  ;;  %2346 = vmax.xlane.f32.xlu1 %v2345_v34  ;;  %2337 = vmax.xlane.f32.xlu0 %v2336_v28  ;;  %v7971_v38 = vadd.f32 %v1494_v58, %v618_v42 }
 0x3de   :  { %v1497_v26 = vpop.f32.mrf.mxu0  ;;  %v7964_v2 = vadd.f32 %v1544_v53, %v620_v8  ;;  %v619_v8 = vld [vmem:[%s9426_s3 + $0x108] sm:$0xff]  ;;  %v7980_v53 = vpop.permute.xlu0 %3646 }
 0x3df   :  { %v6010_v54 = vpop.f32.mrf.mxu1  ;;  %9470 = vst [vmem:[#allocation22_spill] sm:$0xff] %v7980_v53  ;;  %v7987_v1 = vadd.f32 %v1497_v26, %v619_v8 }
 0x3e0   :  { %v6005_v20 = vpop.f32.mrf.mxu0  ;;  %v2354_v34 = vsel %vm2251_vm3, %v7964_v2, -inf }
 0x3e1   :  { %v1547_v28 = vpop.f32.mrf.mxu1  ;;  %2340 = vmax.xlane.f32.xlu1 %v2339_v7  ;;  %2355 = vmax.xlane.f32.xlu0 %v2354_v34  ;;  %v624_v20 = vld [vmem:[%s9426_s3 + $0x130] sm:$0xff]  ;;  %v2348_v7 = vsel %vm2251_vm3, %v7971_v38, -inf  ;;  %v7993_v34 = vpop.permute.xlu1 %4069  ;;  %v2351_v53 = vsel %vm2251_vm3, %v7987_v1, -inf }
 0x3e2   :  { %v7982_v54 = vadd.f32 %v1547_v28, %v621_v15  ;;  %v1594_v58 = vpop.f32.mrf.mxu0  ;;  %9471 = vst [vmem:[#allocation23_spill] sm:$0xff] %v7993_v34  ;;  %v622_v15 = vld [vmem:[%s9426_s3 + $0x120] sm:$0xff]  ;;  %v8003_v8 = vpop.permute.xlu0 %3834 }
 0x3e3   :  { %v6011_v42 = vpop.f32.mrf.mxu1  ;;  %9472 = vst [vmem:[#allocation24_spill] sm:$0xff] %v8003_v8  ;;  %v8005_v18 = vadd.f32 %v1594_v58, %v622_v15 }
 0x3e4   :  { %v6016_v9 = vpop.f32.mrf.mxu0  ;;  %v2357_v59 = vsel %vm2251_vm3, %v7982_v54, -inf }
 0x3e5   :  { %v1644_v28 = vpop.f32.mrf.mxu1  ;;  %2358 = vmax.xlane.f32.xlu1 %v2357_v59  ;;  %2349 = vmax.xlane.f32.xlu0 %v2348_v7  ;;  %v625_v9 = vld [vmem:[%s9426_s3 + $0x138] sm:$0xff]  ;;  %v8018_v58 = vpop.permute.xlu1 %4163  ;;  %v2360_v37 = vsel %vm2251_vm3, %v8005_v18, -inf }
 0x3e6   :  { %v1597_v42 = vpop.f32.mrf.mxu0  ;;  %v7998_v47 = vadd.f32 %v1644_v28, %v624_v20  ;;  %v623_v20 = vld [vmem:[%s9426_s3 + $0x128] sm:$0xff]  ;;  %9473 = vst [vmem:[#allocation25_spill] sm:$0xff] %v8018_v58 }
 0x3e7   :  { %v6022_v26 = vpop.f32.mrf.mxu1  ;;  %v8020_v15 = vadd.f32 %v1597_v42, %v623_v20 }
 0x3e8   :  { %v6017_v34 = vpop.f32.mrf.mxu0  ;;  %v2366_v59 = vsel %vm2251_vm3, %v7998_v47, -inf }
 0x3e9   :  { %v1647_v7 = vpop.f32.mrf.mxu1  ;;  %2352 = vmax.xlane.f32.xlu1 %v2351_v53  ;;  %2367 = vmax.xlane.f32.xlu0 %v2366_v59  ;;  %v8026_v53 = vpop.permute.xlu0 %4022  ;;  %v2363_v42 = vsel %vm2251_vm3, %v8020_v15, -inf }
 0x3ea   :  { %v8014_v28 = vadd.f32 %v1647_v7, %v625_v9  ;;  %v8016_v26 = vpop.f32.mrf.mxu0  ;;  %9474 = vst [vmem:[#allocation26_spill] sm:$0xff] %v8026_v53  ;;  %v8032_v20 = vpop.permute.xlu1 %4257 }
 0x3eb   :  { %v6023_v34 = vpop.f32.mrf.mxu1  ;;  %9475 = vst [vmem:[#allocation27_spill] sm:$0xff] %v8032_v20 }
 0x3ec   :  { %v6028_v8 = vpop.f32.mrf.mxu0  ;;  %v2369_v56 = vsel %vm2251_vm3, %v8014_v28, -inf }
 0x3ed   :  { %v1744_v52 = vpop.f32.mrf.mxu1  ;;  %2370 = vmax.xlane.f32.xlu1 %v2369_v56  ;;  %2361 = vmax.xlane.f32.xlu0 %v2360_v37 }
 0x3ee   :  { %v8028_v9 = vpop.f32.mrf.mxu0  ;;  %v8043_v41 = vpop.permute.xlu1 %4351 }
 0x3ef   :  { %v6034_v59 = vpop.f32.mrf.mxu1  ;;  %9476 = vst [vmem:[#allocation28_spill] sm:$0xff] %v8043_v41 }
 0x3f0   :  { %v6029_v7 = vpop.f32.mrf.mxu0 }
 0x3f1   :  { %v8034_v8 = vpop.f32.mrf.mxu1  ;;  %2364 = vmax.xlane.f32.xlu1 %v2363_v42 }
 0x3f2   :  { %v8036_v34 = vpop.f32.mrf.mxu0  ;;  %v2254_v58 = vpop.xlane.xlu0 %2253 }
 0x3f3   :  { %v2444_v56 = vsub.f32 %v7637_v17, %v2254_v58  ;;  %v6035_v37 = vpop.f32.mrf.mxu1 }
 0x3f4   :  { %v6040_v33 = vpop.f32.mrf.mxu0 }
 0x3f5   :  { %v2508_v53 = vmul.f32 1.442695, %v2444_v56  ;;  %v8039_v0 = vpop.f32.mrf.mxu1  ;;  %v8048_v33 = vpop.permute.xlu1 %4210 }
 0x3f6   :  { %v8041_v59 = vpop.f32.mrf.mxu0  ;;  %9477 = vst [vmem:[#allocation29_spill] sm:$0xff] %v8048_v33 }
 0x3f7   :  { %6648 = vpow2.f32 %v2508_v53  ;;  %v6046_v7 = vpop.f32.mrf.mxu1  ;;  %v2278_v27 = vpop.xlane.xlu0 %2277 }
 0x3f8   :  { %v6041_v20 = vpop.f32.mrf.mxu0  ;;  %v2452_v42 = vsub.f32 %v7652_v23, %v2278_v27 }
 0x3f9   :  { %v8046_v45 = vpop.f32.mrf.mxu1 }
 0x3fa   :  { %v2524_v62 = vmul.f32 1.442695, %v2452_v42 }
 0x3fb   :  { %v6047_v6 = vpop.f32.mrf.mxu1  ;;  %v2260_v17 = vpop.xlane.xlu0 %2259 }
 0x3fc   :  { %6650 = vpow2.f32 %v2524_v62  ;;  %v2446_v58 = vsub.f32 %v7656_v25, %v2260_v17  ;;  %v628_v25 = vld [vmem:[%s9426_s3 + $0x150] sm:$0xff] }
 0x3fe   :  { %v2512_v37 = vmul.f32 1.442695, %v2446_v58  ;;  %v8063_v58 = vadd.f32 %v1744_v52, %v628_v25 }
 0x3ff   :  { %v2290_v56 = vpop.xlane.xlu0 %2289 }
 0x400   :  { %v2456_v53 = vsub.f32 %v7678_v60, %v2290_v56  ;;  %6652 = vpow2.f32 %v2512_v37  ;;  %v626_v56 = vld [vmem:[%s9426_s3 + $0x140] sm:$0xff] }
 0x402   :  { %v2257_v7 = vpop.xlane.xlu1 %2256  ;;  %v2532_v62 = vmul.f32 1.442695, %v2456_v53 }
 0x403   :  { %v2445_v41 = vsub.f32 %v7682_v3, %v2257_v7  ;;  %v2263_v27 = vpop.xlane.xlu0 %2262 }
 0x404   :  { %v8053_v20 = vpop.eup %6648  ;;  %v2447_v53 = vsub.f32 %v7687_v48, %v2263_v27  ;;  %v629_v27 = vld [vmem:[%s9426_s3 + $0x158] sm:$0xff] }
 0x405   :  { %v2510_v23 = vmul.f32 1.442695, %v2445_v41  ;;  %v2636_v6 = vsel %vm2251_vm3, %v8053_v20, 0.0 }
 0x406   :  { %2637 = vadd.xlane.f32.xlu0 %v2636_v6  ;;  %v2281_v42 = vpop.xlane.xlu1 %2280  ;;  %v2514_v6 = vmul.f32 1.442695, %v2447_v53 }
 0x407   :  { %6654 = vpow2.f32 %v2510_v23  ;;  %v2453_v60 = vsub.f32 %v7700_v55, %v2281_v42  ;;  %v2266_v37 = vpop.xlane.xlu0 %2265  ;;  %v8072_v55 = vadd.f32 %v8016_v26, %v626_v56  ;;  %v2378_v23 = vsel %vm2251_vm3, %v8063_v58, -inf }
 0x408   :  { %6656 = vpow2.f32 %v2532_v62  ;;  %v2448_v7 = vsub.f32 %v7706_v10, %v2266_v37  ;;  %v8099_v37 = vadd.f32 %v8034_v8, %v629_v27  ;;  %v630_v8 = vld [vmem:[%s9426_s3 + $0x160] sm:$0xff] }
 0x409   :  { %v8061_v17 = vpop.eup %6650  ;;  %v2526_v3 = vmul.f32 1.442695, %v2453_v60  ;;  %v2372_v25 = vsel %vm2251_vm3, %v8072_v55, -inf }
 0x40a   :  { %9478 = vst [vmem:[#allocation30_spill] sm:$0xff] %v8061_v17  ;;  %v2660_v41 = vsel %vm2251_vm3, %v8061_v17, 0.0  ;;  %v2293_v52 = vpop.xlane.xlu1 %2292  ;;  %v2516_v42 = vmul.f32 1.442695, %v2448_v7  ;;  %v627_v7 = vld [vmem:[%s9426_s3 + $0x148] sm:$0xff] }
 0x40b   :  { %6658 = vpow2.f32 %v2526_v3  ;;  %2661 = vadd.xlane.f32.xlu0 %v2660_v41  ;;  %v2457_v62 = vsub.f32 %v7717_v57, %v2293_v52  ;;  %v632_v41 = vld [vmem:[%s9426_s3 + $0x170] sm:$0xff] }
 0x40c   :  { %6660 = vpow2.f32 %v2514_v6  ;;  %v8107_v52 = vadd.f32 %v8039_v0, %v632_v41  ;;  %v8121_v0 = vadd.f32 %v8036_v34, %v630_v8 }
 0x40d   :  { %v8080_v60 = vpop.eup %6652  ;;  %v2534_v26 = vmul.f32 1.442695, %v2457_v62  ;;  %6662 = vpow2.f32 %v2516_v42  ;;  %v8115_v62 = vadd.f32 %v8028_v9, %v627_v7  ;;  %v2272_v9 = vpop.xlane.xlu0 %2271 }
 0x40e   :  { %v2642_v57 = vsel %vm2251_vm3, %v8080_v60, 0.0  ;;  %v2450_v34 = vsub.f32 %v7728_v50, %v2272_v9 }
 0x40f   :  { %2379 = vmax.xlane.f32.xlu0 %v2378_v23  ;;  %6664 = vpow2.f32 %v2534_v26  ;;  %v2269_v23 = vpop.xlane.xlu1 %2268  ;;  %v2390_v26 = vsel %vm2251_vm3, %v8107_v52, -inf  ;;  %v2375_v27 = vsel %vm2251_vm3, %v8115_v62, -inf }
 0x410   :  { %v2449_v42 = vsub.f32 %v7739_v22, %v2269_v23  ;;  %v2384_v22 = vsel %vm2251_vm3, %v8121_v0, -inf  ;;  %v633_v23 = vld [vmem:[%s9426_s3 + $0x178] sm:$0xff]  ;;  %v2520_v50 = vmul.f32 1.442695, %v2450_v34 }
 0x413   :  { %2373 = vmax.xlane.f32.xlu0 %v2372_v25  ;;  %v2381_v25 = vsel %vm2251_vm3, %v8099_v37, -inf }
 0x414   :  { %v8082_v48 = vpop.eup %6654 }
 0x415   :  { %v2639_v10 = vsel %vm2251_vm3, %v8082_v48, 0.0  ;;  %v8091_v3 = vpop.eup %6656 }
 0x416   :  { %2640 = vadd.xlane.f32.xlu1 %v2639_v10  ;;  %9479 = vst [vmem:[#allocation31_spill] sm:$0xff] %v8091_v3  ;;  %v2672_v6 = vsel %vm2251_vm3, %v8091_v3, 0.0  ;;  %v2518_v10 = vmul.f32 1.442695, %v2449_v42  ;;  %v8144_v42 = vadd.f32 %v8046_v45, %v633_v23 }
 0x417   :  { %2643 = vadd.xlane.f32.xlu0 %v2642_v57 }
 0x418   :  { %v8096_v56 = vpop.eup %6658  ;;  %6666 = vpow2.f32 %v2518_v10  ;;  %v631_v10 = vld [vmem:[%s9426_s3 + $0x168] sm:$0xff]  ;;  %v2393_v45 = vsel %vm2251_vm3, %v8144_v42, -inf }
 0x419   :  { %9480 = vst [vmem:[#allocation32_spill] sm:$0xff] %v8096_v56  ;;  %v2663_v53 = vsel %vm2251_vm3, %v8096_v56, 0.0  ;;  %v8127_v57 = vpop.eup %6660  ;;  %6668 = vpow2.f32 %v2520_v50 }
 0x41a   :  { %2664 = vadd.xlane.f32.xlu1 %v2663_v53  ;;  %v8131_v41 = vpop.eup %6662  ;;  %v2645_v53 = vsel %vm2251_vm3, %v8127_v57, 0.0 }
 0x41b   :  { %2673 = vadd.xlane.f32.xlu0 %v2672_v6  ;;  %9481 = vst [vmem:[#allocation33_spill] sm:$0xff] %v8131_v41  ;;  %v2275_v6 = vpop.xlane.xlu1 %2274  ;;  %v2648_v8 = vsel %vm2251_vm3, %v8131_v41, 0.0 }
 0x41c   :  { %v8136_v7 = vpop.eup %6664 }
 0x41d   :  { %9482 = vst [vmem:[#allocation34_spill] sm:$0xff] %v8136_v7 }
 0x41e   :  { %2382 = vmax.xlane.f32.xlu1 %v2381_v25  ;;  %v2451_v25 = vsub.f32 %v7761_v11, %v2275_v6  ;;  %v636_v11 = vld [vmem:[%s9426_s3 + $0x190] sm:$0xff] }
 0x41f   :  { %2391 = vmax.xlane.f32.xlu0 %v2390_v26  ;;  %v2675_v26 = vsel %vm2251_vm3, %v8136_v7, 0.0 }
 0x420   :  { %v2522_v9 = vmul.f32 1.442695, %v2451_v25 }
 0x422   :  { %2376 = vmax.xlane.f32.xlu1 %v2375_v27  ;;  %v8153_v27 = vadd.f32 %v8041_v59, %v631_v10  ;;  %6670 = vpow2.f32 %v2522_v9  ;;  %v634_v59 = vld [vmem:[%s9426_s3 + $0x180] sm:$0xff]  ;;  %v637_v10 = vld [vmem:[%s9426_s3 + $0x198] sm:$0xff] }
 0x423   :  { %2385 = vmax.xlane.f32.xlu0 %v2384_v22  ;;  %v2284_v22 = vpop.xlane.xlu0 %2283 }
 0x424   :  { %v2387_v34 = vsel %vm2251_vm3, %v8153_v27, -inf  ;;  %v2454_v6 = vsub.f32 %v7750_v31, %v2284_v22  ;;  %v635_v31 = vld [vmem:[%s9426_s3 + $0x188] sm:$0xff] }
 0x426   :  { %2646 = vadd.xlane.f32.xlu1 %v2645_v53  ;;  %v8162_v53 = vpop.eup %6666  ;;  %v2528_v22 = vmul.f32 1.442695, %v2454_v6 }
 0x427   :  { %2649 = vadd.xlane.f32.xlu0 %v2648_v8  ;;  %9483 = vst [vmem:[#allocation35_spill] sm:$0xff] %v8162_v53  ;;  %v2287_v8 = vpop.xlane.xlu1 %2286  ;;  %v2296_v6 = vpop.xlane.xlu0 %2295 }
 0x428   :  { %6672 = vpow2.f32 %v2528_v22  ;;  %v638_v22 = vld [vmem:[%s9426_s3 + $0x1a0] sm:$0xff] }
 0x42a   :  { %2676 = vadd.xlane.f32.xlu1 %v2675_v26 }
 0x42e   :  { %2394 = vmax.xlane.f32.xlu1 %v2393_v45  ;;  %v2651_v45 = vsel %vm2251_vm3, %v8162_v53, 0.0 }
 0x432   :  { %v1944_v23 = vpop.f32.mrf.mxu1  ;;  %2388 = vmax.xlane.f32.xlu1 %v2387_v34 }
 0x433   :  { %v8168_v50 = vadd.f32 %v1944_v23, %v636_v11  ;;  %v2455_v11 = vsub.f32 %v7779_v24, %v2287_v8 }
 0x434   :  { %v1894_v25 = vpop.f32.mrf.mxu0  ;;  %v6058_v26 = vpop.f32.mrf.mxu1 }
 0x435   :  { %v8173_v9 = vadd.f32 %v1894_v25, %v634_v59  ;;  %v2402_v34 = vsel %vm2251_vm3, %v8168_v50, -inf  ;;  %v2530_v24 = vmul.f32 1.442695, %v2455_v11 }
 0x436   :  { %v6052_v33 = vpop.f32.mrf.mxu0  ;;  %v1947_v3 = vpop.f32.mrf.mxu1  ;;  %2652 = vadd.xlane.f32.xlu1 %v2651_v45  ;;  %2403 = vmax.xlane.f32.xlu0 %v2402_v34 }
 0x437   :  { %v8183_v23 = vadd.f32 %v1947_v3, %v637_v10  ;;  %v2396_v33 = vsel %vm2251_vm3, %v8173_v9, -inf  ;;  %v8191_v45 = vpop.eup %6668  ;;  %6674 = vpow2.f32 %v2530_v24  ;;  %v641_v24 = vld [vmem:[%s9426_s3 + $0x1b8] sm:$0xff] }
 0x438   :  { %v1897_v59 = vpop.f32.mrf.mxu0  ;;  %v6059_v25 = vpop.f32.mrf.mxu1  ;;  %9484 = vst [vmem:[#allocation36_spill] sm:$0xff] %v8191_v45  ;;  %v2654_v10 = vsel %vm2251_vm3, %v8191_v45, 0.0 }
 0x439   :  { %v8185_v26 = vadd.f32 %v1897_v59, %v635_v31  ;;  %v2405_v7 = vsel %vm2251_vm3, %v8183_v23, -inf  ;;  %v8197_v31 = vpop.eup %6670  ;;  %v2458_v59 = vsub.f32 %v7770_v40, %v2296_v6  ;;  %v2299_v25 = vpop.xlane.xlu1 %2298 }
 0x43a   :  { %v6053_v34 = vpop.f32.mrf.mxu0  ;;  %2406 = vmax.xlane.f32.xlu1 %v2405_v7  ;;  %2397 = vmax.xlane.f32.xlu0 %v2396_v33  ;;  %9485 = vst [vmem:[#allocation37_spill] sm:$0xff] %v8197_v31  ;;  %v640_v7 = vld [vmem:[%s9426_s3 + $0x1b0] sm:$0xff]  ;;  %v2657_v40 = vsel %vm2251_vm3, %v8197_v31, 0.0  ;;  %v8229_v56 = vpop.eup %6672 }
 0x43b   :  { %v2399_v8 = vsel %vm2251_vm3, %v8185_v26, -inf  ;;  %v2459_v34 = vsub.f32 %v7794_v36, %v2299_v25  ;;  %v639_v36 = vld [vmem:[%s9426_s3 + $0x1a8] sm:$0xff]  ;;  %9489 = vst [vmem:[#allocation41_spill] sm:$0xff] %v8229_v56 }
 0x43c   :  { %v1994_v3 = vpop.f32.mrf.mxu0 }
 0x43e   :  { %v6064_v61 = vpop.f32.mrf.mxu0  ;;  %2400 = vmax.xlane.f32.xlu1 %v2399_v8  ;;  %2655 = vadd.xlane.f32.xlu0 %v2654_v10  ;;  %v8214_v10 = vadd.f32 %v1994_v3, %v638_v22 }
 0x43f   :  { %v2536_v61 = vmul.f32 1.442695, %v2458_v59  ;;  %v2538_v59 = vmul.f32 1.442695, %v2459_v34 }
 0x440   :  { %v1997_v11 = vpop.f32.mrf.mxu0  ;;  %v2044_v33 = vpop.f32.mrf.mxu1  ;;  %9486 = vst [vmem:[#allocation38_spill] sm:$0xff] %v8214_v10  ;;  %v2408_v22 = vsel %vm2251_vm3, %v8214_v10, -inf }
 0x441   :  { %v8207_v45 = vadd.f32 %v2044_v33, %v640_v7  ;;  %6676 = vpow2.f32 %v2536_v61  ;;  %v8223_v31 = vadd.f32 %v1997_v11, %v639_v36 }
 0x442   :  { %v6065_v6 = vpop.f32.mrf.mxu0  ;;  %v6070_v8 = vpop.f32.mrf.mxu1  ;;  %2658 = vadd.xlane.f32.xlu1 %v2657_v40  ;;  %6678 = vpow2.f32 %v2538_v59 }
 0x443   :  { %v2414_v17 = vsel %vm2251_vm3, %v8207_v45, -inf  ;;  %9488 = vst [vmem:[#allocation40_spill] sm:$0xff] %v8223_v31  ;;  %v2411_v5 = vsel %vm2251_vm3, %v8223_v31, -inf }
 0x444   :  { %v2047_v25 = vpop.f32.mrf.mxu1  ;;  %v2094_v7 = vpop.f32.mrf.mxu0  ;;  %2415 = vmax.xlane.f32.xlu0 %v2414_v17  ;;  %v644_v17 = vld [vmem:[%s9426_s3 + $0x1d0] sm:$0xff] }
 0x445   :  { %v8221_v33 = vadd.f32 %v2047_v25, %v641_v24  ;;  %v2308_v40 = vpop.xlane.xlu0 %2307  ;;  %v642_v25 = vld [vmem:[%s9426_s3 + $0x1c0] sm:$0xff] }
 0x446   :  { %v6071_v6 = vpop.f32.mrf.mxu1  ;;  %v6076_v8 = vpop.f32.mrf.mxu0  ;;  %v2462_v11 = vsub.f32 %v7830_v13, %v2308_v40  ;;  %v645_v13 = vld [vmem:[%s9426_s3 + $0x1d8] sm:$0xff] }
 0x447   :  { %9487 = vst [vmem:[#allocation39_spill] sm:$0xff] %v8221_v33  ;;  %v2417_v3 = vsel %vm2251_vm3, %v8221_v33, -inf }
 0x448   :  { %v2144_v34 = vpop.f32.mrf.mxu1  ;;  %2418 = vmax.xlane.f32.xlu1 %v2417_v3  ;;  %2409 = vmax.xlane.f32.xlu0 %v2408_v22  ;;  %v2311_v61 = vpop.xlane.xlu1 %2310  ;;  %v2666_v3 = vsel %vm2251_vm3, %v8229_v56, 0.0 }
 0x449   :  { %v2097_v24 = vpop.f32.mrf.mxu0  ;;  %v8238_v6 = vadd.f32 %v2144_v34, %v644_v17  ;;  %v8244_v22 = vpop.eup %6674  ;;  %v8249_v17 = vadd.f32 %v2094_v7, %v642_v25  ;;  %v2544_v34 = vmul.f32 1.442695, %v2462_v11  ;;  %v643_v7 = vld [vmem:[%s9426_s3 + $0x1c8] sm:$0xff] }
 0x44a   :  { %v6082_v36 = vpop.f32.mrf.mxu1  ;;  %9490 = vst [vmem:[#allocation42_spill] sm:$0xff] %v8244_v22  ;;  %v2302_v59 = vpop.xlane.xlu0 %2301  ;;  %v2669_v41 = vsel %vm2251_vm3, %v8244_v22, 0.0 }
 0x44b   :  { %v6077_v8 = vpop.f32.mrf.mxu0  ;;  %v2460_v10 = vsub.f32 %v7835_v32, %v2302_v59  ;;  %6680 = vpow2.f32 %v2544_v34  ;;  %v2420_v25 = vsel %vm2251_vm3, %v8249_v17, -inf  ;;  %v8267_v59 = vadd.f32 %v2097_v24, %v643_v7 }
 0x44c   :  { %v2147_v40 = vpop.f32.mrf.mxu1  ;;  %2412 = vmax.xlane.f32.xlu1 %v2411_v5  ;;  %2667 = vadd.xlane.f32.xlu0 %v2666_v3  ;;  %v2463_v8 = vsub.f32 %v7841_v29, %v2311_v61  ;;  %v2305_v33 = vpop.xlane.xlu1 %2304  ;;  %v2426_v5 = vsel %vm2251_vm3, %v8238_v6, -inf }
 0x44d   :  { %v2194_v36 = vpop.f32.mrf.mxu0  ;;  %v8253_v56 = vadd.f32 %v2147_v40, %v645_v13  ;;  %v2540_v13 = vmul.f32 1.442695, %v2460_v10 }
 0x44e   :  { %v6083_v31 = vpop.f32.mrf.mxu1  ;;  %v2546_v32 = vmul.f32 1.442695, %v2463_v8  ;;  %v8265_v3 = vpop.eup %6676 }
 0x44f   :  { %v6088_v53 = vpop.f32.mrf.mxu0  ;;  %v2461_v31 = vsub.f32 %v7852_v49, %v2305_v33  ;;  %9491 = vst [vmem:[#allocation43_spill] sm:$0xff] %v8265_v3  ;;  %v648_v49 = vld [vmem:[%s9426_s3 + $0x1f0] sm:$0xff]  ;;  %v8275_v34 = vpop.eup %6678  ;;  %v2678_v10 = vsel %vm2251_vm3, %v8265_v3, 0.0 }
 0x450   :  { %v2244_v11 = vpop.f32.mrf.mxu1  ;;  %2670 = vadd.xlane.f32.xlu1 %v2669_v41  ;;  %2427 = vmax.xlane.f32.xlu0 %v2426_v5  ;;  %v2429_v41 = vsel %vm2251_vm3, %v8253_v56, -inf  ;;  %6682 = vpow2.f32 %v2546_v32  ;;  %v647_v32 = vld [vmem:[%s9426_s3 + $0x1e8] sm:$0xff] }
 0x451   :  { %v2197_v29 = vpop.f32.mrf.mxu0  ;;  %v2542_v8 = vmul.f32 1.442695, %v2461_v31  ;;  %6684 = vpow2.f32 %v2540_v13  ;;  %v8282_v7 = vadd.f32 %v2244_v11, %v648_v49  ;;  %v2681_v13 = vsel %vm2251_vm3, %v8275_v34, 0.0 }
 0x452   :  { %v6094_v61 = vpop.f32.mrf.mxu1  ;;  %v2320_v53 = vpop.xlane.xlu0 %2319  ;;  %v8295_v49 = vadd.f32 %v2197_v29, %v647_v32 }
 0x453   :  { %v6089_v40 = vpop.f32.mrf.mxu0  ;;  %v2466_v22 = vsub.f32 %v7866_v51, %v2320_v53  ;;  %v646_v51 = vld [vmem:[%s9426_s3 + $0x1e0] sm:$0xff]  ;;  %6686 = vpow2.f32 %v2542_v8 }
 0x454   :  { %v2247_v33 = vpop.f32.mrf.mxu1  ;;  %2430 = vmax.xlane.f32.xlu1 %v2429_v41  ;;  %2421 = vmax.xlane.f32.xlu0 %v2420_v25  ;;  %v2423_v25 = vsel %vm2251_vm3, %v8267_v59, -inf  ;;  %v8292_v40 = vadd.f32 %v2194_v36, %v646_v51 }
 0x455   :  { %v2552_v61 = vmul.f32 1.442695, %v2466_v22 }
 0x456   :  { %v6095_v24 = vpop.f32.mrf.mxu1  ;;  %v2323_v5 = vpop.xlane.xlu1 %2322 }
 0x457   :  { %v2314_v53 = vpop.xlane.xlu0 %2313  ;;  %v2467_v22 = vsub.f32 %v7882_v12, %v2323_v5  ;;  %6688 = vpow2.f32 %v2552_v61  ;;  %v2432_v5 = vsel %vm2251_vm3, %v8292_v40, -inf }
 0x458   :  { %v2464_v31 = vsub.f32 %v7873_v43, %v2314_v53  ;;  %2424 = vmax.xlane.f32.xlu1 %v2423_v25  ;;  %2679 = vadd.xlane.f32.xlu0 %v2678_v10  ;;  %v2438_v43 = vsel %vm2251_vm3, %v8282_v7, -inf  ;;  %v649_v10 = vld [vmem:[%s9426_s3 + $0x1f8] sm:$0xff]  ;;  %v2435_v25 = vsel %vm2251_vm3, %v8295_v49, -inf  ;;  %s6991_s3 = smov 8  }
 0x459   :  { %v2554_v8 = vmul.f32 1.442695, %v2467_v22  ;;  %v8308_v51 = vadd.f32 %v2247_v33, %v649_v10 }
 0x45a   :  { %v2548_v11 = vmul.f32 1.442695, %v2464_v31  ;;  %v2317_v41 = vpop.xlane.xlu1 %2316 }
 0x45b   :  { %v2465_v24 = vsub.f32 %v7887_v21, %v2317_v41  ;;  %v2332_v3 = vpop.xlane.xlu0 %2331  ;;  %v8306_v21 = vpop.eup %6680 }
 0x45c   :  { %v2470_v36 = vsub.f32 %v7898_v16, %v2332_v3  ;;  %2682 = vadd.xlane.f32.xlu1 %v2681_v13  ;;  %2439 = vmax.xlane.f32.xlu0 %v2438_v43  ;;  %6690 = vpow2.f32 %v2548_v11  ;;  %v2441_v11 = vsel %vm2251_vm3, %v8308_v51, -inf  ;;  %v2690_v41 = vsel %vm2251_vm3, %v8306_v21, 0.0 }
 0x45d   :  { %v2550_v12 = vmul.f32 1.442695, %v2465_v24  ;;  %v8314_v13 = vpop.eup %6682 }
 0x45e   :  { %v2335_v29 = vpop.xlane.xlu1 %2334  ;;  %v2560_v61 = vmul.f32 1.442695, %v2470_v36 }
 0x45f   :  { %6692 = vpow2.f32 %v2550_v12  ;;  %v2326_v53 = vpop.xlane.xlu0 %2325  ;;  %v2471_v3 = vsub.f32 %v7914_v44, %v2335_v29 }
 0x460   :  { %v2468_v16 = vsub.f32 %v7905_v39, %v2326_v53  ;;  %2433 = vmax.xlane.f32.xlu1 %v2432_v5  ;;  %2436 = vmax.xlane.f32.xlu0 %v2435_v25  ;;  %6694 = vpow2.f32 %v2554_v8  ;;  %v8321_v39 = vpop.eup %6684  ;;  %v2693_v8 = vsel %vm2251_vm3, %v8314_v13, 0.0 }
 0x461   :  { %6696 = vpow2.f32 %v2560_v61  ;;  %v2562_v43 = vmul.f32 1.442695, %v2471_v3  ;;  %v8324_v36 = vpop.eup %6686  ;;  %v2684_v29 = vsel %vm2251_vm3, %v8321_v39, 0.0 }
 0x462   :  { %v2556_v32 = vmul.f32 1.442695, %v2468_v16  ;;  %v2329_v31 = vpop.xlane.xlu1 %2328 }
 0x463   :  { %v2469_v33 = vsub.f32 %v7921_v14, %v2329_v31  ;;  %v2344_v22 = vpop.xlane.xlu0 %2343  ;;  %v2687_v31 = vsel %vm2251_vm3, %v8324_v36, 0.0 }
 0x464   :  { %v2474_v24 = vsub.f32 %v7932_v35, %v2344_v22  ;;  %2442 = vmax.xlane.f32.xlu1 %v2441_v11  ;;  %2691 = vadd.xlane.f32.xlu0 %v2690_v41  ;;  %6698 = vpow2.f32 %v2556_v32  ;;  %v8330_v5 = vpop.eup %6688 }
 0x465   :  { %v2558_v44 = vmul.f32 1.442695, %v2469_v33  ;;  %v2702_v33 = vsel %vm2251_vm3, %v8330_v5, 0.0 }
 0x466   :  { %v2347_v10 = vpop.xlane.xlu1 %2346  ;;  %v2568_v14 = vmul.f32 1.442695, %v2474_v24 }
 0x467   :  { %6700 = vpow2.f32 %v2558_v44  ;;  %v2338_v12 = vpop.xlane.xlu0 %2337  ;;  %v2475_v61 = vsub.f32 %v7948_v46, %v2347_v10 }
 0x468   :  { %v2472_v35 = vsub.f32 %v7937_v30, %v2338_v12  ;;  %2694 = vadd.xlane.f32.xlu1 %v2693_v8  ;;  %2685 = vadd.xlane.f32.xlu0 %v2684_v29  ;;  %6702 = vpow2.f32 %v2562_v43 }
 0x469   :  { %v8334_v16 = vpop.eup %6690  ;;  %6704 = vpow2.f32 %v2568_v14  ;;  %v2570_v11 = vmul.f32 1.442695, %v2475_v61 }
 0x46a   :  { %v2564_v53 = vmul.f32 1.442695, %v2472_v35  ;;  %v2341_v25 = vpop.xlane.xlu1 %2340  ;;  %v2696_v10 = vsel %vm2251_vm3, %v8334_v16, 0.0 }
 0x46b   :  { %v2473_v3 = vsub.f32 %v7955_v19, %v2341_v25  ;;  %v2356_v32 = vpop.xlane.xlu0 %2355 }
 0x46c   :  { %v8341_v30 = vpop.eup %6692  ;;  %v2478_v22 = vsub.f32 %v7964_v2, %v2356_v32  ;;  %2688 = vadd.xlane.f32.xlu1 %v2687_v31  ;;  %2703 = vadd.xlane.f32.xlu0 %v2702_v33  ;;  %6706 = vpow2.f32 %v2564_v53 }
 0x46d   :  { %v2566_v46 = vmul.f32 1.442695, %v2473_v3  ;;  %v8344_v24 = vpop.eup %6694  ;;  %v2699_v43 = vsel %vm2251_vm3, %v8341_v30, 0.0 }
 0x46e   :  { %v2359_v41 = vpop.xlane.xlu1 %2358  ;;  %v2576_v19 = vmul.f32 1.442695, %v2478_v22  ;;  %v8350_v14 = vpop.eup %6696  ;;  %v2705_v25 = vsel %vm2251_vm3, %v8344_v24, 0.0 }
 0x46f   :  { %6708 = vpow2.f32 %v2566_v46  ;;  %v2350_v44 = vpop.xlane.xlu0 %2349  ;;  %v2479_v12 = vsub.f32 %v7982_v54, %v2359_v41  ;;  %v2714_v3 = vsel %vm2251_vm3, %v8350_v14, 0.0 }
 0x470   :  { %v2476_v2 = vsub.f32 %v7971_v38, %v2350_v44  ;;  %2700 = vadd.xlane.f32.xlu0 %v2699_v43  ;;  %2697 = vadd.xlane.f32.xlu1 %v2696_v10  ;;  %6710 = vpow2.f32 %v2570_v11 }
 0x471   :  { %v8354_v35 = vpop.eup %6698  ;;  %6712 = vpow2.f32 %v2576_v19  ;;  %v2578_v31 = vmul.f32 1.442695, %v2479_v12 }
 0x472   :  { %v2572_v8 = vmul.f32 1.442695, %v2476_v2  ;;  %v2353_v29 = vpop.xlane.xlu1 %2352  ;;  %v2708_v41 = vsel %vm2251_vm3, %v8354_v35, 0.0 }
 0x473   :  { %v2477_v61 = vsub.f32 %v7987_v1, %v2353_v29  ;;  %v2368_v53 = vpop.xlane.xlu0 %2367 }
 0x474   :  { %v8361_v38 = vpop.eup %6700  ;;  %v2482_v32 = vsub.f32 %v7998_v47, %v2368_v53  ;;  %2706 = vadd.xlane.f32.xlu1 %v2705_v25  ;;  %2715 = vadd.xlane.f32.xlu0 %v2714_v3  ;;  %6714 = vpow2.f32 %v2572_v8 }
 0x475   :  { %v2574_v54 = vmul.f32 1.442695, %v2477_v61  ;;  %v8364_v22 = vpop.eup %6702  ;;  %v2711_v11 = vsel %vm2251_vm3, %v8361_v38, 0.0 }
 0x476   :  { %v2371_v33 = vpop.xlane.xlu1 %2370  ;;  %v2584_v1 = vmul.f32 1.442695, %v2482_v32  ;;  %v8370_v19 = vpop.eup %6704  ;;  %v2717_v10 = vsel %vm2251_vm3, %v8364_v22, 0.0 }
 0x477   :  { %6716 = vpow2.f32 %v2574_v54  ;;  %v2362_v46 = vpop.xlane.xlu0 %2361  ;;  %v2483_v12 = vsub.f32 %v8014_v28, %v2371_v33  ;;  %v2726_v29 = vsel %vm2251_vm3, %v8370_v19, 0.0 }
 0x478   :  { %v2480_v47 = vsub.f32 %v8005_v18, %v2362_v46  ;;  %2712 = vadd.xlane.f32.xlu0 %v2711_v11  ;;  %2709 = vadd.xlane.f32.xlu1 %v2708_v41  ;;  %6718 = vpow2.f32 %v2578_v31 }
 0x479   :  { %v8375_v2 = vpop.eup %6706  ;;  %6720 = vpow2.f32 %v2584_v1  ;;  %v2586_v25 = vmul.f32 1.442695, %v2483_v12 }
 0x47a   :  { %v2580_v44 = vmul.f32 1.442695, %v2480_v47  ;;  %v2365_v43 = vpop.xlane.xlu1 %2364  ;;  %v2720_v28 = vsel %vm2251_vm3, %v8375_v2, 0.0 }
 0x47b   :  { %v2481_v8 = vsub.f32 %v8020_v15, %v2365_v43 }
 0x47c   :  { %v8381_v61 = vpop.eup %6708  ;;  %2718 = vadd.xlane.f32.xlu1 %v2717_v10  ;;  %2727 = vadd.xlane.f32.xlu0 %v2726_v29  ;;  %6722 = vpow2.f32 %v2580_v44 }
 0x47d   :  { %v2582_v18 = vmul.f32 1.442695, %v2481_v8  ;;  %v8383_v53 = vpop.eup %6710  ;;  %v2723_v3 = vsel %vm2251_vm3, %v8381_v61, 0.0 }
 0x47e   :  { %v8389_v15 = vpop.eup %6712  ;;  %v2729_v54 = vsel %vm2251_vm3, %v8383_v53, 0.0 }
 0x47f   :  { %6724 = vpow2.f32 %v2582_v18  ;;  %v2738_v31 = vsel %vm2251_vm3, %v8389_v15, 0.0 }
 0x480   :  { %2724 = vadd.xlane.f32.xlu0 %v2723_v3  ;;  %2721 = vadd.xlane.f32.xlu1 %v2720_v28  ;;  %6726 = vpow2.f32 %v2586_v25 }
 0x481   :  { %v8391_v32 = vpop.eup %6714 }
 0x482   :  { %v2732_v11 = vsel %vm2251_vm3, %v8391_v32, 0.0 }
 0x484   :  { %v8397_v33 = vpop.eup %6716  ;;  %2730 = vadd.xlane.f32.xlu1 %v2729_v54  ;;  %2739 = vadd.xlane.f32.xlu0 %v2738_v31 }
 0x485   :  { %v8399_v1 = vpop.eup %6718  ;;  %v2735_v46 = vsel %vm2251_vm3, %v8397_v33, 0.0 }
 0x486   :  { %v8405_v41 = vpop.eup %6720  ;;  %v2741_v44 = vsel %vm2251_vm3, %v8399_v1, 0.0 }
 0x487   :  { %9492 = vst [vmem:[#allocation44_spill] sm:$0xff] %v8405_v41  ;;  %v2750_v43 = vsel %vm2251_vm3, %v8405_v41, 0.0 }
 0x488   :  { %2736 = vadd.xlane.f32.xlu0 %v2735_v46  ;;  %2733 = vadd.xlane.f32.xlu1 %v2732_v11 }
 0x489   :  { %v8407_v47 = vpop.eup %6722 }
 0x48a   :  { %9493 = vst [vmem:[#allocation45_spill] sm:$0xff] %v8407_v47  ;;  %v2744_v8 = vsel %vm2251_vm3, %v8407_v47, 0.0 }
 0x48c   :  { %v8413_v10 = vpop.eup %6724  ;;  %2742 = vadd.xlane.f32.xlu1 %v2741_v44  ;;  %2751 = vadd.xlane.f32.xlu0 %v2750_v43 }
 0x48d   :  { %9494 = vst [vmem:[#allocation46_spill] sm:$0xff] %v8413_v10  ;;  %v2747_v12 = vsel %vm2251_vm3, %v8413_v10, 0.0  ;;  %v8419_v29 = vpop.eup %6726 }
 0x48e   :  { %9495 = vst [vmem:[#allocation47_spill] sm:$0xff] %v8419_v29  ;;  %v2753_v25 = vsel %vm2251_vm3, %v8419_v29, 0.0 }
 0x48f   :  { %v2638_v18 = vpop.xlane.xlu0 %2637 }
 0x490   :  { %2748 = vadd.xlane.f32.xlu0 %v2747_v12  ;;  %2745 = vadd.xlane.f32.xlu1 %v2744_v8 }
 0x494   :  { %2754 = vadd.xlane.f32.xlu1 %v2753_v25  ;;  %v8423_v3 = vpop.xlane.xlu0 %2661 }
 0x498   :  { %v2380_v28 = vpop.xlane.xlu0 %2379 }
 0x499   :  { %v2486_v54 = vsub.f32 %v8063_v58, %v2380_v28 }
 0x49b   :  { %v2592_v31 = vmul.f32 1.442695, %v2486_v54 }
 0x49c   :  { %v2374_v46 = vpop.xlane.xlu0 %2373 }
 0x49d   :  { %6728 = vpow2.f32 %v2592_v31  ;;  %v2484_v11 = vsub.f32 %v8072_v55, %v2374_v46 }
 0x49e   :  { %6730 = vrcp.f32 %v2638_v18 }
 0x49f   :  { %v2588_v44 = vmul.f32 1.442695, %v2484_v11  ;;  %v2641_v43 = vpop.xlane.xlu1 %2640 }
 0x4a0   :  { %6732 = vrcp.f32 %v2641_v43  ;;  %v2644_v12 = vpop.xlane.xlu0 %2643 }
 0x4a1   :  { %6734 = vpow2.f32 %v2588_v44 }
 0x4a3   :  { %v8427_v8 = vpop.xlane.xlu1 %2664 }
 0x4a4   :  { %v8429_v29 = vpop.xlane.xlu0 %2673 }
 0x4a7   :  { %v2383_v25 = vpop.xlane.xlu1 %2382 }
 0x4a8   :  { %v2487_v41 = vsub.f32 %v8099_v37, %v2383_v25  ;;  %v2392_v10 = vpop.xlane.xlu0 %2391 }
 0x4a9   :  { %v2490_v58 = vsub.f32 %v8107_v52, %v2392_v10 }
 0x4aa   :  { %v8433_v28 = vpop.eup %6728  ;;  %v2594_v54 = vmul.f32 1.442695, %v2487_v41 }
 0x4ab   :  { %v6731_v55 = vpop.eup %6730  ;;  %v2600_v18 = vmul.f32 1.442695, %v2490_v58  ;;  %v2377_v31 = vpop.xlane.xlu1 %2376  ;;  %v2762_v46 = vsel %vm2251_vm3, %v8433_v28, 0.0 }
 0x4ac   :  { %6736 = vpow2.f32 %v2594_v54  ;;  %v2485_v11 = vsub.f32 %v8115_v62, %v2377_v31  ;;  %2763 = vadd.xlane.f32.xlu0 %v2762_v46  ;;  %v2386_v44 = vpop.xlane.xlu0 %2385  ;;  %v2892_v41 = vmul.f32 %v6731_v55, %v8053_v20 }
 0x4ad   :  { %v6733_v43 = vpop.eup %6732  ;;  %v2488_v37 = vsub.f32 %v8121_v0, %v2386_v44  ;;  %6738 = vrcp.f32 %v2644_v12  ;;  %v9496_v12 = vmov 0.0  }
 0x4ae   :  { %v8439_v25 = vpop.eup %6734  ;;  %v2590_v52 = vmul.f32 1.442695, %v2485_v11  ;;  %v2893_v10 = vmul.f32 %v6733_v43, %v8082_v48  ;;  %6740 = vpow2.f32 %v2600_v18 }
 0x4af   :  { %v2596_v58 = vmul.f32 1.442695, %v2488_v37  ;;  %v2647_v47 = vpop.xlane.xlu1 %2646  ;;  %v2756_v54 = vsel %vm2251_vm3, %v8439_v25, 0.0 }
 0x4b0   :  { %6742 = vpow2.f32 %v2590_v52  ;;  %2757 = vadd.xlane.f32.xlu1 %v2756_v54  ;;  %v2956_v62 = vpack.c.bf16 %v2893_v10, %v2892_v41  ;;  %v2650_v46 = vpop.xlane.xlu0 %2649 }
 0x4b1   :  { %6744 = vpow2.f32 %v2596_v58 }
 0x4b2   :  { %6746 = vrcp.f32 %v2647_v47  ;;  %6099 = vmatmul.mubr.msk.bf16.vlgmr.msra.gmra.mxu0 %vm2251_vm3, %v2956_v62 }
 0x4b3   :  { %6109 = vmatpush3.bf16.msra.mxu0 %v7810_v63  ;;  %v2677_v0 = vpop.xlane.xlu1 %2676  ;;  %6110 = vmatprep.mubr.msk.bf16.mxu0 %vm6986_vm1, %v9496_v12 }
 0x4b4   :  { %6120 = vmatprep.subr.bf16.mxu0 %v9496_v12 }
 0x4b7   :  { %v2395_v20 = vpop.xlane.xlu1 %2394 }
 0x4b8   :  { %v2491_v48 = vsub.f32 %v8144_v42, %v2395_v20 }
 0x4b9   :  { %v8451_v55 = vpop.eup %6736 }
 0x4ba   :  { %v2602_v18 = vmul.f32 1.442695, %v2491_v48  ;;  %v2765_v31 = vsel %vm2251_vm3, %v8451_v55, 0.0  ;;  %v6739_v47 = vpop.eup %6738 }
 0x4bb   :  { %v2389_v11 = vpop.xlane.xlu1 %2388  ;;  %2766 = vadd.xlane.f32.xlu1 %v2765_v31  ;;  %v8455_v63 = vpop.eup %6740 }
 0x4bc   :  { %6748 = vpow2.f32 %v2602_v18  ;;  %v2489_v44 = vsub.f32 %v8153_v27, %v2389_v11  ;;  %v2894_v27 = vmul.f32 %v6739_v47, %v8080_v60  ;;  %v2774_v31 = vsel %vm2251_vm3, %v8455_v63, 0.0 }
 0x4bd   :  { %v8458_v43 = vpop.eup %6742  ;;  %6750 = vrcp.f32 %v2650_v46 }
 0x4be   :  { %v8460_v37 = vpop.eup %6744  ;;  %v2598_v42 = vmul.f32 1.442695, %v2489_v44  ;;  %v2759_v52 = vsel %vm2251_vm3, %v8458_v43, 0.0 }
 0x4bf   :  { %v6747_v41 = vpop.eup %6746  ;;  %v2653_v10 = vpop.xlane.xlu1 %2652  ;;  %2760 = vadd.xlane.f32.xlu0 %v2759_v52  ;;  %v2768_v54 = vsel %vm2251_vm3, %v8460_v37, 0.0 }
 0x4c0   :  { %v2404_v58 = vpop.xlane.xlu0 %2403  ;;  %6752 = vpow2.f32 %v2598_v42  ;;  %2769 = vadd.xlane.f32.xlu1 %v2768_v54  ;;  %v2895_v20 = vmul.f32 %v6747_v41, %v8127_v57  ;;  %v9497_v54 = vld [vmem:[#allocation33_spill] sm:$0xff] }
 0x4c1   :  { %v2494_v62 = vsub.f32 %v8168_v50, %v2404_v58  ;;  %6754 = vrcp.f32 %v2653_v10 }
 0x4c2   :  { %v2957_v18 = vpack.c.bf16 %v2895_v20, %v2894_v27  ;;  %v9498_v27 = vld [vmem:[#allocation35_spill] sm:$0xff] }
 0x4c3   :  { %v2608_v48 = vmul.f32 1.442695, %v2494_v62  ;;  %v2407_v46 = vpop.xlane.xlu1 %2406  ;;  %2775 = vadd.xlane.f32.xlu0 %v2774_v31 }
 0x4c4   :  { %v2398_v11 = vpop.xlane.xlu0 %2397  ;;  %6105 = vmatmul.mubr.msk.bf16.vlgmr.msra.gmra.mxu1 %vm2251_vm3, %v2957_v18  ;;  %v2495_v44 = vsub.f32 %v8183_v23, %v2407_v46 }
 0x4c5   :  { %6756 = vpow2.f32 %v2608_v48  ;;  %v2492_v50 = vsub.f32 %v8173_v9, %v2398_v11  ;;  %6115 = vmatpush3.bf16.msra.mxu1 %v7812_v4  ;;  %6116 = vmatprep.mubr.msk.bf16.mxu1 %vm6986_vm1, %v9496_v12 }
 0x4c6   :  { %6758 = vrcp.f32 %v8427_v8  ;;  %v2610_v60 = vmul.f32 1.442695, %v2495_v44  ;;  %6126 = vmatprep.subr.bf16.mxu1 %v9496_v12 }
 0x4c7   :  { %v2604_v57 = vmul.f32 1.442695, %v2492_v50  ;;  %6760 = vrcp.f32 %v8423_v3  ;;  %v2401_v47 = vpop.xlane.xlu1 %2400  ;;  %v9499_v50 = vld [vmem:[#allocation39_spill] sm:$0xff] }
 0x4c8   :  { %6762 = vrcp.f32 %v2677_v0  ;;  %v2493_v42 = vsub.f32 %v8185_v26, %v2401_v47  ;;  %v2656_v23 = vpop.xlane.xlu0 %2655 }
 0x4c9   :  { %v8481_v52 = vpop.eup %6748  ;;  %6764 = vpow2.f32 %v2604_v57 }
 0x4ca   :  { %6766 = vpow2.f32 %v2610_v60  ;;  %v2606_v9 = vmul.f32 1.442695, %v2493_v42  ;;  %v2777_v4 = vsel %vm2251_vm3, %v8481_v52, 0.0  ;;  %v6751_v41 = vpop.eup %6750  ;;  %v9500_v60 = vld [vmem:[#allocation38_spill] sm:$0xff] }
 0x4cb   :  { %6768 = vrcp.f32 %v2656_v23  ;;  %v2659_v8 = vpop.xlane.xlu1 %2658  ;;  %2778 = vadd.xlane.f32.xlu1 %v2777_v4  ;;  %v2896_v62 = vmul.f32 %v6751_v41, %v9497_v54 }
 0x4cc   :  { %6770 = vpow2.f32 %v2606_v9  ;;  %v9501_v9 = vld [vmem:[#allocation4_spill] sm:$0xff] }
 0x4cd   :  { %v8485_v10 = vpop.eup %6752  ;;  %6772 = vrcp.f32 %v2659_v8  ;;  %v2416_v3 = vpop.xlane.xlu0 %2415 }
 0x4ce   :  { %v6755_v0 = vpop.eup %6754  ;;  %v2498_v26 = vsub.f32 %v8207_v45, %v2416_v3  ;;  %v2771_v58 = vsel %vm2251_vm3, %v8485_v10, 0.0  ;;  %6774 = vrcp.f32 %v8429_v29  ;;  %v9502_v3 = vld [vmem:[#allocation32_spill] sm:$0xff] }
 0x4cf   :  { %2772 = vadd.xlane.f32.xlu0 %v2771_v58  ;;  %v2897_v20 = vmul.f32 %v6755_v0, %v9498_v27  ;;  %v9503_v58 = vld [vmem:[#allocation40_spill] sm:$0xff] }
 0x4d0   :  { %v2616_v48 = vmul.f32 1.442695, %v2498_v26 }
 0x4d1   :  { %v2419_v31 = vpop.xlane.xlu1 %2418  ;;  %v2410_v46 = vpop.xlane.xlu0 %2409  ;;  %v2958_v11 = vpack.c.bf16 %v2897_v20, %v2896_v62  ;;  %v9504_v20 = vld [vmem:[#allocation30_spill] sm:$0xff] }
 0x4d2   :  { %v8493_v18 = vpop.eup %6756  ;;  %6776 = vpow2.f32 %v2616_v48  ;;  %v2499_v45 = vsub.f32 %v9499_v50, %v2419_v31  ;;  %v2496_v57 = vsub.f32 %v9500_v60, %v2410_v46 }
 0x4d3   :  { %v6759_v44 = vpop.eup %6758  ;;  %v2786_v29 = vsel %vm2251_vm3, %v8493_v18, 0.0  ;;  %6111 = vmatmul.mubr.msk.bf16.vlgmr.msra.gmra.mxu0 %vm2251_vm3, %v2958_v11 }
 0x4d4   :  { %2787 = vadd.xlane.f32.xlu0 %v2786_v29  ;;  %v6761_v47 = vpop.eup %6760  ;;  %v2618_v42 = vmul.f32 1.442695, %v2499_v45  ;;  %v2612_v23 = vmul.f32 1.442695, %v2496_v57  ;;  %6121 = vmatpush3.bf16.msra.mxu0 %v9501_v9  ;;  %v2901_v0 = vmul.f32 %v6759_v44, %v9502_v3  ;;  %v9506_v9 = vld [vmem:[#allocation37_spill] sm:$0xff] }
 0x4d5   :  { %6122 = vmatprep.mubr.msk.bf16.mxu0 %vm6986_vm1, %v9496_v12  ;;  %v6763_v4 = vpop.eup %6762  ;;  %v2413_v8 = vpop.xlane.xlu1 %2412  ;;  %6132 = vmatprep.subr.bf16.mxu0 %v9496_v12  ;;  %v2900_v48 = vmul.f32 %v6761_v47, %v9504_v20 }
 0x4d6   :  { %v2668_v41 = vpop.xlane.xlu0 %2667  ;;  %v8505_v26 = vpop.eup %6764  ;;  %v2497_v54 = vsub.f32 %v9503_v58, %v2413_v8  ;;  %6778 = vpow2.f32 %v2612_v23 }
 0x4d7   :  { %v8508_v62 = vpop.eup %6766  ;;  %v2780_v27 = vsel %vm2251_vm3, %v8505_v26, 0.0  ;;  %6780 = vpow2.f32 %v2618_v42  ;;  %v2960_v45 = vpack.c.bf16 %v2901_v0, %v2900_v48  ;;  %v9505_v42 = vld [vmem:[#allocation36_spill] sm:$0xff]  ;;  %v9507_v0 = vld [vmem:[#allocation6_spill] sm:$0xff] }
 0x4d8   :  { %v6769_v31 = vpop.eup %6768  ;;  %v2614_v46 = vmul.f32 1.442695, %v2497_v54  ;;  %2781 = vadd.xlane.f32.xlu1 %v2780_v27  ;;  %6782 = vrcp.f32 %v2668_v41  ;;  %v2789_v47 = vsel %vm2251_vm3, %v8508_v62, 0.0  ;;  %v9508_v27 = vld [vmem:[#allocation34_spill] sm:$0xff] }
 0x4d9   :  { %v8513_v11 = vpop.eup %6770  ;;  %v2671_v44 = vpop.xlane.xlu1 %2670  ;;  %v2898_v23 = vmul.f32 %v6769_v31, %v9505_v42  ;;  %v2905_v20 = vmul.f32 %v6763_v4, %v9508_v27 }
 0x4da   :  { %v2428_v50 = vpop.xlane.xlu0 %2427  ;;  %v6773_v60 = vpop.eup %6772  ;;  %6784 = vpow2.f32 %v2614_v46  ;;  %v2783_v29 = vsel %vm2251_vm3, %v8513_v11, 0.0 }
 0x4db   :  { %v2502_v57 = vsub.f32 %v8238_v6, %v2428_v50  ;;  %6786 = vrcp.f32 %v2671_v44  ;;  %6123 = vmatmul.mubr.msk.bf16.vlgmr.msra.gmra.mxu0 %vm2251_vm3, %v2960_v45  ;;  %2784 = vadd.xlane.f32.xlu0 %v2783_v29  ;;  %v2899_v8 = vmul.f32 %v6773_v60, %v9506_v9  ;;  %v6775_v41 = vpop.eup %6774  ;;  %v9509_v44 = vld [vmem:[#allocation31_spill] sm:$0xff]  ;;  %v9511_v9 = vld [vmem:[#allocation8_spill] sm:$0xff] }
 0x4dc   :  { %6133 = vmatpush3.bf16.msra.mxu0 %v9507_v0  ;;  %2790 = vadd.xlane.f32.xlu1 %v2789_v47  ;;  %v2904_v50 = vmul.f32 %v6775_v41, %v9509_v44 }
 0x4dd   :  { %v2624_v3 = vmul.f32 1.442695, %v2502_v57  ;;  %v2431_v6 = vpop.xlane.xlu1 %2430  ;;  %v2959_v54 = vpack.c.bf16 %v2899_v8, %v2898_v23  ;;  %6134 = vmatprep.mubr.msk.bf16.mxu0 %vm6986_vm1, %v9496_v12  ;;  %6144 = vmatprep.subr.bf16.mxu0 %v9496_v12  ;;  %v9510_v57 = vld [vmem:[#allocation5_spill] sm:$0xff] }
 0x4de   :  { %v2422_v58 = vpop.xlane.xlu0 %2421  ;;  %v2503_v48 = vsub.f32 %v8253_v56, %v2431_v6 }
 0x4df   :  { %6788 = vpow2.f32 %v2624_v3  ;;  %v2500_v31 = vsub.f32 %v8249_v17, %v2422_v58  ;;  %v8530_v46 = vpop.eup %6776  ;;  %6117 = vmatmul.mubr.msk.bf16.vlgmr.msra.gmra.mxu1 %vm2251_vm3, %v2959_v54  ;;  %v2962_v17 = vpack.c.bf16 %v2905_v20, %v2904_v50  ;;  %v9512_v50 = vld [vmem:[#allocation41_spill] sm:$0xff] }
 0x4e0   :  { %v2626_v45 = vmul.f32 1.442695, %v2503_v48  ;;  %6127 = vmatpush3.bf16.msra.mxu1 %v9510_v57  ;;  %v2798_v29 = vsel %vm2251_vm3, %v8530_v46, 0.0  ;;  %6128 = vmatprep.mubr.msk.bf16.mxu1 %vm6986_vm1, %v9496_v12 }
 0x4e1   :  { %v2620_v60 = vmul.f32 1.442695, %v2500_v31  ;;  %v2425_v4 = vpop.xlane.xlu1 %2424  ;;  %2799 = vadd.xlane.f32.xlu0 %v2798_v29  ;;  %6138 = vmatprep.subr.bf16.mxu1 %v9496_v12 }
 0x4e2   :  { %v2680_v56 = vpop.xlane.xlu0 %2679  ;;  %v2501_v47 = vsub.f32 %v8267_v59, %v2425_v4 }
 0x4e3   :  { %6790 = vpow2.f32 %v2620_v60  ;;  %6135 = vmatmul.mubr.msk.bf16.vlgmr.msra.gmra.mxu0 %vm2251_vm3, %v2962_v17  ;;  %v8542_v42 = vpop.eup %6778  ;;  %v9513_v60 = vld [vmem:[#allocation42_spill] sm:$0xff] }
 0x4e4   :  { %6792 = vpow2.f32 %v2626_v45  ;;  %v2622_v23 = vmul.f32 1.442695, %v2501_v47  ;;  %6145 = vmatpush3.bf16.msra.mxu0 %v9511_v9  ;;  %6146 = vmatprep.mubr.msk.bf16.mxu0 %vm6986_vm1, %v9496_v12  ;;  %v8547_v8 = vpop.eup %6780  ;;  %v2792_v3 = vsel %vm2251_vm3, %v8542_v42, 0.0 }
 0x4e5   :  { %6794 = vrcp.f32 %v2680_v56  ;;  %v2683_v41 = vpop.xlane.xlu1 %2682  ;;  %6156 = vmatprep.subr.bf16.mxu0 %v9496_v12  ;;  %v6783_v0 = vpop.eup %6782  ;;  %2793 = vadd.xlane.f32.xlu1 %v2792_v3  ;;  %v2801_v31 = vsel %vm2251_vm3, %v8547_v8, 0.0  ;;  %v9514_v3 = vld [vmem:[#allocation7_spill] sm:$0xff] }
 0x4e6   :  { %v2440_v59 = vpop.xlane.xlu0 %2439  ;;  %6796 = vpow2.f32 %v2622_v23  ;;  %v2902_v45 = vmul.f32 %v6783_v0, %v9512_v50 }
 0x4e7   :  { %v2506_v6 = vsub.f32 %v8282_v7, %v2440_v59  ;;  %v8553_v58 = vpop.eup %6784  ;;  %6798 = vrcp.f32 %v2683_v41 }
 0x4e8   :  { %v6787_v54 = vpop.eup %6786  ;;  %v2795_v20 = vsel %vm2251_vm3, %v8553_v58, 0.0 }
 0x4e9   :  { %v2632_v27 = vmul.f32 1.442695, %v2506_v6  ;;  %v2434_v48 = vpop.xlane.xlu1 %2433  ;;  %2796 = vadd.xlane.f32.xlu0 %v2795_v20  ;;  %v2903_v57 = vmul.f32 %v6787_v54, %v9513_v60  ;;  %2802 = vadd.xlane.f32.xlu1 %v2801_v31  ;;  %v9515_v60 = vld [vmem:[#allocation43_spill] sm:$0xff] }
 0x4ea   :  { %v2437_v44 = vpop.xlane.xlu0 %2436  ;;  %v2504_v7 = vsub.f32 %v8292_v40, %v2434_v48 }
 0x4eb   :  { %6800 = vpow2.f32 %v2632_v27  ;;  %v2505_v29 = vsub.f32 %v8295_v49, %v2437_v44  ;;  %v2961_v56 = vpack.c.bf16 %v2903_v57, %v2902_v45 }
 0x4ec   :  { %v8563_v4 = vpop.eup %6788  ;;  %v2628_v17 = vmul.f32 1.442695, %v2504_v7 }
 0x4ed   :  { %v2630_v47 = vmul.f32 1.442695, %v2505_v29  ;;  %v2810_v23 = vsel %vm2251_vm3, %v8563_v4, 0.0  ;;  %6129 = vmatmul.mubr.msk.bf16.vlgmr.msra.gmra.mxu1 %vm2251_vm3, %v2961_v56  ;;  %v2443_v9 = vpop.xlane.xlu1 %2442 }
 0x4ee   :  { %2811 = vadd.xlane.f32.xlu0 %v2810_v23  ;;  %v2692_v41 = vpop.xlane.xlu0 %2691  ;;  %6802 = vpow2.f32 %v2628_v17  ;;  %6139 = vmatpush3.bf16.msra.mxu1 %v9514_v3  ;;  %v2507_v40 = vsub.f32 %v8308_v51, %v2443_v9  ;;  %v9516_v9 = vld [vmem:[#allocation9_spill] sm:$0xff] }
 0x4ef   :  { %6140 = vmatprep.mubr.msk.bf16.mxu1 %vm6986_vm1, %v9496_v12  ;;  %6804 = vpow2.f32 %v2630_v47  ;;  %6150 = vmatprep.subr.bf16.mxu1 %v9496_v12 }
 0x4f0   :  { %v8573_v49 = vpop.eup %6790  ;;  %v2634_v59 = vmul.f32 1.442695, %v2507_v40  ;;  %6806 = vrcp.f32 %v2692_v41 }
 0x4f1   :  { %v8575_v0 = vpop.eup %6792  ;;  %v2695_v6 = vpop.xlane.xlu1 %2694  ;;  %v2804_v54 = vsel %vm2251_vm3, %v8573_v49, 0.0 }
 0x4f2   :  { %v2686_v27 = vpop.xlane.xlu0 %2685  ;;  %v6795_v20 = vpop.eup %6794  ;;  %6808 = vpow2.f32 %v2634_v59  ;;  %2805 = vadd.xlane.f32.xlu1 %v2804_v54  ;;  %v2813_v50 = vsel %vm2251_vm3, %v8575_v0, 0.0 }
 0x4f3   :  { %v8579_v51 = vpop.eup %6796  ;;  %6810 = vrcp.f32 %v2695_v6  ;;  %v2906_v57 = vmul.f32 %v6795_v20, %v9515_v60 }
 0x4f4   :  { %v6799_v48 = vpop.eup %6798  ;;  %6812 = vrcp.f32 %v2686_v27  ;;  %v2807_v31 = vsel %vm2251_vm3, %v8579_v51, 0.0 }
 0x4f5   :  { %v2689_v44 = vpop.xlane.xlu1 %2688  ;;  %2808 = vadd.xlane.f32.xlu0 %v2807_v31  ;;  %v2907_v7 = vmul.f32 %v6799_v48, %v8275_v34 }
 0x4f6   :  { %v2704_v45 = vpop.xlane.xlu0 %2703  ;;  %6814 = vrcp.f32 %v2689_v44  ;;  %2814 = vadd.xlane.f32.xlu1 %v2813_v50 }
 0x4f7   :  { %v2963_v56 = vpack.c.bf16 %v2907_v7, %v2906_v57 }
 0x4f8   :  { %v8587_v29 = vpop.eup %6800 }
 0x4f9   :  { %v2822_v17 = vsel %vm2251_vm3, %v8587_v29, 0.0  ;;  %6141 = vmatmul.mubr.msk.bf16.vlgmr.msra.gmra.mxu1 %vm2251_vm3, %v2963_v56  ;;  %v2698_v47 = vpop.xlane.xlu1 %2697 }
 0x4fa   :  { %2823 = vadd.xlane.f32.xlu0 %v2822_v17  ;;  %v2701_v23 = vpop.xlane.xlu0 %2700  ;;  %6151 = vmatpush3.bf16.msra.mxu1 %v9516_v9  ;;  %6816 = vrcp.f32 %v2698_v47  ;;  %v9517_v9 = vld [vmem:[#allocation11_spill] sm:$0xff] }
 0x4fb   :  { %6152 = vmatprep.mubr.msk.bf16.mxu1 %vm6986_vm1, %v9496_v12  ;;  %v8595_v34 = vpop.eup %6802  ;;  %6818 = vrcp.f32 %v2701_v23  ;;  %6162 = vmatprep.subr.bf16.mxu1 %v9496_v12 }
 0x4fc   :  { %v8598_v41 = vpop.eup %6804  ;;  %6820 = vrcp.f32 %v2704_v45  ;;  %v2816_v3 = vsel %vm2251_vm3, %v8595_v34, 0.0 }
 0x4fd   :  { %v2707_v40 = vpop.xlane.xlu1 %2706  ;;  %2817 = vadd.xlane.f32.xlu1 %v2816_v3  ;;  %v2819_v59 = vsel %vm2251_vm3, %v8598_v41, 0.0  ;;  %v6807_v54 = vpop.eup %6806 }
 0x4fe   :  { %v2716_v6 = vpop.xlane.xlu0 %2715  ;;  %6822 = vrcp.f32 %v2707_v40  ;;  %2820 = vadd.xlane.f32.xlu0 %v2819_v59  ;;  %v2910_v45 = vmul.f32 %v6807_v54, %v8306_v21  ;;  %v9518_v40 = vld [vmem:[#allocation20_spill] sm:$0xff] }
 0x4ff   :  { %v8604_v27 = vpop.eup %6808 }
 0x500   :  { %v6811_v20 = vpop.eup %6810  ;;  %v2825_v48 = vsel %vm2251_vm3, %v8604_v27, 0.0 }
 0x501   :  { %v6813_v31 = vpop.eup %6812  ;;  %v2710_v44 = vpop.xlane.xlu1 %2709  ;;  %2826 = vadd.xlane.f32.xlu1 %v2825_v48  ;;  %v2911_v60 = vmul.f32 %v6811_v20, %v8314_v13 }
 0x502   :  { %v2713_v50 = vpop.xlane.xlu0 %2712  ;;  %6824 = vrcp.f32 %v2710_v44  ;;  %v2908_v56 = vmul.f32 %v6813_v31, %v8321_v39 }
 0x503   :  { %v6815_v57 = vpop.eup %6814  ;;  %6826 = vrcp.f32 %v2713_v50  ;;  %v2965_v7 = vpack.c.bf16 %v2911_v60, %v2910_v45 }
 0x504   :  { %6828 = vrcp.f32 %v2716_v6  ;;  %v2909_v17 = vmul.f32 %v6815_v57, %v8324_v36 }
 0x505   :  { %6153 = vmatmul.mubr.msk.bf16.vlgmr.msra.gmra.mxu1 %vm2251_vm3, %v2965_v7  ;;  %v2719_v47 = vpop.xlane.xlu1 %2718 }
 0x506   :  { %v2728_v23 = vpop.xlane.xlu0 %2727  ;;  %6163 = vmatpush3.bf16.msra.mxu1 %v9517_v9  ;;  %6830 = vrcp.f32 %v2719_v47  ;;  %v2964_v3 = vpack.c.bf16 %v2909_v17, %v2908_v56  ;;  %6164 = vmatprep.mubr.msk.bf16.mxu1 %vm6986_vm1, %v9496_v12  ;;  %v9520_v56 = vld [vmem:[#allocation13_spill] sm:$0xff] }
 0x507   :  { %v6817_v21 = vpop.eup %6816  ;;  %6174 = vmatprep.subr.bf16.mxu1 %v9496_v12 }
 0x508   :  { %v6819_v13 = vpop.eup %6818  ;;  %6147 = vmatmul.mubr.msk.bf16.vlgmr.msra.gmra.mxu0 %vm2251_vm3, %v2964_v3  ;;  %v2912_v6 = vmul.f32 %v6817_v21, %v8334_v16  ;;  %v9522_v3 = vld [vmem:[#allocation2_spill] sm:$0xff] }
 0x509   :  { %v6821_v39 = vpop.eup %6820  ;;  %6157 = vmatpush3.bf16.msra.mxu0 %v9518_v40  ;;  %v2722_v36 = vpop.xlane.xlu1 %2721  ;;  %6158 = vmatprep.mubr.msk.bf16.mxu0 %vm6986_vm1, %v9496_v12  ;;  %v2913_v54 = vmul.f32 %v6819_v13, %v8341_v30  ;;  %v9519_v30 = vld [vmem:[#allocation10_spill] sm:$0xff] }
 0x50a   :  { %v2725_v59 = vpop.xlane.xlu0 %2724  ;;  %6832 = vrcp.f32 %v2722_v36  ;;  %6168 = vmatprep.subr.bf16.mxu0 %v9496_v12  ;;  %v2914_v48 = vmul.f32 %v6821_v39, %v8330_v5 }
 0x50b   :  { %v6823_v20 = vpop.eup %6822  ;;  %6834 = vrcp.f32 %v2725_v59  ;;  %v2966_v45 = vpack.c.bf16 %v2913_v54, %v2912_v6  ;;  %v9523_v54 = vld [vmem:[#allocation22_spill] sm:$0xff] }
 0x50c   :  { %6836 = vrcp.f32 %v2728_v23  ;;  %v2915_v31 = vmul.f32 %v6823_v20, %v8344_v24  ;;  %v9521_v24 = vld [vmem:[#allocation3_spill] sm:$0xff] }
 0x50d   :  { %v2731_v44 = vpop.xlane.xlu1 %2730  ;;  %v9524_v20 = vld [vmem:[#allocation15_spill] sm:$0xff] }
 0x50e   :  { %v2740_v50 = vpop.xlane.xlu0 %2739  ;;  %6838 = vrcp.f32 %v2731_v44  ;;  %v2967_v60 = vpack.c.bf16 %v2915_v31, %v2914_v48 }
 0x50f   :  { %v6825_v57 = vpop.eup %6824 }
 0x510   :  { %v6827_v7 = vpop.eup %6826  ;;  %6159 = vmatmul.mubr.msk.bf16.vlgmr.msra.gmra.mxu0 %vm2251_vm3, %v2966_v45  ;;  %6165 = vmatmul.mubr.msk.bf16.vlgmr.msra.gmra.mxu1 %vm2251_vm3, %v2967_v60  ;;  %v2916_v47 = vmul.f32 %v6825_v57, %v8354_v35 }
 0x511   :  { %v6829_v16 = vpop.eup %6828  ;;  %6169 = vmatpush3.bf16.msra.mxu0 %v9519_v30  ;;  %6175 = vmatpush3.bf16.msra.mxu1 %v9520_v56  ;;  %v2734_v17 = vpop.xlane.xlu1 %2733  ;;  %v2917_v23 = vmul.f32 %v6827_v7, %v8361_v38  ;;  %v9526_v56 = vld [vmem:[#allocation17_spill] sm:$0xff] }
 0x512   :  { %v2737_v5 = vpop.xlane.xlu0 %2736  ;;  %6840 = vrcp.f32 %v2734_v17  ;;  %4445 = vrot.lane.b32.xlu1 %v9521_v24, %s6990_s5  ;;  %6170 = vmatprep.mubr.msk.bf16.mxu0 %vm6986_vm1, %v9496_v12  ;;  %v2918_v21 = vmul.f32 %v6829_v16, %v8350_v14 }
 0x513   :  { %v6831_v9 = vpop.eup %6830  ;;  %6842 = vrcp.f32 %v2737_v5  ;;  %6176 = vmatprep.mubr.msk.bf16.mxu1 %vm6986_vm1, %v9496_v12  ;;  %6180 = vmatprep.subr.bf16.mxu0 %v9496_v12  ;;  %v2968_v38 = vpack.c.bf16 %v2917_v23, %v2916_v47 }
 0x514   :  { %6844 = vrcp.f32 %v2740_v50  ;;  %4398 = vrot.lane.b32.xlu0 %v9522_v3, %s6990_s5  ;;  %6186 = vmatprep.subr.bf16.mxu1 %v9496_v12  ;;  %v2919_v13 = vmul.f32 %v6831_v9, %v8364_v22 }
 0x515   :  { %v2743_v35 = vpop.xlane.xlu1 %2742 }
 0x516   :  { %v2752_v39 = vpop.xlane.xlu0 %2751  ;;  %6846 = vrcp.f32 %v2743_v35  ;;  %v2969_v40 = vpack.c.bf16 %v2919_v13, %v2918_v21  ;;  %v9527_v21 = vld [vmem:[#allocation24_spill] sm:$0xff]  ;;  %v9530_v13 = vld [vmem:[#allocation46_spill] sm:$0xff] }
 0x517   :  { %v6833_v36 = vpop.eup %6832 }
 0x518   :  { %v6835_v59 = vpop.eup %6834  ;;  %6171 = vmatmul.mubr.msk.bf16.vlgmr.msra.gmra.mxu0 %vm2251_vm3, %v2968_v38  ;;  %6177 = vmatmul.mubr.msk.bf16.vlgmr.msra.gmra.mxu1 %vm2251_vm3, %v2969_v40  ;;  %v2920_v22 = vmul.f32 %v6833_v36, %v8375_v2  ;;  %v9531_v38 = vld [vmem:[#allocation44_spill] sm:$0xff]  ;;  %v9532_v36 = vld [vmem:[#allocation47_spill] sm:$0xff] }
 0x519   :  { %v6837_v6 = vpop.eup %6836  ;;  %6181 = vmatpush3.bf16.msra.mxu0 %v9523_v54  ;;  %6187 = vmatpush3.bf16.msra.mxu1 %v9524_v20  ;;  %v2746_v48 = vpop.xlane.xlu1 %2745  ;;  %v2921_v31 = vmul.f32 %v6835_v59, %v8381_v61  ;;  %v9525_v61 = vld [vmem:[#allocation12_spill] sm:$0xff]  ;;  %v9533_v20 = vld [vmem:[#allocation14_spill] sm:$0xff] }
 0x51a   :  { %v2749_v14 = vpop.xlane.xlu0 %2748  ;;  %6848 = vrcp.f32 %v2746_v48  ;;  %6182 = vmatprep.mubr.msk.bf16.mxu0 %vm6986_vm1, %v9496_v12  ;;  %6188 = vmatprep.mubr.msk.bf16.mxu1 %vm6986_vm1, %v9496_v12  ;;  %v2922_v50 = vmul.f32 %v6837_v6, %v8370_v19  ;;  %v9534_v48 = vld [vmem:[#allocation21_spill] sm:$0xff] }
 0x51b   :  { %v6839_v44 = vpop.eup %6838  ;;  %6850 = vrcp.f32 %v2749_v14  ;;  %6192 = vmatprep.subr.bf16.mxu0 %v9496_v12  ;;  %6198 = vmatprep.subr.bf16.mxu1 %v9496_v12  ;;  %v2970_v57 = vpack.c.bf16 %v2921_v31, %v2920_v22 }
 0x51c   :  { %6852 = vrcp.f32 %v2752_v39  ;;  %v2923_v45 = vmul.f32 %v6839_v44, %v8383_v53 }
 0x51d   :  { %v2755_v60 = vpop.xlane.xlu1 %2754 }
 0x51e   :  { %6854 = vrcp.f32 %v2755_v60  ;;  %v2971_v7 = vpack.c.bf16 %v2923_v45, %v2922_v50 }
 0x51f   :  { %v6841_v16 = vpop.eup %6840 }
 0x520   :  { %v6843_v30 = vpop.eup %6842  ;;  %6183 = vmatmul.mubr.msk.bf16.vlgmr.msra.gmra.mxu0 %vm2251_vm3, %v2970_v57  ;;  %6189 = vmatmul.mubr.msk.bf16.vlgmr.msra.gmra.mxu1 %vm2251_vm3, %v2971_v7  ;;  %v2924_v19 = vmul.f32 %v6841_v16, %v8391_v32 }
 0x521   :  { %v6845_v2 = vpop.eup %6844  ;;  %6193 = vmatpush3.bf16.msra.mxu0 %v9525_v61  ;;  %6199 = vmatpush3.bf16.msra.mxu1 %v9526_v56  ;;  %v2925_v53 = vmul.f32 %v6843_v30, %v8397_v33  ;;  %v9528_v33 = vld [vmem:[#allocation19_spill] sm:$0xff] }
 0x522   :  { %6194 = vmatprep.mubr.msk.bf16.mxu0 %vm6986_vm1, %v9496_v12  ;;  %6200 = vmatprep.mubr.msk.bf16.mxu1 %vm6986_vm1, %v9496_v12  ;;  %v2926_v5 = vmul.f32 %v6845_v2, %v8389_v15  ;;  %v9529_v15 = vld [vmem:[#allocation45_spill] sm:$0xff] }
 0x523   :  { %v6847_v17 = vpop.eup %6846  ;;  %6204 = vmatprep.subr.bf16.mxu0 %v9496_v12  ;;  %6210 = vmatprep.subr.bf16.mxu1 %v9496_v12  ;;  %v2972_v23 = vpack.c.bf16 %v2925_v53, %v2924_v19 }
 0x524   :  { %v2927_v24 = vmul.f32 %v6847_v17, %v8399_v1  ;;  %v9535_v17 = vld [vmem:[#allocation23_spill] sm:$0xff] }
 0x526   :  { %v2973_v47 = vpack.c.bf16 %v2927_v24, %v2926_v5 }
 0x527   :  { %v6849_v9 = vpop.eup %6848 }
 0x528   :  { %v6851_v3 = vpop.eup %6850  ;;  %6195 = vmatmul.mubr.msk.bf16.vlgmr.msra.gmra.mxu0 %vm2251_vm3, %v2972_v23  ;;  %6201 = vmatmul.mubr.msk.bf16.vlgmr.msra.gmra.mxu1 %vm2251_vm3, %v2973_v47  ;;  %v2928_v1 = vmul.f32 %v6849_v9, %v9529_v15 }
 0x529   :  { %v6853_v32 = vpop.eup %6852  ;;  %6205 = vmatpush3.bf16.msra.mxu0 %v9527_v21  ;;  %6211 = vmatpush3.bf16.msra.mxu1 %v9528_v33  ;;  %v2929_v35 = vmul.f32 %v6851_v3, %v9530_v13 }
 0x52a   :  { %6206 = vmatprep.mubr.msk.bf16.mxu0 %vm6986_vm1, %v9496_v12  ;;  %6212 = vmatprep.mubr.msk.bf16.mxu1 %vm6986_vm1, %v9496_v12  ;;  %v2930_v40 = vmul.f32 %v6853_v32, %v9531_v38 }
 0x52b   :  { %v6855_v39 = vpop.eup %6854  ;;  %6216 = vmatprep.subr.bf16.mxu0 %v9496_v12  ;;  %6222 = vmatprep.subr.bf16.mxu1 %v9496_v12  ;;  %v2974_v54 = vpack.c.bf16 %v2929_v35, %v2928_v1  ;;  %v9537_v35 = vld [vmem:[#allocation25_spill] sm:$0xff] }
 0x52c   :  { %v2931_v59 = vmul.f32 %v6855_v39, %v9532_v36 }
 0x52e   :  { %v2975_v6 = vpack.c.bf16 %v2931_v59, %v2930_v40 }
 0x530   :  { %6207 = vmatmul.mubr.msk.bf16.vlgmr.msra.gmra.mxu0 %vm2251_vm3, %v2974_v54  ;;  %6213 = vmatmul.mubr.msk.bf16.vlgmr.msra.gmra.mxu1 %vm2251_vm3, %v2975_v6 }
 0x531   :  { %6217 = vmatpush3.bf16.msra.mxu0 %v9533_v20  ;;  %6223 = vmatpush3.bf16.msra.mxu1 %v9534_v48 }
 0x532   :  { %6224 = vmatprep.mubr.msk.bf16.mxu1 %vm6986_vm1, %v9496_v12  ;;  %6234 = vmatprep.subr.bf16.mxu1 %v9496_v12 }
 0x533   :  { %6218 = vmatprep.mubr.msk.bf16.mxu0 %vm6986_vm1, %v9496_v12  ;;  %6228 = vmatprep.subr.bf16.mxu0 %v9496_v12 }
 0x535   :  { %v2764_v14 = vpop.xlane.xlu0 %2763 }
 0x536   :  { %6856 = vrcp.f32 %v2764_v14 }
 0x539   :  { %v2758_v22 = vpop.xlane.xlu1 %2757 }
 0x543   :  { %v6857_v50 = vpop.eup %6856 }
 0x544   :  { %v2767_v31 = vpop.xlane.xlu1 %2766  ;;  %v2934_v7 = vmul.f32 %v6857_v50, %v8433_v28 }
 0x545   :  { %6858 = vrcp.f32 %v2767_v31 }
 0x546   :  { %6860 = vrcp.f32 %v2758_v22 }
 0x548   :  { %v2761_v44 = vpop.xlane.xlu0 %2760 }
 0x549   :  { %6862 = vrcp.f32 %v2761_v44  ;;  %v2770_v45 = vpop.xlane.xlu1 %2769 }
 0x54c   :  { %v2776_v60 = vpop.xlane.xlu0 %2775 }
 0x54d   :  { %6864 = vrcp.f32 %v2776_v60  ;;  %v9539_v60 = vld [vmem:[#allocation29_spill] sm:$0xff] }
 0x552   :  { %v6859_v57 = vpop.eup %6858 }
 0x553   :  { %v2935_v16 = vmul.f32 %v6859_v57, %v8451_v55  ;;  %v6861_v30 = vpop.eup %6860  ;;  %v9536_v55 = vld [vmem:[#allocation26_spill] sm:$0xff] }
 0x554   :  { %v2779_v2 = vpop.xlane.xlu1 %2778  ;;  %v2932_v19 = vmul.f32 %v6861_v30, %v8439_v25 }
 0x555   :  { %v2977_v61 = vpack.c.bf16 %v2935_v16, %v2934_v7  ;;  %6866 = vrcp.f32 %v2779_v2 }
 0x556   :  { %v6863_v56 = vpop.eup %6862  ;;  %6868 = vrcp.f32 %v2770_v45 }
 0x557   :  { %6225 = vmatmul.mubr.msk.bf16.vlgmr.msra.gmra.mxu1 %vm2251_vm3, %v2977_v61  ;;  %v2933_v53 = vmul.f32 %v6863_v56, %v8458_v43 }
 0x558   :  { %6235 = vmatpush3.bf16.msra.mxu1 %v9535_v17  ;;  %v2773_v5 = vpop.xlane.xlu0 %2772  ;;  %6236 = vmatprep.mubr.msk.bf16.mxu1 %vm6986_vm1, %v9496_v12 }
 0x559   :  { %6870 = vrcp.f32 %v2773_v5  ;;  %v2976_v28 = vpack.c.bf16 %v2933_v53, %v2932_v19  ;;  %6246 = vmatprep.subr.bf16.mxu1 %v9496_v12 }
 0x55a   :  { %v6865_v25 = vpop.eup %6864 }
 0x55b   :  { %6219 = vmatmul.mubr.msk.bf16.vlgmr.msra.gmra.mxu0 %vm2251_vm3, %v2976_v28  ;;  %v2938_v23 = vmul.f32 %v6865_v25, %v8455_v63 }
 0x55c   :  { %6229 = vmatpush3.bf16.msra.mxu0 %v9536_v55  ;;  %6230 = vmatprep.mubr.msk.bf16.mxu0 %vm6986_vm1, %v9496_v12 }
 0x55d   :  { %6240 = vmatprep.subr.bf16.mxu0 %v9496_v12  ;;  %v2788_v43 = vpop.xlane.xlu0 %2787 }
 0x561   :  { %v2782_v24 = vpop.xlane.xlu1 %2781 }
 0x562   :  { %v6867_v47 = vpop.eup %6866  ;;  %6872 = vrcp.f32 %v2782_v24  ;;  %v9541_v24 = vld [vmem:[#allocation18_spill] sm:$0xff] }
 0x563   :  { %v2939_v9 = vmul.f32 %v6867_v47, %v8481_v52  ;;  %v6869_v3 = vpop.eup %6868  ;;  %6874 = vrcp.f32 %v2788_v43  ;;  %v9538_v52 = vld [vmem:[#allocation16_spill] sm:$0xff] }
 0x564   :  { %v2785_v32 = vpop.xlane.xlu0 %2784  ;;  %v2936_v1 = vmul.f32 %v6869_v3, %v8460_v37 }
 0x565   :  { %v2979_v21 = vpack.c.bf16 %v2939_v9, %v2938_v23  ;;  %v2791_v33 = vpop.xlane.xlu1 %2790  ;;  %6876 = vrcp.f32 %v2785_v32 }
 0x566   :  { %v6871_v15 = vpop.eup %6870  ;;  %6878 = vrcp.f32 %v2791_v33 }
 0x567   :  { %6237 = vmatmul.mubr.msk.bf16.vlgmr.msra.gmra.mxu1 %vm2251_vm3, %v2979_v21  ;;  %v2937_v13 = vmul.f32 %v6871_v15, %v8485_v10 }
 0x568   :  { %6247 = vmatpush3.bf16.msra.mxu1 %v9537_v35  ;;  %6248 = vmatprep.mubr.msk.bf16.mxu1 %vm6986_vm1, %v9496_v12 }
 0x569   :  { %v2978_v63 = vpack.c.bf16 %v2937_v13, %v2936_v1  ;;  %6258 = vmatprep.subr.bf16.mxu1 %v9496_v12 }
 0x56a   :  { %v2800_v37 = vpop.xlane.xlu0 %2799 }
 0x56b   :  { %6231 = vmatmul.mubr.msk.bf16.vlgmr.msra.gmra.mxu0 %vm2251_vm3, %v2978_v63 }
 0x56c   :  { %6241 = vmatpush3.bf16.msra.mxu0 %v9538_v52  ;;  %6242 = vmatprep.mubr.msk.bf16.mxu0 %vm6986_vm1, %v9496_v12 }
 0x56d   :  { %6252 = vmatprep.subr.bf16.mxu0 %v9496_v12 }
 0x56e   :  { %v2794_v39 = vpop.xlane.xlu1 %2793 }
 0x56f   :  { %v6873_v10 = vpop.eup %6872  ;;  %6880 = vrcp.f32 %v2794_v39 }
 0x570   :  { %v6875_v38 = vpop.eup %6874  ;;  %6882 = vrcp.f32 %v2800_v37  ;;  %v2940_v54 = vmul.f32 %v6873_v10, %v8505_v26 }
 0x571   :  { %v2942_v14 = vmul.f32 %v6875_v38, %v8493_v18 }
 0x572   :  { %v6877_v40 = vpop.eup %6876  ;;  %v8724_v36 = vpop.f32.mrf.mxu0 }
 0x573   :  { %v2797_v59 = vpop.xlane.xlu0 %2796  ;;  %v6879_v6 = vpop.eup %6878  ;;  %v2941_v20 = vmul.f32 %v6877_v40, %v8513_v11  ;;  %v9540_v11 = vld [vmem:[#allocation27_spill] sm:$0xff] }
 0x574   :  { %v2803_v48 = vpop.xlane.xlu1 %2802  ;;  %6884 = vrcp.f32 %v2797_v59  ;;  %v2943_v22 = vmul.f32 %v6879_v6, %v8508_v62  ;;  %v6100_v31 = vpop.f32.mrf.mxu0 }
 0x575   :  { %6886 = vrcp.f32 %v2803_v48  ;;  %v2980_v44 = vpack.c.bf16 %v2941_v20, %v2940_v54 }
 0x576   :  { %v2981_v50 = vpack.c.bf16 %v2943_v22, %v2942_v14  ;;  %v8730_v45 = vpop.f32.mrf.mxu0 }
 0x577   :  { %6243 = vmatmul.mubr.msk.bf16.vlgmr.msra.gmra.mxu0 %vm2251_vm3, %v2980_v44  ;;  %v2812_v18 = vpop.xlane.xlu0 %2811 }
 0x578   :  { %6249 = vmatmul.mubr.msk.bf16.vlgmr.msra.gmra.mxu1 %vm2251_vm3, %v2981_v50  ;;  %6253 = vmatpush3.bf16.msra.mxu0 %v9539_v60  ;;  %v6101_v26 = vpop.f32.mrf.mxu0 }
 0x579   :  { %6259 = vmatpush3.bf16.msra.mxu1 %v9540_v11  ;;  %6254 = vmatprep.mubr.msk.bf16.mxu0 %vm6986_vm1, %v9496_v12 }
 0x57a   :  { %6260 = vmatprep.mubr.msk.bf16.mxu1 %vm6986_vm1, %v9496_v12  ;;  %6264 = vmatprep.subr.bf16.mxu0 %v9496_v12 }
 0x57b   :  { %v2806_v62 = vpop.xlane.xlu1 %2805  ;;  %6270 = vmatprep.subr.bf16.mxu1 %v9496_v12 }
 0x57c   :  { %6888 = vrcp.f32 %v2806_v62  ;;  %v6881_v57 = vpop.eup %6880 }
 0x57d   :  { %6890 = vrcp.f32 %v2812_v18  ;;  %v6883_v16 = vpop.eup %6882  ;;  %v2944_v56 = vmul.f32 %v6881_v57, %v8542_v42  ;;  %v9542_v42 = vld [vmem:[#allocation28_spill] sm:$0xff] }
 0x57e   :  { %v2809_v7 = vpop.xlane.xlu0 %2808  ;;  %v2946_v53 = vmul.f32 %v6883_v16, %v8530_v46 }
 0x57f   :  { %v2815_v30 = vpop.xlane.xlu1 %2814  ;;  %6892 = vrcp.f32 %v2809_v7 }
 0x580   :  { %6894 = vrcp.f32 %v2815_v30 }
 0x581   :  { %v6885_v2 = vpop.eup %6884 }
 0x582   :  { %v6887_v61 = vpop.eup %6886  ;;  %v2945_v19 = vmul.f32 %v6885_v2, %v8553_v58 }
 0x583   :  { %v2947_v17 = vmul.f32 %v6887_v61, %v8547_v8  ;;  %v2824_v5 = vpop.xlane.xlu0 %2823 }
 0x584   :  { %v2982_v28 = vpack.c.bf16 %v2945_v19, %v2944_v56  ;;  %v8746_v25 = vpop.f32.mrf.mxu1 }
 0x585   :  { %v2983_v55 = vpack.c.bf16 %v2947_v17, %v2946_v53 }
 0x586   :  { %6255 = vmatmul.mubr.msk.bf16.vlgmr.msra.gmra.mxu0 %vm2251_vm3, %v2982_v28  ;;  %v6106_v43 = vpop.f32.mrf.mxu1  ;;  %v2818_v47 = vpop.xlane.xlu1 %2817 }
 0x587   :  { %6261 = vmatmul.mubr.msk.bf16.vlgmr.msra.gmra.mxu1 %vm2251_vm3, %v2983_v55  ;;  %6265 = vmatpush3.bf16.msra.mxu0 %v9541_v24  ;;  %6896 = vrcp.f32 %v2818_v47  ;;  %v2821_v58 = vpop.xlane.xlu0 %2820 }
 0x588   :  { %6271 = vmatpush3.bf16.msra.mxu1 %v9542_v42  ;;  %6266 = vmatprep.mubr.msk.bf16.mxu0 %vm6986_vm1, %v9496_v12  ;;  %v8754_v46 = vpop.f32.mrf.mxu1  ;;  %6898 = vrcp.f32 %v2821_v58 }
 0x589   :  { %6272 = vmatprep.mubr.msk.bf16.mxu1 %vm6986_vm1, %v9496_v12  ;;  %6276 = vmatprep.subr.bf16.mxu0 %v9496_v12  ;;  %6900 = vrcp.f32 %v2824_v5  ;;  %v6889_v8 = vpop.eup %6888 }
 0x58a   :  { %6282 = vmatprep.subr.bf16.mxu1 %v9496_v12  ;;  %v6107_v23 = vpop.f32.mrf.mxu1  ;;  %v2827_v9 = vpop.xlane.xlu1 %2826  ;;  %v2948_v33 = vmul.f32 %v6889_v8, %v8573_v49 }
 0x58b   :  { %v6891_v3 = vpop.eup %6890  ;;  %6902 = vrcp.f32 %v2827_v9  ;;  %v4399_v52 = vpop.permute.xlu0 %4398 }
 0x58c   :  { %v6893_v32 = vpop.eup %6892  ;;  %v2950_v1 = vmul.f32 %v6891_v3, %v8563_v4 }
 0x58d   :  { %v6895_v21 = vpop.eup %6894  ;;  %v2949_v15 = vmul.f32 %v6893_v32, %v8579_v51 }
 0x58e   :  { %v2951_v13 = vmul.f32 %v6895_v21, %v8575_v0  ;;  %v4446_v37 = vpop.permute.xlu1 %4445 }
 0x58f   :  { %v2984_v35 = vpack.c.bf16 %v2949_v15, %v2948_v33 }
 0x590   :  { %v2985_v63 = vpack.c.bf16 %v2951_v13, %v2950_v1 }
 0x591   :  { %6267 = vmatmul.mubr.msk.bf16.vlgmr.msra.gmra.mxu0 %vm2251_vm3, %v2984_v35 }
 0x592   :  { %6273 = vmatmul.mubr.msk.bf16.vlgmr.msra.gmra.mxu1 %vm2251_vm3, %v2985_v63  ;;  %6277 = vmatpush3.bf16.msra.mxu0 %v4399_v52 }
 0x593   :  { %6283 = vmatpush3.bf16.msra.mxu1 %v4446_v37  ;;  %v8766_v39 = vpop.f32.mrf.mxu0  ;;  %6278 = vmatprep.mubr.msk.bf16.mxu0 %vm6986_vm1, %v9496_v12 }
 0x594   :  { %v6897_v49 = vpop.eup %6896  ;;  %6284 = vmatprep.mubr.msk.bf16.mxu1 %vm6986_vm1, %v9496_v12 }
 0x595   :  { %v6899_v4 = vpop.eup %6898  ;;  %v2952_v0 = vmul.f32 %v6897_v49, %v8595_v34  ;;  %v6112_v51 = vpop.f32.mrf.mxu0 }
 0x596   :  { %v6901_v10 = vpop.eup %6900  ;;  %v2953_v38 = vmul.f32 %v6899_v4, %v8598_v41 }
 0x597   :  { %v8774_v40 = vpop.f32.mrf.mxu0  ;;  %v2954_v54 = vmul.f32 %v6901_v10, %v8587_v29 }
 0x598   :  { %v6903_v59 = vpop.eup %6902  ;;  %v2986_v6 = vpack.c.bf16 %v2953_v38, %v2952_v0 }
 0x599   :  { %v2955_v20 = vmul.f32 %v6903_v59, %v8604_v27  ;;  %v6113_v48 = vpop.f32.mrf.mxu0 }
 0x59a   :  { %6279 = vmatmul.mubr.msk.bf16.vlgmr.msra.gmra.mxu0 %vm2251_vm3, %v2986_v6 }
 0x59b   :  { %v2987_v14 = vpack.c.bf16 %v2955_v20, %v2954_v54  ;;  %v8779_v12 = vpop.f32.mrf.mxu0 }
 0x59d   :  { %v6124_v22 = vpop.f32.mrf.mxu0  ;;  %6285 = vmatmul.mubr.msk.bf16.vlgmr.msra.gmra.mxu1 %vm2251_vm3, %v2987_v14 }
 0x59f   :  { %v8782_v34 = vpop.f32.mrf.mxu1  ;;  %v8784_v41 = vpop.f32.mrf.mxu0 }
 0x5a1   :  { %v6118_v31 = vpop.f32.mrf.mxu1  ;;  %v6125_v44 = vpop.f32.mrf.mxu0 }
 0x5a3   :  { %v8786_v50 = vpop.f32.mrf.mxu1  ;;  %v8788_v29 = vpop.f32.mrf.mxu0 }
 0x5a5   :  { %v6119_v27 = vpop.f32.mrf.mxu1  ;;  %v6136_v60 = vpop.f32.mrf.mxu0 }
 0x5a7   :  { %v8790_v26 = vpop.f32.mrf.mxu0 }
 0x5a9   :  { %v6137_v11 = vpop.f32.mrf.mxu0 }
 0x5ad   :  { %v8792_v18 = vpop.f32.mrf.mxu1 }
 0x5af   :  { %v6130_v62 = vpop.f32.mrf.mxu1 }
 0x5b1   :  { %v8794_v57 = vpop.f32.mrf.mxu1 }
 0x5b3   :  { %v6131_v7 = vpop.f32.mrf.mxu1 }
 0x5b9   :  { %v8796_v16 = vpop.f32.mrf.mxu1 }
 0x5bb   :  { %v6142_v30 = vpop.f32.mrf.mxu1 }
 0x5bc   :  { %v6608_v30 = vld [vmem:[%s9424_s1 + $0x18] sm:$0xff]  }
 0x5bd   :  { %v8798_v2 = vpop.f32.mrf.mxu1  ;;  %6288 = vmatprep.subr.bf16.mxu0 %v6608_v30 }
 0x5be   :  { %6289 = vmatpush3.bf16.msra.mxu0 %v6608_v30 }
 0x5bf   :  { %v6143_v61 = vpop.f32.mrf.mxu1 }
 0x5c5   :  { %v3451_v56 = vpop.f32.mrf.mxu1 }
 0x5c7   :  { %v6154_v19 = vpop.f32.mrf.mxu1 }
 0x5c8   :  { %v3404_v53 = vpop.f32.mrf.mxu0 }
 0x5c9   :  { %v3454_v17 = vpop.f32.mrf.mxu1 }
 0x5ca   :  { %v6486_v5 = vpack.i.bf16 %v3454_v17, %v3451_v56  ;;  %v6148_v28 = vpop.f32.mrf.mxu0 }
 0x5cb   :  { %v6155_v55 = vpop.f32.mrf.mxu1 }
 0x5cc   :  { %6487 = vrot.lane.b32.xlu1 %v6486_v5, %s6991_s3  ;;  %v3407_v43 = vpop.f32.mrf.mxu0 }
 0x5cd   :  { %v6491_v24 = vpack.i.bf16 %v3407_v43, %v3404_v53 }
 0x5ce   :  { %v6149_v47 = vpop.f32.mrf.mxu0 }
 0x5cf   :  { %6492 = vrot.lane.b32.xlu0 %v6491_v24, %s6991_s3 }
 0x5d0   :  { %v3498_v42 = vpop.f32.mrf.mxu0  ;;  %v3545_v58 = vpop.f32.mrf.mxu1 }
 0x5d2   :  { %v6160_v8 = vpop.f32.mrf.mxu0  ;;  %v6166_v23 = vpop.f32.mrf.mxu1 }
 0x5d4   :  { %v3501_v9 = vpop.f32.mrf.mxu0  ;;  %v3548_v3 = vpop.f32.mrf.mxu1 }
 0x5d5   :  { %v6501_v32 = vpack.i.bf16 %v3501_v9, %v3498_v42  ;;  %v6496_v21 = vpack.i.bf16 %v3548_v3, %v3545_v58 }
 0x5d6   :  { %v6161_v33 = vpop.f32.mrf.mxu0  ;;  %v6167_v15 = vpop.f32.mrf.mxu1 }
 0x5d7   :  { %6497 = vrot.lane.b32.xlu1 %v6496_v21, %s6991_s3  ;;  %6502 = vrot.lane.b32.xlu0 %v6501_v32, %s6991_s3 }
 0x5d8   :  { %v3592_v1 = vpop.f32.mrf.mxu0  ;;  %v3639_v13 = vpop.f32.mrf.mxu1 }
 0x5da   :  { %v6172_v35 = vpop.f32.mrf.mxu0  ;;  %v6178_v63 = vpop.f32.mrf.mxu1 }
 0x5dc   :  { %v3595_v52 = vpop.f32.mrf.mxu0  ;;  %v3642_v37 = vpop.f32.mrf.mxu1 }
 0x5dd   :  { %v6511_v49 = vpack.i.bf16 %v3595_v52, %v3592_v1  ;;  %v6506_v4 = vpack.i.bf16 %v3642_v37, %v3639_v13 }
 0x5de   :  { %v6173_v0 = vpop.f32.mrf.mxu0  ;;  %v6179_v51 = vpop.f32.mrf.mxu1 }
 0x5df   :  { %6507 = vrot.lane.b32.xlu1 %v6506_v4, %s6991_s3  ;;  %6512 = vrot.lane.b32.xlu0 %v6511_v49, %s6991_s3  ;;  %v6609_v51 = vld [vmem:[%s9424_s1 + $0x10] sm:$0xff]  }
 0x5e0   :  { %v8806_v10 = vpop.f32.mrf.mxu0  ;;  %v8808_v38 = vpop.f32.mrf.mxu1  ;;  %6290 = vmatprep.subr.bf16.mxu0 %v6609_v51 }
 0x5e1   :  { %6291 = vmatpush3.bf16.msra.mxu0 %v6609_v51 }
 0x5e2   :  { %v6184_v59 = vpop.f32.mrf.mxu0  ;;  %v6190_v6 = vpop.f32.mrf.mxu1 }
 0x5e4   :  { %v8810_v54 = vpop.f32.mrf.mxu0  ;;  %v8812_v20 = vpop.f32.mrf.mxu1 }
 0x5e5   :  { %v6566_v48 = vpack.i.bf16 %v8810_v54, %v8806_v10  ;;  %v6571_v14 = vpack.i.bf16 %v8812_v20, %v8808_v38 }
 0x5e6   :  { %v6185_v22 = vpop.f32.mrf.mxu0  ;;  %v6191_v31 = vpop.f32.mrf.mxu1 }
 0x5e8   :  { %v3780_v44 = vpop.f32.mrf.mxu0  ;;  %v3827_v27 = vpop.f32.mrf.mxu1 }
 0x5ea   :  { %v6196_v60 = vpop.f32.mrf.mxu0  ;;  %v6202_v11 = vpop.f32.mrf.mxu1 }
 0x5ec   :  { %v3783_v62 = vpop.f32.mrf.mxu0  ;;  %v3830_v7 = vpop.f32.mrf.mxu1 }
 0x5ed   :  { %v6521_v61 = vpack.i.bf16 %v3783_v62, %v3780_v44  ;;  %v6516_v56 = vpack.i.bf16 %v3830_v7, %v3827_v27 }
 0x5ee   :  { %v6197_v19 = vpop.f32.mrf.mxu0  ;;  %v6203_v53 = vpop.f32.mrf.mxu1 }
 0x5ef   :  { %6517 = vrot.lane.b32.xlu1 %v6516_v56, %s6992_s10  ;;  %6522 = vrot.lane.b32.xlu0 %v6521_v61, %s6992_s10 }
 0x5f0   :  { %v3874_v17 = vpop.f32.mrf.mxu0  ;;  %v3921_v5 = vpop.f32.mrf.mxu1 }
 0x5f2   :  { %v6208_v28 = vpop.f32.mrf.mxu0  ;;  %v6214_v55 = vpop.f32.mrf.mxu1 }
 0x5f4   :  { %v3877_v43 = vpop.f32.mrf.mxu0  ;;  %v3924_v24 = vpop.f32.mrf.mxu1 }
 0x5f5   :  { %v6531_v47 = vpack.i.bf16 %v3877_v43, %v3874_v17  ;;  %v6526_v42 = vpack.i.bf16 %v3924_v24, %v3921_v5 }
 0x5f6   :  { %v6209_v58 = vpop.f32.mrf.mxu0  ;;  %v6215_v8 = vpop.f32.mrf.mxu1 }
 0x5f7   :  { %6527 = vrot.lane.b32.xlu1 %v6526_v42, %s6992_s10  ;;  %6532 = vrot.lane.b32.xlu0 %v6531_v47, %s6992_s10 }
 0x617   :  { %v4015_v23 = vpop.f32.mrf.mxu1 }
 0x619   :  { %v6226_v9 = vpop.f32.mrf.mxu1 }
 0x61b   :  { %v3968_v3 = vpop.f32.mrf.mxu0  ;;  %v4018_v32 = vpop.f32.mrf.mxu1 }
 0x61c   :  { %v6551_v61 = vpack.i.bf16 %v4018_v32, %v4015_v23 }
 0x61d   :  { %v6220_v21 = vpop.f32.mrf.mxu0  ;;  %v6227_v33 = vpop.f32.mrf.mxu1 }
 0x61f   :  { %v3971_v15 = vpop.f32.mrf.mxu0 }
 0x620   :  { %v6546_v30 = vpack.i.bf16 %v3971_v15, %v3968_v3 }
 0x621   :  { %v6221_v1 = vpop.f32.mrf.mxu0 }
 0x627   :  { %v4109_v13 = vpop.f32.mrf.mxu1 }
 0x629   :  { %v6238_v35 = vpop.f32.mrf.mxu1 }
 0x62b   :  { %v4062_v63 = vpop.f32.mrf.mxu0  ;;  %v4112_v52 = vpop.f32.mrf.mxu1 }
 0x62d   :  { %v6232_v37 = vpop.f32.mrf.mxu0  ;;  %v6239_v49 = vpop.f32.mrf.mxu1 }
 0x62f   :  { %v4065_v4 = vpop.f32.mrf.mxu0 }
 0x630   :  { %v6586_v10 = vpack.i.bf16 %v4065_v4, %v4062_v63 }
 0x631   :  { %v6233_v0 = vpop.f32.mrf.mxu0 }
 0x637   :  { %v4156_v59 = vpop.f32.mrf.mxu0 }
 0x638   :  { %v4203_v6 = vpop.f32.mrf.mxu1 }
 0x639   :  { %v6244_v22 = vpop.f32.mrf.mxu0 }
 0x63a   :  { %v6250_v31 = vpop.f32.mrf.mxu1 }
 0x63b   :  { %v4159_v44 = vpop.f32.mrf.mxu0 }
 0x63c   :  { %v6541_v27 = vpack.i.bf16 %v4159_v44, %v4156_v59  ;;  %v4206_v60 = vpop.f32.mrf.mxu1 }
 0x63d   :  { %v6536_v11 = vpack.i.bf16 %v4206_v60, %v4203_v6  ;;  %v6245_v62 = vpop.f32.mrf.mxu0 }
 0x63e   :  { %v6251_v7 = vpop.f32.mrf.mxu1  ;;  %6542 = vrot.lane.b32.xlu0 %v6541_v27, %s6993_s13  ;;  %v6488_v4 = vpop.permute.xlu1 %6487 }
 0x63f   :  { %6537 = vrot.lane.b32.xlu1 %v6536_v11, %s6993_s13  ;;  %v6490_v44 = vunpack.i.h.bf16 %v6488_v4  ;;  %v6489_v27 = vunpack.i.l.bf16 %v6488_v4 }
 0x641   :  { %v6493_v63 = vpop.permute.xlu0 %6492 }
 0x642   :  { %6547 = vrot.lane.b32.xlu0 %v6546_v30, %s6992_s10  ;;  %v6495_v11 = vunpack.i.h.bf16 %v6493_v63  ;;  %v6494_v62 = vunpack.i.l.bf16 %v6493_v63 }
 0x643   :  { %6552 = vrot.lane.b32.xlu1 %v6551_v61, %s6992_s10 }
 0x646   :  { %v4250_v56 = vpop.f32.mrf.mxu0 }
 0x647   :  { %v4297_v19 = vpop.f32.mrf.mxu1 }
 0x648   :  { %v6256_v53 = vpop.f32.mrf.mxu0 }
 0x649   :  { %v6262_v17 = vpop.f32.mrf.mxu1  ;;  %v4687_v53 = vsel %vm653_vm2, %v8754_v46, %v6490_v44 }
 0x64a   :  { %v4253_v5 = vpop.f32.mrf.mxu0  ;;  %v4686_v17 = vsel %vm653_vm2, %v8746_v25, %v6489_v27 }
 0x64b   :  { %v6561_v28 = vpack.i.bf16 %v4253_v5, %v4250_v56  ;;  %v4300_v55 = vpop.f32.mrf.mxu1 }
 0x64c   :  { %v6556_v43 = vpack.i.bf16 %v4300_v55, %v4297_v19  ;;  %v6257_v24 = vpop.f32.mrf.mxu0  ;;  %v4684_v55 = vsel %vm653_vm2, %v8724_v36, %v6494_v62 }
 0x64d   :  { %v6263_v47 = vpop.f32.mrf.mxu1  ;;  %6562 = vrot.lane.b32.xlu0 %v6561_v28, %s6993_s13  ;;  %v4685_v28 = vsel %vm653_vm2, %v8730_v45, %v6495_v11 }
 0x64e   :  { %6557 = vrot.lane.b32.xlu1 %v6556_v43, %s6993_s13 }
 0x651   :  { %6567 = vrot.lane.b32.xlu0 %v6566_v48, %s6991_s3  ;;  %v4344_v42 = vpop.f32.mrf.mxu0  ;;  %v6591_v48 = vpack.i.bf16 %v4112_v52, %v4109_v13  ;;  %v6503_v13 = vpop.permute.xlu0 %6502 }
 0x652   :  { %6572 = vrot.lane.b32.xlu1 %v6571_v14, %s6991_s3  ;;  %v4391_v58 = vpop.f32.mrf.mxu1  ;;  %v6498_v52 = vpop.permute.xlu1 %6497 }
 0x653   :  { %v6268_v8 = vpop.f32.mrf.mxu0 }
 0x654   :  { %v6274_v23 = vpop.f32.mrf.mxu1 }
 0x655   :  { %v4347_v9 = vpop.f32.mrf.mxu0  ;;  %v8848_v59 = vpop.permute.xlu0 %6512 }
 0x656   :  { %v6581_v3 = vpack.i.bf16 %v4347_v9, %v4344_v42  ;;  %v4394_v32 = vpop.f32.mrf.mxu1  ;;  %v8850_v6 = vpop.permute.xlu1 %6507 }
 0x657   :  { %v6576_v21 = vpack.i.bf16 %v4394_v32, %v4391_v58  ;;  %v6269_v33 = vpop.f32.mrf.mxu0 }
 0x658   :  { %v6275_v15 = vpop.f32.mrf.mxu1  ;;  %6582 = vrot.lane.b32.xlu0 %v6581_v3, %s6993_s13  ;;  %v6500_v33 = vunpack.i.h.bf16 %v6498_v52 }
 0x659   :  { %6577 = vrot.lane.b32.xlu1 %v6576_v21, %s6993_s13  ;;  %v6499_v15 = vunpack.i.l.bf16 %v6498_v52 }
 0x65a   :  { %v4438_v54 = vpop.f32.mrf.mxu0 }
 0x65c   :  { %v6280_v1 = vpop.f32.mrf.mxu0  ;;  %6587 = vrot.lane.b32.xlu0 %v6586_v10, %s6992_s10 }
 0x65d   :  { %6592 = vrot.lane.b32.xlu1 %v6591_v48, %s6992_s10  ;;  %v4485_v38 = vpop.f32.mrf.mxu1  ;;  %v6504_v48 = vunpack.i.l.bf16 %v6503_v13 }
 0x65e   :  { %v4441_v20 = vpop.f32.mrf.mxu0 }
 0x65f   :  { %v6596_v14 = vpack.i.bf16 %v4441_v20, %v4438_v54  ;;  %v6286_v35 = vpop.f32.mrf.mxu1  ;;  %v6505_v54 = vunpack.i.h.bf16 %v6503_v13  ;;  %v4688_v63 = vsel %vm653_vm2, %v8766_v39, %v6504_v48 }
 0x660   :  { %v6281_v37 = vpop.f32.mrf.mxu0 }
 0x661   :  { %6597 = vrot.lane.b32.xlu0 %v6596_v14, %s6993_s13  ;;  %v4488_v49 = vpop.f32.mrf.mxu1  ;;  %v6523_v22 = vpop.permute.xlu0 %6522  ;;  %v4691_v37 = vsel %vm653_vm2, %v8786_v50, %v6500_v33 }
 0x662   :  { %v6601_v0 = vpack.i.bf16 %v4488_v49, %v4485_v38  ;;  %v6518_v31 = vpop.permute.xlu1 %6517  ;;  %v6525_v30 = vunpack.i.h.bf16 %v6523_v22  ;;  %v6524_v61 = vunpack.i.l.bf16 %v6523_v22  ;;  %v4690_v49 = vsel %vm653_vm2, %v8782_v34, %v6499_v15 }
 0x663   :  { %v6287_v51 = vpop.f32.mrf.mxu1  ;;  %v6520_v56 = vunpack.i.h.bf16 %v6518_v31  ;;  %v6519_v19 = vunpack.i.l.bf16 %v6518_v31 }
 0x664   :  { %6602 = vrot.lane.b32.xlu1 %v6601_v0, %s6993_s13  ;;  %v4700_v42 = vsel %vm2251_vm3, %v4684_v55, %v6524_v61  ;;  %v4701_v58 = vsel %vm2251_vm3, %v4685_v28, %v6525_v30  ;;  %v4689_v51 = vsel %vm653_vm2, %v8774_v40, %v6505_v54  ;;  %v6510_v30 = vunpack.i.h.bf16 %v8850_v6 }
 0x665   :  { %v4703_v23 = vsel %vm2251_vm3, %v4687_v53, %v6520_v56  ;;  %v4702_v25 = vsel %vm2251_vm3, %v4686_v17, %v6519_v19  ;;  %v6509_v61 = vunpack.i.l.bf16 %v8850_v6  ;;  %v6515_v19 = vunpack.i.h.bf16 %v8848_v59 }
 0x666   :  { %v6514_v53 = vunpack.i.l.bf16 %v8848_v59 }
 0x667   :  { %v4693_v6 = vsel %vm653_vm2, %v8784_v41, %v6515_v19 }
 0x669   :  { %v6533_v60 = vpop.permute.xlu0 %6532  ;;  %v6528_v7 = vpop.permute.xlu1 %6527 }
 0x66a   :  { %v6535_v38 = vunpack.i.h.bf16 %v6533_v60  ;;  %v6534_v20 = vunpack.i.l.bf16 %v6533_v60  ;;  %v6530_v14 = vunpack.i.h.bf16 %v6528_v7  ;;  %v6529_v35 = vunpack.i.l.bf16 %v6528_v7 }
 0x66c   :  { %v4704_v22 = vsel %vm2251_vm3, %v4688_v63, %v6534_v20  ;;  %v4705_v31 = vsel %vm2251_vm3, %v4689_v51, %v6535_v38  ;;  %v4707_v50 = vsel %vm2251_vm3, %v4691_v37, %v6530_v14  ;;  %v4706_v34 = vsel %vm2251_vm3, %v4690_v49, %v6529_v35 }
 0x6b0   :  { %v6543_v5 = vpop.permute.xlu0 %6542 }
 0x6b1   :  { %v6538_v43 = vpop.permute.xlu1 %6537  ;;  %v6545_v24 = vunpack.i.h.bf16 %v6543_v5  ;;  %v6544_v47 = vunpack.i.l.bf16 %v6543_v5 }
 0x6b2   :  { %v6540_v8 = vunpack.i.h.bf16 %v6538_v43  ;;  %v6539_v46 = vunpack.i.l.bf16 %v6538_v43 }
 0x6b3   :  { %v4717_v9 = vsel %vm4716_vm4, %v4700_v42, %v6544_v47  ;;  %v4718_v45 = vsel %vm4716_vm4, %v4701_v58, %v6545_v24  ;;  %v4695_v24 = vsel %vm653_vm2, %v8794_v57, %v6510_v30  ;;  %v4694_v47 = vsel %vm653_vm2, %v8792_v18, %v6509_v61 }
 0x6b4   :  { %v4720_v3 = vsel %vm4716_vm4, %v4703_v23, %v6540_v8  ;;  %v4719_v36 = vsel %vm4716_vm4, %v4702_v25, %v6539_v46  ;;  %v4733_v32 = vpack.c.bf16 %v4718_v45, %v4717_v9  ;;  %v6548_v10 = vpop.permute.xlu0 %6547  ;;  %v4692_v58 = vsel %vm653_vm2, %v8779_v12, %v6514_v53 }
 0x6b5   :  { %v4734_v21 = vpack.c.bf16 %v4720_v3, %v4719_v36  ;;  %v6553_v1 = vpop.permute.xlu1 %6552  ;;  %v6550_v5 = vunpack.i.h.bf16 %v6548_v10  ;;  %v6549_v28 = vunpack.i.l.bf16 %v6548_v10 }
 0x6b6   :  { %6292 = vmatprep.mubr.msk.bf16.mxu0 %vm34_vm0, %v4733_v32  ;;  %v6555_v55 = vunpack.i.h.bf16 %v6553_v1  ;;  %v6554_v43 = vunpack.i.l.bf16 %v6553_v1 }
 0x6b7   :  { %6293 = vmatmul.mubr.msk.bf16.vlgmr.msra.gmra.mxu0 %vm34_vm0, %v4734_v21  ;;  %v4708_v23 = vsel %vm2251_vm3, %v4692_v58, %v6549_v28  ;;  %v4709_v25 = vsel %vm2251_vm3, %v4693_v6, %v6550_v5 }
 0x6b8   :  { %v4711_v57 = vsel %vm2251_vm3, %v4695_v24, %v6555_v55  ;;  %v4710_v18 = vsel %vm2251_vm3, %v4694_v47, %v6554_v43  ;;  %v6970_v24 = vld [vmem:[%s9423_s0 + $0x8] sm:$0xff] }
 0x6bf   :  { %v6563_v0 = vpop.permute.xlu0 %6562 }
 0x6c0   :  { %v6558_v4 = vpop.permute.xlu1 %6557  ;;  %v6565_v13 = vunpack.i.h.bf16 %v6563_v0  ;;  %v6564_v52 = vunpack.i.l.bf16 %v6563_v0 }
 0x6c1   :  { %v6560_v44 = vunpack.i.h.bf16 %v6558_v4  ;;  %v6559_v27 = vunpack.i.l.bf16 %v6558_v4 }
 0x6c2   :  { %v4721_v60 = vsel %vm4716_vm4, %v4704_v22, %v6564_v52  ;;  %v4722_v40 = vsel %vm4716_vm4, %v4705_v31, %v6565_v13 }
 0x6c3   :  { %v4724_v11 = vsel %vm4716_vm4, %v4707_v50, %v6560_v44  ;;  %v4723_v39 = vsel %vm4716_vm4, %v4706_v34, %v6559_v27  ;;  %v4735_v62 = vpack.c.bf16 %v4722_v40, %v4721_v60  ;;  %v6568_v56 = vpop.permute.xlu0 %6567 }
 0x6c4   :  { %v4736_v7 = vpack.c.bf16 %v4724_v11, %v4723_v39  ;;  %v6573_v17 = vpop.permute.xlu1 %6572  ;;  %v6570_v33 = vunpack.i.h.bf16 %v6568_v56  ;;  %v6569_v15 = vunpack.i.l.bf16 %v6568_v56  ;;  %v6968_v56 = vld [vmem:[%s9423_s0] sm:$0xff] }
 0x6c5   :  { %6296 = vmatprep.mubr.msk.bf16.mxu0 %vm34_vm0, %v4735_v62  ;;  %v6575_v38 = vunpack.i.h.bf16 %v6573_v17  ;;  %v6574_v20 = vunpack.i.l.bf16 %v6573_v17  ;;  %v6969_v17 = vld [vmem:[%s9423_s0 + $0x10] sm:$0xff] }
 0x6c6   :  { %6297 = vmatmul.mubr.msk.bf16.gmra.mxu0 %vm34_vm0, %v4736_v7  ;;  %v4697_v14 = vsel %vm653_vm2, %v8790_v26, %v6570_v33  ;;  %v4696_v35 = vsel %vm653_vm2, %v8788_v29, %v6569_v15  ;;  %v6974_v33 = vld [vmem:[%s9423_s0 + $0x28] sm:$0xff] }
 0x6c7   :  { %v4699_v52 = vsel %vm653_vm2, %v8798_v2, %v6575_v38  ;;  %v4698_v29 = vsel %vm653_vm2, %v8796_v16, %v6574_v20  ;;  %v8931_v16 = vld [vmem:[%s9425_s2 + $0x1] ss:$0 sm:$0xff] }
 0x6ca   :  { %v6583_v42 = vpop.permute.xlu0 %6582 }
 0x6cb   :  { %v6578_v8 = vpop.permute.xlu1 %6577  ;;  %v6585_v59 = vunpack.i.h.bf16 %v6583_v42  ;;  %v6584_v46 = vunpack.i.l.bf16 %v6583_v42  ;;  %v6971_v42 = vld [vmem:[%s9423_s0 + $0x18] sm:$0xff] }
 0x6cc   :  { %v6580_v9 = vunpack.i.h.bf16 %v6578_v8  ;;  %v6579_v45 = vunpack.i.l.bf16 %v6578_v8 }
 0x6cd   :  { %v4725_v3 = vsel %vm4716_vm4, %v4708_v23, %v6584_v46  ;;  %v4726_v41 = vsel %vm4716_vm4, %v4709_v25, %v6585_v59 }
 0x6ce   :  { %v4728_v36 = vsel %vm4716_vm4, %v4711_v57, %v6580_v9  ;;  %v4727_v12 = vsel %vm4716_vm4, %v4710_v18, %v6579_v45  ;;  %v4737_v32 = vpack.c.bf16 %v4726_v41, %v4725_v3  ;;  %v6588_v21 = vpop.permute.xlu0 %6587  ;;  %v6972_v57 = vld [vmem:[%s9423_s0 + $0x20] sm:$0xff]  ;;  %v6973_v41 = vld [vmem:[%s9423_s0 + $0x30] sm:$0xff] }
 0x6cf   :  { %v4738_v10 = vpack.c.bf16 %v4728_v36, %v4727_v12  ;;  %v6593_v54 = vpop.permute.xlu1 %6592  ;;  %v6590_v48 = vunpack.i.h.bf16 %v6588_v21  ;;  %v6589_v1 = vunpack.i.l.bf16 %v6588_v21 }
 0x6d0   :  { %6300 = vmatprep.mubr.msk.bf16.mxu0 %vm34_vm0, %v4737_v32  ;;  %v6595_v49 = vunpack.i.h.bf16 %v6593_v54  ;;  %v6594_v0 = vunpack.i.l.bf16 %v6593_v54 }
 0x6d1   :  { %6301 = vmatmul.mubr.msk.bf16.gmra.mxu0 %vm34_vm0, %v4738_v10  ;;  %v4712_v4 = vsel %vm2251_vm3, %v4696_v35, %v6589_v1  ;;  %v4713_v13 = vsel %vm2251_vm3, %v4697_v14, %v6590_v48  ;;  %v6975_v10 = vld [vmem:[%s9423_s0 + $0x38] sm:$0xff] }
 0x6d2   :  { %v4715_v34 = vsel %vm2251_vm3, %v4699_v52, %v6595_v49  ;;  %v4714_v60 = vsel %vm2251_vm3, %v4698_v29, %v6594_v0  ;;  %v6976_v0 = vld [vmem:[%s9423_s0 + $0x40] sm:$0xff] }
 0x6d3   :  { %v6598_v37 = vpop.permute.xlu0 %6597 }
 0x6d4   :  { %v6600_v51 = vunpack.i.h.bf16 %v6598_v37  ;;  %v6599_v63 = vunpack.i.l.bf16 %v6598_v37 }
 0x6d6   :  { %v4729_v22 = vsel %vm4716_vm4, %v4712_v4, %v6599_v63  ;;  %v4730_v31 = vsel %vm4716_vm4, %v4713_v13, %v6600_v51  ;;  %v6603_v26 = vpop.permute.xlu1 %6602  ;;  %v6977_v4 = vld [vmem:[%s9423_s0 + $0x50] sm:$0xff] }
 0x6d7   :  { %v4739_v44 = vpack.c.bf16 %v4730_v31, %v4729_v22  ;;  %v6605_v27 = vunpack.i.h.bf16 %v6603_v26  ;;  %v6604_v50 = vunpack.i.l.bf16 %v6603_v26  ;;  %v6978_v26 = vld [vmem:[%s9423_s0 + $0x48] sm:$0xff] }
 0x6d9   :  { %v4732_v40 = vsel %vm4716_vm4, %v4715_v34, %v6605_v27  ;;  %v4731_v11 = vsel %vm4716_vm4, %v4714_v60, %v6604_v50  ;;  %6304 = vmatprep.mubr.msk.bf16.mxu0 %vm34_vm0, %v4739_v44  ;;  %v6979_v44 = vld [vmem:[%s9423_s0 + $0x58] sm:$0xff] }
 0x6da   :  { %v4740_v2 = vpack.c.bf16 %v4732_v40, %v4731_v11 }
 0x6dc   :  { %6305 = vmatmul.mubr.msk.bf16.gmra.mxu0 %vm34_vm0, %v4740_v2 }
 0x777   :  { %v6294_v39 = vpop.f32.mrf.mxu0 }
 0x778   :  { %v4829_v7 = vadd.f32 %v6294_v39, %v8931_v16 }
 0x779   :  { %v4820_v62 = vpop.f32.mrf.mxu0 }
 0x77a   :  { %v4821_v30 = vadd.f32 %v8931_v16, %v4820_v62  ;;  %v8943_v5 = vadd.f32 %v6969_v17, %v4829_v7  ;;  %v6980_v7 = vld [vmem:[%s9423_s0 + $0x60] sm:$0xff] }
 0x77b   :  { %v6295_v61 = vpop.f32.mrf.mxu0 }
 0x77c   :  { %v8938_v19 = vadd.f32 %v6968_v56, %v4821_v30  ;;  %v4832_v28 = vadd.f32 %v6295_v61, %v8931_v16  ;;  %v4905_v8 = vsel %vm34_vm0, %v8943_v5, 0.0  ;;  %v6981_v56 = vld [vmem:[%s9423_s0 + $0x70] sm:$0xff] }
 0x77d   :  { %v4823_v53 = vpop.f32.mrf.mxu0 }
 0x77e   :  { %v4824_v55 = vadd.f32 %v8931_v16, %v4823_v53  ;;  %v4899_v43 = vsel %vm34_vm0, %v8938_v19, 0.0  ;;  %v8957_v6 = vadd.f32 %v6971_v42, %v4832_v28  ;;  %v6983_v42 = vld [vmem:[%s9423_s0 + $0x78] sm:$0xff] }
 0x77f   :  { %4900 = vadd.xlane.f32.xlu0 %v4899_v43  ;;  %v6982_v43 = vld [vmem:[%s9423_s0 + $0x68] sm:$0xff] }
 0x780   :  { %v8952_v47 = vadd.f32 %v6970_v24, %v4824_v55  ;;  %v4908_v46 = vsel %vm34_vm0, %v8957_v6, 0.0 }
 0x782   :  { %v4902_v58 = vsel %vm34_vm0, %v8952_v47, 0.0 }
 0x783   :  { %4903 = vadd.xlane.f32.xlu1 %v4902_v58  ;;  %4906 = vadd.xlane.f32.xlu0 %v4905_v8 }
 0x786   :  { %v6298_v59 = vpop.f32.mrf.mxu0 }
 0x787   :  { %4909 = vadd.xlane.f32.xlu0 %v4908_v46  ;;  %v4845_v25 = vadd.f32 %v6298_v59, %v8931_v16 }
 0x788   :  { %v4836_v23 = vpop.f32.mrf.mxu0 }
 0x789   :  { %v4837_v9 = vadd.f32 %v8931_v16, %v4836_v23  ;;  %v8975_v36 = vadd.f32 %v6973_v41, %v4845_v25 }
 0x78a   :  { %v6299_v45 = vpop.f32.mrf.mxu0 }
 0x78b   :  { %v8970_v18 = vadd.f32 %v6972_v57, %v4837_v9  ;;  %v4848_v12 = vadd.f32 %v6299_v45, %v8931_v16  ;;  %v4917_v1 = vsel %vm34_vm0, %v8975_v36, 0.0 }
 0x78c   :  { %v4839_v3 = vpop.f32.mrf.mxu0 }
 0x78d   :  { %v4840_v32 = vadd.f32 %v8931_v16, %v4839_v3  ;;  %v4911_v21 = vsel %vm34_vm0, %v8970_v18, 0.0  ;;  %v8989_v54 = vadd.f32 %v6975_v10, %v4848_v12 }
 0x78e   :  { %4912 = vadd.xlane.f32.xlu0 %v4911_v21 }
 0x78f   :  { %v8984_v15 = vadd.f32 %v6974_v33, %v4840_v32  ;;  %v4920_v37 = vsel %vm34_vm0, %v8989_v54, 0.0 }
 0x791   :  { %v4914_v48 = vsel %vm34_vm0, %v8984_v15, 0.0  ;;  %v6302_v38 = vpop.f32.mrf.mxu0 }
 0x792   :  { %4915 = vadd.xlane.f32.xlu1 %v4914_v48  ;;  %4918 = vadd.xlane.f32.xlu0 %v4917_v1  ;;  %v4861_v14 = vadd.f32 %v6302_v38, %v8931_v16 }
 0x793   :  { %v4852_v20 = vpop.f32.mrf.mxu0 }
 0x794   :  { %v4853_v35 = vadd.f32 %v8931_v16, %v4852_v20  ;;  %v9007_v13 = vadd.f32 %v6977_v4, %v4861_v14 }
 0x795   :  { %v6303_v49 = vpop.f32.mrf.mxu0 }
 0x796   :  { %4921 = vadd.xlane.f32.xlu1 %v4920_v37  ;;  %v9002_v51 = vadd.f32 %v6976_v0, %v4853_v35  ;;  %v4864_v52 = vadd.f32 %v6303_v49, %v8931_v16  ;;  %v4929_v60 = vsel %vm34_vm0, %v9007_v13, 0.0 }
 0x797   :  { %v4855_v63 = vpop.f32.mrf.mxu0 }
 0x798   :  { %v4856_v22 = vadd.f32 %v8931_v16, %v4855_v63  ;;  %v4923_v31 = vsel %vm34_vm0, %v9002_v51, 0.0  ;;  %v9021_v27 = vadd.f32 %v6979_v44, %v4864_v52 }
 0x799   :  { %4924 = vadd.xlane.f32.xlu0 %v4923_v31 }
 0x79a   :  { %v9016_v29 = vadd.f32 %v6978_v26, %v4856_v22  ;;  %v4932_v62 = vsel %vm34_vm0, %v9021_v27, 0.0 }
 0x79c   :  { %v6306_v50 = vpop.f32.mrf.mxu0  ;;  %v4926_v34 = vsel %vm34_vm0, %v9016_v29, 0.0 }
 0x79d   :  { %4927 = vadd.xlane.f32.xlu1 %v4926_v34  ;;  %4930 = vadd.xlane.f32.xlu0 %v4929_v60  ;;  %v4877_v11 = vadd.f32 %v6306_v50, %v8931_v16 }
 0x79e   :  { %v4868_v40 = vpop.f32.mrf.mxu0 }
 0x79f   :  { %v4869_v2 = vadd.f32 %v8931_v16, %v4868_v40  ;;  %v9039_v53 = vadd.f32 %v6981_v56, %v4877_v11 }
 0x7a0   :  { %v6307_v39 = vpop.f32.mrf.mxu0 }
 0x7a1   :  { %v9034_v30 = vadd.f32 %v6980_v7, %v4869_v2  ;;  %4933 = vadd.xlane.f32.xlu1 %v4932_v62  ;;  %v4880_v17 = vadd.f32 %v6307_v39, %v8931_v16 }
 0x7a2   :  { %v4871_v61 = vpop.f32.mrf.mxu0 }
 0x7a3   :  { %v4872_v28 = vadd.f32 %v8931_v16, %v4871_v61  ;;  %v4935_v55 = vsel %vm34_vm0, %v9034_v30, 0.0  ;;  %v9053_v58 = vadd.f32 %v6983_v42, %v4880_v17  ;;  %v4941_v16 = vsel %vm34_vm0, %v9039_v53, 0.0 }
 0x7a4   :  { %4936 = vadd.xlane.f32.xlu0 %v4935_v55 }
 0x7a5   :  { %v9048_v24 = vadd.f32 %v6982_v43, %v4872_v28  ;;  %v4944_v59 = vsel %vm34_vm0, %v9053_v58, 0.0 }
 0x7a7   :  { %v4938_v8 = vsel %vm34_vm0, %v9048_v24, 0.0 }
 0x7a8   :  { %4939 = vadd.xlane.f32.xlu1 %v4938_v8  ;;  %4942 = vadd.xlane.f32.xlu0 %v4941_v16 }
 0x7ac   :  { %4945 = vadd.xlane.f32.xlu1 %v4944_v59 }
 0x808   :  { %v4901_v46 = vpop.xlane.xlu0 %4900 }
 0x809   :  { %v4947_v23 = vmul.f32 0.03125, %v4901_v46 }
 0x80b   :  { %v9062_v25 = vsub.f32 %v8938_v19, %v4947_v23 }
 0x80c   :  { %v4904_v9 = vpop.xlane.xlu1 %4903  ;;  %v4907_v45 = vpop.xlane.xlu0 %4906 }
 0x80d   :  { %v4948_v57 = vmul.f32 0.03125, %v4904_v9  ;;  %v4949_v3 = vmul.f32 0.03125, %v4907_v45  ;;  %v4979_v41 = vmul.f32 %v9062_v25, %v9062_v25 }
 0x80f   :  { %v9067_v12 = vsub.f32 %v8952_v47, %v4948_v57  ;;  %v9070_v32 = vsub.f32 %v8943_v5, %v4949_v3  ;;  %v4995_v21 = vsel %vm34_vm0, %v4979_v41, 0.0 }
 0x810   :  { %4996 = vadd.xlane.f32.xlu0 %v4995_v21  ;;  %v4910_v33 = vpop.xlane.xlu0 %4909 }
 0x811   :  { %v4950_v10 = vmul.f32 0.03125, %v4910_v33  ;;  %v4980_v48 = vmul.f32 %v9067_v12, %v9067_v12  ;;  %v4981_v1 = vmul.f32 %v9070_v32, %v9070_v32 }
 0x813   :  { %v9078_v38 = vsub.f32 %v8957_v6, %v4950_v10  ;;  %v4998_v20 = vsel %vm34_vm0, %v4980_v48, 0.0  ;;  %v5001_v14 = vsel %vm34_vm0, %v4981_v1, 0.0 }
 0x814   :  { %4999 = vadd.xlane.f32.xlu1 %v4998_v20  ;;  %5002 = vadd.xlane.f32.xlu0 %v5001_v14 }
 0x815   :  { %v4982_v35 = vmul.f32 %v9078_v38, %v9078_v38 }
 0x817   :  { %v4913_v37 = vpop.xlane.xlu0 %4912  ;;  %v5004_v0 = vsel %vm34_vm0, %v4982_v35, 0.0 }
 0x818   :  { %v4951_v49 = vmul.f32 0.03125, %v4913_v37  ;;  %5005 = vadd.xlane.f32.xlu1 %v5004_v0  ;;  %v6610_v0 = vld [vmem:[%s9424_s1 + $0x28] sm:$0xff]  }
 0x819   :  { %6308 = vmatprep.subr.bf16.mxu1 %v6610_v0 }
 0x81a   :  { %v9086_v63 = vsub.f32 %v8970_v18, %v4951_v49  ;;  %6309 = vmatpush3.bf16.msra.mxu1 %v6610_v0 }
 0x81b   :  { %v4916_v4 = vpop.xlane.xlu1 %4915  ;;  %v4919_v52 = vpop.xlane.xlu0 %4918 }
 0x81c   :  { %v4952_v22 = vmul.f32 0.03125, %v4916_v4  ;;  %v4953_v31 = vmul.f32 0.03125, %v4919_v52  ;;  %v4983_v26 = vmul.f32 %v9086_v63, %v9086_v63 }
 0x81e   :  { %v9091_v44 = vsub.f32 %v8984_v15, %v4952_v22  ;;  %v9094_v50 = vsub.f32 %v8975_v36, %v4953_v31  ;;  %v5007_v34 = vsel %vm34_vm0, %v4983_v26, 0.0 }
 0x81f   :  { %v4922_v60 = vpop.xlane.xlu1 %4921  ;;  %5008 = vadd.xlane.f32.xlu0 %v5007_v34 }
 0x820   :  { %v4954_v40 = vmul.f32 0.03125, %v4922_v60  ;;  %v4984_v11 = vmul.f32 %v9091_v44, %v9091_v44  ;;  %v4985_v2 = vmul.f32 %v9094_v50, %v9094_v50 }
 0x822   :  { %v9102_v39 = vsub.f32 %v8989_v54, %v4954_v40  ;;  %v5010_v62 = vsel %vm34_vm0, %v4984_v11, 0.0  ;;  %v5013_v7 = vsel %vm34_vm0, %v4985_v2, 0.0  ;;  %v4925_v61 = vpop.xlane.xlu0 %4924  ;;  %v6611_v40 = vld [vmem:[%s9424_s1 + $0x20] sm:$0xff]  }
 0x823   :  { %5011 = vadd.xlane.f32.xlu1 %v5010_v62  ;;  %5014 = vadd.xlane.f32.xlu0 %v5013_v7  ;;  %v4955_v56 = vmul.f32 0.03125, %v4925_v61 }
 0x824   :  { %v4986_v17 = vmul.f32 %v9102_v39, %v9102_v39  ;;  %6310 = vmatprep.subr.bf16.mxu1 %v6611_v40 }
 0x825   :  { %v9109_v28 = vsub.f32 %v9002_v51, %v4955_v56  ;;  %6311 = vmatpush3.bf16.msra.mxu1 %v6611_v40 }
 0x826   :  { %v5016_v55 = vsel %vm34_vm0, %v4986_v17, 0.0  ;;  %v4928_v43 = vpop.xlane.xlu1 %4927  ;;  %v4931_v42 = vpop.xlane.xlu0 %4930 }
 0x827   :  { %5017 = vadd.xlane.f32.xlu1 %v5016_v55  ;;  %v4956_v8 = vmul.f32 0.03125, %v4928_v43  ;;  %v4957_v16 = vmul.f32 0.03125, %v4931_v42  ;;  %v4987_v59 = vmul.f32 %v9109_v28, %v9109_v28 }
 0x829   :  { %v9115_v46 = vsub.f32 %v9016_v29, %v4956_v8  ;;  %v9118_v23 = vsub.f32 %v9007_v13, %v4957_v16  ;;  %v5019_v9 = vsel %vm34_vm0, %v4987_v59, 0.0 }
 0x82a   :  { %v4934_v45 = vpop.xlane.xlu1 %4933  ;;  %5020 = vadd.xlane.f32.xlu0 %v5019_v9 }
 0x82b   :  { %v4958_v57 = vmul.f32 0.03125, %v4934_v45  ;;  %v4988_v3 = vmul.f32 %v9115_v46, %v9115_v46  ;;  %v4989_v41 = vmul.f32 %v9118_v23, %v9118_v23 }
 0x82d   :  { %v9126_v21 = vsub.f32 %v9021_v27, %v4958_v57  ;;  %v4937_v33 = vpop.xlane.xlu0 %4936  ;;  %v5022_v10 = vsel %vm34_vm0, %v4988_v3, 0.0  ;;  %v5025_v48 = vsel %vm34_vm0, %v4989_v41, 0.0 }
 0x82e   :  { %v4959_v1 = vmul.f32 0.03125, %v4937_v33  ;;  %5023 = vadd.xlane.f32.xlu1 %v5022_v10  ;;  %5026 = vadd.xlane.f32.xlu0 %v5025_v48 }
 0x82f   :  { %v4990_v20 = vmul.f32 %v9126_v21, %v9126_v21 }
 0x830   :  { %v9133_v14 = vsub.f32 %v9034_v30, %v4959_v1 }
 0x831   :  { %v4940_v35 = vpop.xlane.xlu1 %4939  ;;  %v4943_v37 = vpop.xlane.xlu0 %4942  ;;  %v5028_v49 = vsel %vm34_vm0, %v4990_v20, 0.0 }
 0x832   :  { %v4960_v4 = vmul.f32 0.03125, %v4940_v35  ;;  %v4961_v52 = vmul.f32 0.03125, %v4943_v37  ;;  %5029 = vadd.xlane.f32.xlu1 %v5028_v49  ;;  %v4991_v22 = vmul.f32 %v9133_v14, %v9133_v14 }
 0x834   :  { %v9142_v31 = vsub.f32 %v9048_v24, %v4960_v4  ;;  %v9145_v26 = vsub.f32 %v9039_v53, %v4961_v52  ;;  %v5031_v34 = vsel %vm34_vm0, %v4991_v22, 0.0 }
 0x835   :  { %v4946_v60 = vpop.xlane.xlu1 %4945  ;;  %5032 = vadd.xlane.f32.xlu0 %v5031_v34 }
 0x836   :  { %v4962_v11 = vmul.f32 0.03125, %v4946_v60  ;;  %v4992_v2 = vmul.f32 %v9142_v31, %v9142_v31  ;;  %v4993_v62 = vmul.f32 %v9145_v26, %v9145_v26 }
 0x838   :  { %v9156_v7 = vsub.f32 %v9053_v58, %v4962_v11  ;;  %v5034_v61 = vsel %vm34_vm0, %v4992_v2, 0.0  ;;  %v5037_v56 = vsel %vm34_vm0, %v4993_v62, 0.0 }
 0x839   :  { %5035 = vadd.xlane.f32.xlu1 %v5034_v61  ;;  %5038 = vadd.xlane.f32.xlu0 %v5037_v56 }
 0x83a   :  { %v4994_v17 = vmul.f32 %v9156_v7, %v9156_v7 }
 0x83c   :  { %v5040_v55 = vsel %vm34_vm0, %v4994_v17, 0.0 }
 0x83d   :  { %5041 = vadd.xlane.f32.xlu1 %v5040_v55 }
 0x899   :  { %v4997_v43 = vpop.xlane.xlu0 %4996 }
 0x89a   :  { %v5043_v42 = vmul.f32 0.03125, %v4997_v43 }
 0x89c   :  { %v5059_v8 = vadd.f32 1e-05, %v5043_v42 }
 0x89d   :  { %v5000_v16 = vpop.xlane.xlu1 %4999  ;;  %v5003_v59 = vpop.xlane.xlu0 %5002 }
 0x89e   :  { %v5044_v9 = vmul.f32 0.03125, %v5000_v16  ;;  %v5045_v45 = vmul.f32 0.03125, %v5003_v59  ;;  %6904 = vrsqrt.f32 %v5059_v8 }
 0x8a0   :  { %v5060_v57 = vadd.f32 1e-05, %v5044_v9  ;;  %v5061_v3 = vadd.f32 1e-05, %v5045_v45 }
 0x8a1   :  { %v5006_v41 = vpop.xlane.xlu1 %5005 }
 0x8a2   :  { %6906 = vrsqrt.f32 %v5060_v57  ;;  %v5046_v33 = vmul.f32 0.03125, %v5006_v41 }
 0x8a3   :  { %6908 = vrsqrt.f32 %v5061_v3 }
 0x8a4   :  { %v5062_v10 = vadd.f32 1e-05, %v5046_v33 }
 0x8a6   :  { %6910 = vrsqrt.f32 %v5062_v10 }
 0x8a8   :  { %v5009_v48 = vpop.xlane.xlu0 %5008 }
 0x8a9   :  { %v5047_v1 = vmul.f32 0.03125, %v5009_v48 }
 0x8ab   :  { %v5063_v20 = vadd.f32 1e-05, %v5047_v1  ;;  %v6905_v4 = vpop.eup %6904 }
 0x8ac   :  { %v5012_v35 = vpop.xlane.xlu1 %5011  ;;  %v5015_v37 = vpop.xlane.xlu0 %5014  ;;  %v5091_v11 = vmul.f32 %v6905_v4, %v9062_v25 }
 0x8ad   :  { %v5048_v49 = vmul.f32 0.03125, %v5012_v35  ;;  %v5049_v0 = vmul.f32 0.03125, %v5015_v37  ;;  %6912 = vrsqrt.f32 %v5063_v20 }
 0x8af   :  { %v5064_v52 = vadd.f32 1e-05, %v5048_v49  ;;  %v5065_v22 = vadd.f32 1e-05, %v5049_v0  ;;  %v6907_v34 = vpop.eup %6906 }
 0x8b0   :  { %v5018_v60 = vpop.xlane.xlu1 %5017  ;;  %v5092_v2 = vmul.f32 %v6907_v34, %v9067_v12  ;;  %v6909_v62 = vpop.eup %6908 }
 0x8b1   :  { %6914 = vrsqrt.f32 %v5064_v52  ;;  %v5050_v40 = vmul.f32 0.03125, %v5018_v60  ;;  %v5093_v43 = vmul.f32 %v6909_v62, %v9070_v32 }
 0x8b2   :  { %6916 = vrsqrt.f32 %v5065_v22  ;;  %v5107_v56 = vpack.c.bf16 %v5092_v2, %v5091_v11 }
 0x8b3   :  { %v5066_v61 = vadd.f32 1e-05, %v5050_v40  ;;  %v6911_v17 = vpop.eup %6910  ;;  %v5021_v55 = vpop.xlane.xlu0 %5020 }
 0x8b4   :  { %v5094_v42 = vmul.f32 %v6911_v17, %v9078_v38  ;;  %v5051_v8 = vmul.f32 0.03125, %v5021_v55  ;;  %6312 = vmatprep.mubr.msk.bf16.mxu1 %vm34_vm0, %v5107_v56 }
 0x8b5   :  { %6918 = vrsqrt.f32 %v5066_v61 }
 0x8b6   :  { %v5067_v16 = vadd.f32 1e-05, %v5051_v8  ;;  %v5108_v59 = vpack.c.bf16 %v5094_v42, %v5093_v43 }
 0x8b7   :  { %v5024_v9 = vpop.xlane.xlu1 %5023  ;;  %v5027_v25 = vpop.xlane.xlu0 %5026 }
 0x8b8   :  { %v5052_v45 = vmul.f32 0.03125, %v5024_v9  ;;  %v5053_v12 = vmul.f32 0.03125, %v5027_v25  ;;  %6313 = vmatmul.mubr.msk.bf16.vlgmr.msra.gmra.mxu1 %vm34_vm0, %v5108_v59  ;;  %6920 = vrsqrt.f32 %v5067_v16 }
 0x8ba   :  { %v5068_v57 = vadd.f32 1e-05, %v5052_v45  ;;  %v5069_v3 = vadd.f32 1e-05, %v5053_v12  ;;  %v6913_v41 = vpop.eup %6912 }
 0x8bb   :  { %v5030_v33 = vpop.xlane.xlu1 %5029  ;;  %v5095_v1 = vmul.f32 %v6913_v41, %v9086_v63 }
 0x8bc   :  { %6922 = vrsqrt.f32 %v5068_v57  ;;  %v5054_v32 = vmul.f32 0.03125, %v5030_v33 }
 0x8bd   :  { %6924 = vrsqrt.f32 %v5069_v3 }
 0x8be   :  { %v6915_v38 = vpop.eup %6914  ;;  %v5070_v10 = vadd.f32 1e-05, %v5054_v32  ;;  %v5033_v48 = vpop.xlane.xlu0 %5032 }
 0x8bf   :  { %v5096_v20 = vmul.f32 %v6915_v38, %v9091_v44  ;;  %v6917_v35 = vpop.eup %6916  ;;  %v5055_v37 = vmul.f32 0.03125, %v5033_v48 }
 0x8c0   :  { %6926 = vrsqrt.f32 %v5070_v10  ;;  %v5097_v34 = vmul.f32 %v6917_v35, %v9094_v50 }
 0x8c1   :  { %v5109_v49 = vpack.c.bf16 %v5096_v20, %v5095_v1  ;;  %v5071_v4 = vadd.f32 1e-05, %v5055_v37 }
 0x8c2   :  { %v6919_v0 = vpop.eup %6918  ;;  %v5036_v52 = vpop.xlane.xlu1 %5035 }
 0x8c3   :  { %6316 = vmatprep.mubr.msk.bf16.mxu1 %vm34_vm0, %v5109_v49  ;;  %v5039_v22 = vpop.xlane.xlu0 %5038  ;;  %v5098_v60 = vmul.f32 %v6919_v0, %v9102_v39  ;;  %v5056_v40 = vmul.f32 0.03125, %v5036_v52  ;;  %6928 = vrsqrt.f32 %v5071_v4 }
 0x8c4   :  { %v5057_v11 = vmul.f32 0.03125, %v5039_v22 }
 0x8c5   :  { %v5110_v2 = vpack.c.bf16 %v5098_v60, %v5097_v34  ;;  %v5072_v63 = vadd.f32 1e-05, %v5056_v40  ;;  %v6921_v61 = vpop.eup %6920 }
 0x8c6   :  { %v5073_v44 = vadd.f32 1e-05, %v5057_v11  ;;  %v5042_v62 = vpop.xlane.xlu1 %5041  ;;  %v5099_v43 = vmul.f32 %v6921_v61, %v9109_v28 }
 0x8c7   :  { %6317 = vmatmul.mubr.msk.bf16.gmra.mxu1 %vm34_vm0, %v5110_v2  ;;  %6930 = vrsqrt.f32 %v5072_v63  ;;  %v5058_v56 = vmul.f32 0.03125, %v5042_v62 }
 0x8c8   :  { %6932 = vrsqrt.f32 %v5073_v44 }
 0x8c9   :  { %v6923_v17 = vpop.eup %6922  ;;  %v5074_v55 = vadd.f32 1e-05, %v5058_v56 }
 0x8ca   :  { %v5100_v50 = vmul.f32 %v6923_v17, %v9115_v46  ;;  %v6925_v39 = vpop.eup %6924 }
 0x8cb   :  { %6934 = vrsqrt.f32 %v5074_v55  ;;  %v5101_v16 = vmul.f32 %v6925_v39, %v9118_v23 }
 0x8cc   :  { %v5111_v42 = vpack.c.bf16 %v5100_v50, %v5099_v43 }
 0x8cd   :  { %v6927_v8 = vpop.eup %6926 }
 0x8ce   :  { %6320 = vmatprep.mubr.msk.bf16.mxu1 %vm34_vm0, %v5111_v42  ;;  %v5102_v59 = vmul.f32 %v6927_v8, %v9126_v21  ;;  %v6612_v21 = vld [vmem:[%s9424_s1 + $0x48] sm:$0xff]  }
 0x8cf   :  { %6328 = vmatprep.subr.bf16.mxu0 %v6612_v21 }
 0x8d0   :  { %v5112_v9 = vpack.c.bf16 %v5102_v59, %v5101_v16  ;;  %v6929_v25 = vpop.eup %6928  ;;  %6329 = vmatpush3.bf16.msra.mxu0 %v6612_v21 }
 0x8d1   :  { %v5103_v12 = vmul.f32 %v6929_v25, %v9133_v14  ;;  %v6613_v14 = vld [vmem:[%s9424_s1 + $0x40] sm:$0xff]  }
 0x8d2   :  { %6321 = vmatmul.mubr.msk.bf16.gmra.mxu1 %vm34_vm0, %v5112_v9  ;;  %6330 = vmatprep.subr.bf16.mxu0 %v6613_v14 }
 0x8d4   :  { %v6931_v45 = vpop.eup %6930  ;;  %6331 = vmatpush3.bf16.msra.mxu0 %v6613_v14 }
 0x8d5   :  { %v5104_v28 = vmul.f32 %v6931_v45, %v9142_v31  ;;  %v6933_v46 = vpop.eup %6932  ;;  %v6614_v31 = vld [vmem:[%s9424_s1 + $0x38] sm:$0xff]  }
 0x8d6   :  { %v5105_v41 = vmul.f32 %v6933_v46, %v9145_v26  ;;  %6332 = vmatprep.subr.bf16.mxu0 %v6614_v31  ;;  %v6615_v26 = vld [vmem:[%s9424_s1 + $0x30] sm:$0xff]  }
 0x8d7   :  { %v5113_v57 = vpack.c.bf16 %v5104_v28, %v5103_v12 }
 0x8d8   :  { %v6935_v3 = vpop.eup %6934  ;;  %6333 = vmatpush3.bf16.msra.mxu0 %v6614_v31 }
 0x8d9   :  { %6324 = vmatprep.mubr.msk.bf16.mxu1 %vm34_vm0, %v5113_v57  ;;  %v5106_v23 = vmul.f32 %v6935_v3, %v9156_v7  ;;  %6334 = vmatprep.subr.bf16.mxu0 %v6615_v26  ;;  %v9202_v7 = vld [vmem:[%s9425_s2 + $0x2] ss:$0 sm:$0xff] }
 0x8db   :  { %v5114_v33 = vpack.c.bf16 %v5106_v23, %v5105_v41 }
 0x8dc   :  { %6335 = vmatpush3.bf16.msra.mxu0 %v6615_v26 }
 0x8dd   :  { %6325 = vmatmul.mubr.msk.bf16.gmra.mxu1 %vm34_vm0, %v5114_v33 }
 0x978   :  { %v6314_v32 = vpop.f32.mrf.mxu1 }
 0x979   :  { %v9205_v38 = vadd.f32 %v6314_v32, %v9202_v7 }
 0x97a   :  { %v5194_v10 = vpop.f32.mrf.mxu1 }
 0x97b   :  { %v5275_v48 = vmul.f32 0.044715, %v9205_v38  ;;  %v9209_v1 = vadd.f32 %v9202_v7, %v5194_v10 }
 0x97c   :  { %v6315_v20 = vpop.f32.mrf.mxu1 }
 0x97d   :  { %v5291_v35 = vmul.f32 %v5275_v48, %v9205_v38  ;;  %v5273_v37 = vmul.f32 0.044715, %v9209_v1  ;;  %v9214_v49 = vadd.f32 %v6315_v20, %v9202_v7 }
 0x97e   :  { %v5197_v0 = vpop.f32.mrf.mxu1 }
 0x97f   :  { %v5307_v4 = vmul.f32 %v5291_v35, %v9205_v38  ;;  %v5289_v52 = vmul.f32 %v5273_v37, %v9209_v1  ;;  %v5276_v22 = vmul.f32 0.044715, %v9214_v49  ;;  %v9220_v34 = vadd.f32 %v9202_v7, %v5197_v0 }
 0x981   :  { %v5323_v60 = vadd.f32 %v5307_v4, %v9205_v38  ;;  %v5305_v40 = vmul.f32 %v5289_v52, %v9209_v1  ;;  %v5292_v11 = vmul.f32 %v5276_v22, %v9214_v49  ;;  %v5274_v2 = vmul.f32 0.044715, %v9220_v34 }
 0x983   :  { %v5339_v63 = vmul.f32 0.7978845, %v5323_v60  ;;  %v5321_v44 = vadd.f32 %v5305_v40, %v9209_v1  ;;  %v5308_v62 = vmul.f32 %v5292_v11, %v9214_v49  ;;  %v5290_v61 = vmul.f32 %v5274_v2, %v9220_v34 }
 0x985   :  { %v5337_v56 = vmul.f32 0.7978845, %v5321_v44  ;;  %v5324_v17 = vadd.f32 %v5308_v62, %v9214_v49  ;;  %v5306_v55 = vmul.f32 %v5290_v61, %v9220_v34  ;;  %6936 = vtanh.f32 %v5339_v63 }
 0x986   :  { %v5257_v61 = vmul.f32 0.5, %v9209_v1 }
 0x987   :  { %v6318_v43 = vpop.f32.mrf.mxu1  ;;  %v5340_v50 = vmul.f32 0.7978845, %v5324_v17  ;;  %6938 = vtanh.f32 %v5337_v56  ;;  %v5322_v42 = vadd.f32 %v5306_v55, %v9220_v34 }
 0x988   :  { %v9232_v39 = vadd.f32 %v6318_v43, %v9202_v7  ;;  %v5260_v43 = vmul.f32 0.5, %v9214_v49 }
 0x989   :  { %v5210_v8 = vpop.f32.mrf.mxu1  ;;  %6940 = vtanh.f32 %v5340_v50  ;;  %v5338_v9 = vmul.f32 0.7978845, %v5322_v42 }
 0x98a   :  { %v5279_v16 = vmul.f32 0.044715, %v9232_v39  ;;  %v9237_v59 = vadd.f32 %v9202_v7, %v5210_v8 }
 0x98b   :  { %v6319_v25 = vpop.f32.mrf.mxu1  ;;  %6942 = vtanh.f32 %v5338_v9 }
 0x98c   :  { %v5295_v45 = vmul.f32 %v5279_v16, %v9232_v39  ;;  %v5277_v12 = vmul.f32 0.044715, %v9237_v59  ;;  %v9242_v28 = vadd.f32 %v6319_v25, %v9202_v7 }
 0x98d   :  { %v5213_v46 = vpop.f32.mrf.mxu1 }
 0x98e   :  { %v5311_v57 = vmul.f32 %v5295_v45, %v9232_v39  ;;  %v5293_v3 = vmul.f32 %v5277_v12, %v9237_v59  ;;  %v5280_v41 = vmul.f32 0.044715, %v9242_v28  ;;  %v9248_v23 = vadd.f32 %v9202_v7, %v5213_v46 }
 0x98f   :  { %v5258_v12 = vmul.f32 0.5, %v9220_v34 }
 0x990   :  { %v5327_v33 = vadd.f32 %v5311_v57, %v9232_v39  ;;  %v5309_v21 = vmul.f32 %v5293_v3, %v9237_v59  ;;  %v5296_v14 = vmul.f32 %v5280_v41, %v9242_v28  ;;  %v5278_v31 = vmul.f32 0.044715, %v9248_v23 }
 0x991   :  { %v5259_v3 = vmul.f32 0.5, %v9205_v38 }
 0x992   :  { %v5343_v26 = vmul.f32 0.7978845, %v5327_v33  ;;  %v5325_v32 = vadd.f32 %v5309_v21, %v9237_v59  ;;  %v5312_v10 = vmul.f32 %v5296_v14, %v9242_v28  ;;  %v5294_v48 = vmul.f32 %v5278_v31, %v9248_v23  ;;  %v6322_v20 = vpop.f32.mrf.mxu1  ;;  %v6937_v0 = vpop.eup %6936 }
 0x993   :  { %v9260_v52 = vadd.f32 %v6322_v20, %v9202_v7  ;;  %v5371_v25 = vadd.f32 1.0, %v6937_v0 }
 0x994   :  { %v5341_v35 = vmul.f32 0.7978845, %v5325_v32  ;;  %v5328_v37 = vadd.f32 %v5312_v10, %v9242_v28  ;;  %v5310_v4 = vmul.f32 %v5294_v48, %v9248_v23  ;;  %v5226_v22 = vpop.f32.mrf.mxu1  ;;  %v6939_v60 = vpop.eup %6938  ;;  %6944 = vtanh.f32 %v5343_v26 }
 0x995   :  { %v9263_v11 = vadd.f32 %v9202_v7, %v5226_v22  ;;  %v5283_v44 = vmul.f32 0.044715, %v9260_v52  ;;  %v5369_v16 = vadd.f32 1.0, %v6939_v60  ;;  %v5387_v32 = vmul.f32 %v5371_v25, %v5259_v3 }
 0x996   :  { %v5344_v40 = vmul.f32 0.7978845, %v5328_v37  ;;  %v6941_v2 = vpop.eup %6940  ;;  %6946 = vtanh.f32 %v5341_v35  ;;  %v5326_v63 = vadd.f32 %v5310_v4, %v9248_v23  ;;  %v6323_v62 = vpop.f32.mrf.mxu1 }
 0x997   :  { %v5372_v56 = vadd.f32 1.0, %v6941_v2  ;;  %v5281_v17 = vmul.f32 0.044715, %v9263_v11  ;;  %v9270_v55 = vadd.f32 %v6323_v62, %v9202_v7  ;;  %v5299_v42 = vmul.f32 %v5283_v44, %v9260_v52 }
 0x998   :  { %6948 = vtanh.f32 %v5344_v40  ;;  %v5342_v50 = vmul.f32 0.7978845, %v5326_v63  ;;  %v5229_v8 = vpop.f32.mrf.mxu1  ;;  %v6943_v9 = vpop.eup %6942  ;;  %v5385_v26 = vmul.f32 %v5369_v16, %v5257_v61 }
 0x999   :  { %v5297_v45 = vmul.f32 %v5281_v17, %v9263_v11  ;;  %v5284_v1 = vmul.f32 0.044715, %v9270_v55  ;;  %v5315_v46 = vmul.f32 %v5299_v42, %v9260_v52  ;;  %v9279_v57 = vadd.f32 %v9202_v7, %v5229_v8 }
 0x99a   :  { %6950 = vtanh.f32 %v5342_v50  ;;  %v5370_v49 = vadd.f32 1.0, %v6943_v9  ;;  %v5388_v41 = vmul.f32 %v5372_v56, %v5260_v43 }
 0x99b   :  { %v5313_v33 = vmul.f32 %v5297_v45, %v9263_v11  ;;  %v5300_v21 = vmul.f32 %v5284_v1, %v9270_v55  ;;  %v5331_v14 = vadd.f32 %v5315_v46, %v9260_v52  ;;  %v5282_v31 = vmul.f32 0.044715, %v9279_v57 }
 0x99c   :  { %v5386_v34 = vmul.f32 %v5370_v49, %v5258_v12  ;;  %v5402_v4 = vpack.c.bf16 %v5388_v41, %v5387_v32  ;;  %v5261_v49 = vmul.f32 0.5, %v9237_v59  ;;  %v5262_v59 = vmul.f32 0.5, %v9248_v23 }
 0x99d   :  { %v5329_v10 = vadd.f32 %v5313_v33, %v9263_v11  ;;  %v5316_v48 = vmul.f32 %v5300_v21, %v9270_v55  ;;  %v6326_v20 = vpop.f32.mrf.mxu1  ;;  %v5347_v35 = vmul.f32 0.7978845, %v5331_v14  ;;  %v5298_v38 = vmul.f32 %v5282_v31, %v9279_v57 }
 0x99e   :  { %v9290_v37 = vadd.f32 %v6326_v20, %v9202_v7  ;;  %v5401_v0 = vpack.c.bf16 %v5386_v34, %v5385_v26  ;;  %v5264_v31 = vmul.f32 0.5, %v9242_v28  ;;  %v5263_v20 = vmul.f32 0.5, %v9232_v39 }
 0x99f   :  { %v5345_v22 = vmul.f32 0.7978845, %v5329_v10  ;;  %v5332_v60 = vadd.f32 %v5316_v48, %v9270_v55  ;;  %v5242_v40 = vpop.f32.mrf.mxu1  ;;  %v5314_v2 = vmul.f32 %v5298_v38, %v9279_v57  ;;  %6952 = vtanh.f32 %v5347_v35 }
 0x9a0   :  { %v5287_v63 = vmul.f32 0.044715, %v9290_v37  ;;  %6336 = vmatprep.mubr.msk.bf16.mxu0 %vm5446_vm5, %v5401_v0  ;;  %v9297_v62 = vadd.f32 %v9202_v7, %v5242_v40 }
 0x9a1   :  { %v5348_v44 = vmul.f32 0.7978845, %v5332_v60  ;;  %6337 = vmatmul.mubr.msk.bf16.vlgmr.msra.gmra.mxu0 %vm5446_vm5, %v5402_v4  ;;  %v6327_v61 = vpop.f32.mrf.mxu1  ;;  %v6945_v56 = vpop.eup %6944  ;;  %6954 = vtanh.f32 %v5345_v22  ;;  %v5330_v17 = vadd.f32 %v5314_v2, %v9279_v57 }
 0x9a2   :  { %v5303_v43 = vmul.f32 %v5287_v63, %v9290_v37  ;;  %v9303_v50 = vadd.f32 %v6327_v61, %v9202_v7  ;;  %v5285_v8 = vmul.f32 0.044715, %v9297_v62  ;;  %v5375_v32 = vadd.f32 1.0, %v6945_v56 }
 0x9a3   :  { %v6947_v42 = vpop.eup %6946  ;;  %6956 = vtanh.f32 %v5348_v44  ;;  %v5245_v16 = vpop.f32.mrf.mxu1  ;;  %v5346_v25 = vmul.f32 0.7978845, %v5330_v17 }
 0x9a4   :  { %v5319_v45 = vmul.f32 %v5303_v43, %v9290_v37  ;;  %v5288_v1 = vmul.f32 0.044715, %v9303_v50  ;;  %v5301_v12 = vmul.f32 %v5285_v8, %v9297_v62  ;;  %v9310_v46 = vadd.f32 %v9202_v7, %v5245_v16 }
 0x9a5   :  { %v6949_v9 = vpop.eup %6948  ;;  %6958 = vtanh.f32 %v5346_v25  ;;  %v5373_v21 = vadd.f32 1.0, %v6947_v42  ;;  %v5391_v2 = vmul.f32 %v5375_v32, %v5263_v20  ;;  %v5271_v20 = vmul.f32 0.5, %v9290_v37 }
 0x9a6   :  { %v5376_v3 = vadd.f32 1.0, %v6949_v9  ;;  %v5335_v41 = vadd.f32 %v5319_v45, %v9290_v37  ;;  %v5304_v33 = vmul.f32 %v5288_v1, %v9303_v50  ;;  %v5317_v26 = vmul.f32 %v5301_v12, %v9297_v62 }
 0x9a7   :  { %v6951_v14 = vpop.eup %6950  ;;  %v5286_v34 = vmul.f32 0.044715, %v9310_v46  ;;  %v5389_v4 = vmul.f32 %v5373_v21, %v5261_v49  ;;  %v5268_v9 = vmul.f32 0.5, %v9270_v55  ;;  %v5265_v45 = vmul.f32 0.5, %v9263_v11 }
 0x9a8   :  { %v5351_v10 = vmul.f32 0.7978845, %v5335_v41  ;;  %v5320_v7 = vmul.f32 %v5304_v33, %v9303_v50  ;;  %v5374_v48 = vadd.f32 1.0, %v6951_v14  ;;  %v5333_v35 = vadd.f32 %v5317_v26, %v9297_v62 }
 0x9a9   :  { %v5302_v38 = vmul.f32 %v5286_v34, %v9310_v46  ;;  %v5392_v0 = vmul.f32 %v5376_v3, %v5264_v31  ;;  %v5266_v1 = vmul.f32 0.5, %v9279_v57  ;;  %v5267_v49 = vmul.f32 0.5, %v9260_v52 }
 0x9aa   :  { %v5336_v28 = vadd.f32 %v5320_v7, %v9303_v50  ;;  %v5390_v22 = vmul.f32 %v5374_v48, %v5262_v59  ;;  %v5349_v60 = vmul.f32 0.7978845, %v5333_v35  ;;  %6960 = vtanh.f32 %v5351_v10 }
 0x9ab   :  { %v5318_v40 = vmul.f32 %v5302_v38, %v9310_v46  ;;  %v5404_v39 = vpack.c.bf16 %v5392_v0, %v5391_v2  ;;  %v5272_v57 = vmul.f32 0.5, %v9303_v50  ;;  %v5269_v52 = vmul.f32 0.5, %v9297_v62  ;;  %v5701_v50 = vld [vmem:[%s9425_s2 + $0x3] ss:$0 sm:$0xff] }
 0x9ac   :  { %v5352_v63 = vmul.f32 0.7978845, %v5336_v28  ;;  %v5403_v44 = vpack.c.bf16 %v5390_v22, %v5389_v4  ;;  %6962 = vtanh.f32 %v5349_v60  ;;  %v6953_v61 = vpop.eup %6952  ;;  %v5270_v59 = vmul.f32 0.5, %v9310_v46 }
 0x9ad   :  { %v5334_v23 = vadd.f32 %v5318_v40, %v9310_v46  ;;  %v5379_v25 = vadd.f32 1.0, %v6953_v61 }
 0x9ae   :  { %6964 = vtanh.f32 %v5352_v63  ;;  %6340 = vmatprep.mubr.msk.bf16.mxu0 %vm5446_vm5, %v5403_v44  ;;  %v6955_v56 = vpop.eup %6954 }
 0x9af   :  { %v5350_v17 = vmul.f32 0.7978845, %v5334_v23  ;;  %6341 = vmatmul.mubr.msk.bf16.gmra.mxu0 %vm5446_vm5, %v5404_v39  ;;  %v5377_v8 = vadd.f32 1.0, %v6955_v56  ;;  %v5395_v21 = vmul.f32 %v5379_v25, %v5267_v49 }
 0x9b0   :  { %v6957_v43 = vpop.eup %6956 }
 0x9b1   :  { %6966 = vtanh.f32 %v5350_v17  ;;  %v5380_v42 = vadd.f32 1.0, %v6957_v43  ;;  %v5393_v41 = vmul.f32 %v5377_v8, %v5265_v45 }
 0x9b2   :  { %v6959_v16 = vpop.eup %6958 }
 0x9b3   :  { %v5378_v12 = vadd.f32 1.0, %v6959_v16  ;;  %v5396_v3 = vmul.f32 %v5380_v42, %v5268_v9 }
 0x9b5   :  { %v5394_v33 = vmul.f32 %v5378_v12, %v5266_v1  ;;  %v5406_v26 = vpack.c.bf16 %v5396_v3, %v5395_v21 }
 0x9b7   :  { %v5405_v14 = vpack.c.bf16 %v5394_v33, %v5393_v41  ;;  %v6961_v31 = vpop.eup %6960 }
 0x9b8   :  { %v5383_v7 = vadd.f32 1.0, %v6961_v31 }
 0x9b9   :  { %v6963_v34 = vpop.eup %6962  ;;  %6344 = vmatprep.mubr.msk.bf16.mxu0 %vm5446_vm5, %v5405_v14 }
 0x9ba   :  { %6345 = vmatmul.mubr.msk.bf16.gmra.mxu0 %vm5446_vm5, %v5406_v26  ;;  %v5381_v11 = vadd.f32 1.0, %v6963_v34  ;;  %v5399_v28 = vmul.f32 %v5383_v7, %v5271_v20 }
 0x9bb   :  { %v6965_v32 = vpop.eup %6964 }
 0x9bc   :  { %v5384_v55 = vadd.f32 1.0, %v6965_v32  ;;  %v5397_v38 = vmul.f32 %v5381_v11, %v5269_v52 }
 0x9be   :  { %v6967_v10 = vpop.eup %6966  ;;  %v5400_v35 = vmul.f32 %v5384_v55, %v5272_v57 }
 0x9bf   :  { %v5382_v48 = vadd.f32 1.0, %v6967_v10 }
 0x9c0   :  { %v5408_v22 = vpack.c.bf16 %v5400_v35, %v5399_v28 }
 0x9c1   :  { %v5398_v0 = vmul.f32 %v5382_v48, %v5270_v59 }
 0x9c3   :  { %v5407_v4 = vpack.c.bf16 %v5398_v0, %v5397_v38 }
 0x9c5   :  { %6348 = vmatprep.mubr.msk.bf16.mxu0 %vm5446_vm5, %v5407_v4 }
 0x9c6   :  { %6349 = vmatmul.mubr.msk.bf16.gmra.mxu0 %vm5446_vm5, %v5408_v22 }
 0xa61   :  { %v6338_v62 = vpop.f32.mrf.mxu0 }
 0xa62   :  { %v5514_v60 = vadd.f32 %v6338_v62, %v5701_v50 }
 0xa63   :  { %v5505_v46 = vpop.f32.mrf.mxu0 }
 0xa64   :  { %v5570_v40 = vadd.f32 %v5514_v60, %v8943_v5  ;;  %v5506_v37 = vadd.f32 %v5701_v50, %v5505_v46 }
 0xa65   :  { %v6339_v2 = vpop.f32.mrf.mxu0 }
 0xa66   :  { %5586 = vst.msk [vmem:[%s9427_s4 + $0x10] sm:$0xff] %vm34_vm0, %v5570_v40  ;;  %v5568_v63 = vadd.f32 %v5506_v37, %v8938_v19  ;;  %v5517_v44 = vadd.f32 %v6339_v2, %v5701_v50 }
 0xa67   :  { %v5508_v23 = vpop.f32.mrf.mxu0 }
 0xa68   :  { %5584 = vst.msk [vmem:[%s9427_s4] sm:$0xff] %vm34_vm0, %v5568_v63  ;;  %v5571_v39 = vadd.f32 %v5517_v44, %v8957_v6  ;;  %v5509_v61 = vadd.f32 %v5701_v50, %v5508_v23 }
 0xa6a   :  { %5587 = vst.msk [vmem:[%s9427_s4 + $0x18] sm:$0xff] %vm34_vm0, %v5571_v39  ;;  %v5569_v5 = vadd.f32 %v5509_v61, %v8952_v47 }
 0xa6c   :  { %5585 = vst.msk [vmem:[%s9427_s4 + $0x8] sm:$0xff] %vm34_vm0, %v5569_v5 }
 0xa6f   :  { %v6342_v19 = vpop.f32.mrf.mxu0 }
 0xa70   :  { %v5530_v56 = vadd.f32 %v6342_v19, %v5701_v50 }
 0xa71   :  { %v5521_v17 = vpop.f32.mrf.mxu0 }
 0xa72   :  { %v5574_v43 = vadd.f32 %v5530_v56, %v8975_v36  ;;  %v5522_v42 = vadd.f32 %v5701_v50, %v5521_v17 }
 0xa73   :  { %v6343_v6 = vpop.f32.mrf.mxu0 }
 0xa74   :  { %5590 = vst.msk [vmem:[%s9427_s4 + $0x30] sm:$0xff] %vm34_vm0, %v5574_v43  ;;  %v5572_v8 = vadd.f32 %v5522_v42, %v8970_v18  ;;  %v5533_v47 = vadd.f32 %v6343_v6, %v5701_v50 }
 0xa75   :  { %v5524_v16 = vpop.f32.mrf.mxu0 }
 0xa76   :  { %5588 = vst.msk [vmem:[%s9427_s4 + $0x20] sm:$0xff] %vm34_vm0, %v5572_v8  ;;  %v5575_v9 = vadd.f32 %v5533_v47, %v8989_v54  ;;  %v5525_v25 = vadd.f32 %v5701_v50, %v5524_v16 }
 0xa78   :  { %5591 = vst.msk [vmem:[%s9427_s4 + $0x38] sm:$0xff] %vm34_vm0, %v5575_v9  ;;  %v5573_v36 = vadd.f32 %v5525_v25, %v8984_v15 }
 0xa7a   :  { %5589 = vst.msk [vmem:[%s9427_s4 + $0x28] sm:$0xff] %vm34_vm0, %v5573_v36  ;;  %v6346_v18 = vpop.f32.mrf.mxu0 }
 0xa7b   :  { %v5546_v45 = vadd.f32 %v6346_v18, %v5701_v50 }
 0xa7c   :  { %v5537_v1 = vpop.f32.mrf.mxu0 }
 0xa7d   :  { %v5578_v12 = vadd.f32 %v5546_v45, %v9007_v13  ;;  %v5538_v49 = vadd.f32 %v5701_v50, %v5537_v1 }
 0xa7e   :  { %v6347_v54 = vpop.f32.mrf.mxu0 }
 0xa7f   :  { %5594 = vst.msk [vmem:[%s9427_s4 + $0x50] sm:$0xff] %vm34_vm0, %v5578_v12  ;;  %v5576_v3 = vadd.f32 %v5538_v49, %v9002_v51  ;;  %v5549_v15 = vadd.f32 %v6347_v54, %v5701_v50 }
 0xa80   :  { %v5540_v41 = vpop.f32.mrf.mxu0 }
 0xa81   :  { %5592 = vst.msk [vmem:[%s9427_s4 + $0x40] sm:$0xff] %vm34_vm0, %v5576_v3  ;;  %v5579_v33 = vadd.f32 %v5549_v15, %v9021_v27  ;;  %v5541_v21 = vadd.f32 %v5701_v50, %v5540_v41 }
 0xa83   :  { %5595 = vst.msk [vmem:[%s9427_s4 + $0x58] sm:$0xff] %vm34_vm0, %v5579_v33  ;;  %v5577_v13 = vadd.f32 %v5541_v21, %v9016_v29 }
 0xa85   :  { %5593 = vst.msk [vmem:[%s9427_s4 + $0x48] sm:$0xff] %vm34_vm0, %v5577_v13 }
 0xa86   :  { %v6350_v51 = vpop.f32.mrf.mxu0 }
 0xa87   :  { %v5562_v14 = vadd.f32 %v6350_v51, %v5701_v50 }
 0xa88   :  { %v5553_v31 = vpop.f32.mrf.mxu0 }
 0xa89   :  { %v5582_v26 = vadd.f32 %v5562_v14, %v9039_v53  ;;  %v5554_v34 = vadd.f32 %v5701_v50, %v5553_v31 }
 0xa8a   :  { %v6351_v27 = vpop.f32.mrf.mxu0 }
 0xa8b   :  { %5598 = vst.msk [vmem:[%s9427_s4 + $0x70] sm:$0xff] %vm34_vm0, %v5582_v26  ;;  %v5580_v32 = vadd.f32 %v5554_v34, %v9034_v30  ;;  %v5565_v29 = vadd.f32 %v6351_v27, %v5701_v50 }
 0xa8c   :  { %v5556_v55 = vpop.f32.mrf.mxu0 }
 0xa8d   :  { %5596 = vst.msk [vmem:[%s9427_s4 + $0x60] sm:$0xff] %vm34_vm0, %v5580_v32  ;;  %v5583_v11 = vadd.f32 %v5565_v29, %v9053_v58  ;;  %v5557_v10 = vadd.f32 %v5701_v50, %v5556_v55 }
 0xa8f   :  { %5599 = vst.msk [vmem:[%s9427_s4 + $0x78] sm:$0xff] %vm34_vm0, %v5583_v11  ;;  %v5581_v53 = vadd.f32 %v5557_v10, %v9048_v24 }
 0xa91   :  { %5597 = vst.msk [vmem:[%s9427_s4 + $0x68] sm:$0xff] %vm34_vm0, %v5581_v53 }

</bundles_post_ra>
